<compile_context>
chip_gen: v7x
topology: tpu7x:2x2x1
jax: 0.10.0
libtpu: 0.0.40
codegen_flags: <defaults>
</compile_context>

<pallas_src>
import jax
import jax.numpy as jnp
from jax import lax
from jax.experimental import pallas as pl
from jax.experimental.pallas import tpu as pltpu

LANES = 128   # lane-padded channel width for activations / weights
W_OFF = 8     # sublane-aligned start of the interior along the scratch W axis


def _fused_net_kernel(x_ref, w1_ref, b1_ref, w2_ref, b2_ref, w3_ref, b3_ref,
                      o_ref, h1p_ref, h2p_ref):
    """Fused conv1->conv2->conv3 for one batch block.

    x_ref : (n_blk, H+2, W+2, 128)  spatially padded, lane-padded input
    w1_ref: (9, 128, 128)   per-tap weight matrices (cin-lane -> cout-lane)
    b1_ref: (1, 128)        lane-padded bias
    w2_ref: (9, 128, 128), b2_ref: (1, 128)
    w3_ref: (9, 128)        last layer has one output channel
    b3_ref: (1,)            SMEM scalar
    o_ref : (1, 1, n_blk*H*W)  lane-dense output block
    h1p_ref, h2p_ref: (n_blk, H+2, W_OFF+W+2, 128) padded activation scratch
    """
    n_blk = x_ref.shape[0]
    H = x_ref.shape[1] - 2
    W = x_ref.shape[2] - 2
    C = x_ref.shape[3]
    M = n_blk * H * W

    # Zero the padded scratch only on the first step of the inner (arbitrary)
    # grid axis.  Interiors are fully overwritten every step; the halo ring is
    # never written again and stays zero.  Keying on the *arbitrary* axis (not
    # the parallel one) keeps this correct when the parallel axis is split
    # across TensorCores, because every core re-runs q==0 for its own p's.
    @pl.when(pl.program_id(1) == 0)
    def _():
        h1p_ref[...] = jnp.zeros(h1p_ref.shape, h1p_ref.dtype)
        h2p_ref[...] = jnp.zeros(h2p_ref.shape, h2p_ref.dtype)

    def conv3x3(src_ref, w_ref, b_row, off):
        """3x3 'same' conv as 9 lane-aligned (M,128)x(128,128) MXU matmuls."""
        acc = None
        t = 0
        for dy in range(3):
            for dx in range(3):
                tap = src_ref[:, dy:dy + H, off + dx:off + dx + W, :]
                tap = tap.reshape(M, C)            # leading-dim collapse only
                p = jnp.dot(tap, w_ref[t], preferred_element_type=jnp.float32)
                acc = p if acc is None else acc + p
                t += 1
        return acc + b_row                          # (M, C) f32

    # ---- layer 1: 30 -> 64 (lane pads carry exact zeros) --------------------
    h1 = conv3x3(x_ref, w1_ref, b1_ref[...], 0)
    h1p_ref[:, 1:H + 1, W_OFF:W_OFF + W, :] = (
        h1.reshape(n_blk, H, W, C).astype(h1p_ref.dtype))

    # ---- layer 2: 64 -> 16 ---------------------------------------------------
    h2 = conv3x3(h1p_ref, w2_ref, b2_ref[...], W_OFF - 1)
    h2p_ref[:, 1:H + 1, W_OFF:W_OFF + W, :] = (
        h2.reshape(n_blk, H, W, C).astype(h2p_ref.dtype))

    # ---- layer 3: 16 -> 1 ----------------------------------------------------
    # Per-tap full-lane VPU MAC, then a single lane-reduction matmul whose
    # (1, M) result is already lane-dense for the output store.
    acc3 = None
    t = 0
    for dy in range(3):
        for dx in range(3):
            tap = h2p_ref[:, dy:dy + H,
                          (W_OFF - 1) + dx:(W_OFF - 1) + dx + W, :]
            tap = tap.reshape(M, C).astype(jnp.float32)
            term = tap * w3_ref[t]                  # (M, C) * (C,)
            acc3 = term if acc3 is None else acc3 + term
            t += 1
    ones_row = jnp.ones((1, C), jnp.float32)
    out_row = lax.dot_general(ones_row, acc3,
                              dimension_numbers=(((1,), (1,)), ((), ())),
                              preferred_element_type=jnp.float32)   # (1, M)
    out_row = out_row + b3_ref[0]
    o_ref[...] = out_row.reshape(1, 1, M).astype(o_ref.dtype)


def net_forward(x_nchw, params, *, batch_block=1, compute_dtype=jnp.float32):
    """Forward pass of Net. x_nchw: (N, 30, H, W) f32. Returns (N, H, W) f32.

    compute_dtype=jnp.bfloat16 stores activations/weights in bf16 (f32 accum)
    for v6e/v7x; default f32 matches PyTorch numerics (v5e-friendly).
    batch_block folds several images into the matmul M dimension for large N.
    """
    (w1, b1), (w2, b2), (w3, b3) = params
    N, C0, H, W = x_nchw.shape
    C1, C2 = w1.shape[0], w2.shape[0]
    assert N % batch_block == 0, "batch must be divisible by batch_block"

    G = N // batch_block                         # number of batch blocks
    P = 2 if (G >= 2 and G % 2 == 0) else 1      # outer, core-parallel axis
    Q = G // P                                   # inner, sequential axis
    M_blk = batch_block * H * W
    Wp = W_OFF + W + 2                           # scratch W extent

    # ---- input: NCHW -> NHWC, 1-px spatial halo, channels lane-padded -------
    x_nhwc = jnp.transpose(x_nchw, (0, 2, 3, 1))
    x_pad = jnp.pad(x_nhwc, ((0, 0), (1, 1), (1, 1), (0, LANES - C0)))
    x_pad = x_pad.astype(compute_dtype)

    # ---- weights: (Cout, Cin, 3, 3) -> (9, 128, 128) per-tap matrices -------
    def pack_w(w):
        cout, cin = w.shape[0], w.shape[1]
        wt = jnp.transpose(w, (2, 3, 1, 0)).reshape(9, cin, cout)
        wt = jnp.pad(wt, ((0, 0), (0, LANES - cin), (0, LANES - cout)))
        return wt.astype(compute_dtype)

    w1t = pack_w(w1)                                           # (9,128,128)
    w2t = pack_w(w2)                                           # (9,128,128)
    w3t = jnp.pad(jnp.transpose(w3[0], (1, 2, 0)).reshape(9, C2),
                  ((0, 0), (0, LANES - C2))).astype(jnp.float32)   # (9,128)
    b1r = jnp.pad(b1.reshape(1, C1), ((0, 0), (0, LANES - C1))).astype(jnp.float32)
    b2r = jnp.pad(b2.reshape(1, C2), ((0, 0), (0, LANES - C2))).astype(jnp.float32)
    b3r = b3.reshape(1).astype(jnp.float32)

    bmap = lambda p, q: (p * Q + q, 0, 0, 0)
    cmap3 = lambda p, q: (0, 0, 0)
    cmap2 = lambda p, q: (0, 0)

    flops = 2 * N * H * W * 9 * (C0 * C1 + C1 * C2 + C2 * 1)
    bytes_accessed = (x_pad.size * x_pad.dtype.itemsize
                      + w1t.size * w1t.dtype.itemsize
                      + w2t.size * w2t.dtype.itemsize
                      + w3t.size * 4 + N * H * W * 4)

    out = pl.pallas_call(
        _fused_net_kernel,
        out_shape=jax.ShapeDtypeStruct((G, 1, M_blk), jnp.float32),
        grid_spec=pltpu.PrefetchScalarGridSpec(
            num_scalar_prefetch=0,
            grid=(P, Q),
            in_specs=[
                pl.BlockSpec((batch_block, H + 2, W + 2, LANES), bmap),
                pl.BlockSpec((9, LANES, LANES), cmap3),
                pl.BlockSpec((1, LANES), cmap2),
                pl.BlockSpec((9, LANES, LANES), cmap3),
                pl.BlockSpec((1, LANES), cmap2),
                pl.BlockSpec((9, LANES), cmap2),
                pl.BlockSpec(memory_space=pltpu.MemorySpace.SMEM),   # b3 scalar
            ],
            out_specs=pl.BlockSpec((1, 1, M_blk),
                                   lambda p, q: (p * Q + q, 0, 0)),
            scratch_shapes=[
                pltpu.VMEM((batch_block, H + 2, Wp, LANES), compute_dtype),
                pltpu.VMEM((batch_block, H + 2, Wp, LANES), compute_dtype),
            ],
        ),
        compiler_params=pltpu.CompilerParams(
            dimension_semantics=("parallel", "arbitrary")),
        cost_estimate=pl.CostEstimate(flops=flops, transcendentals=0,
                                      bytes_accessed=int(bytes_accessed)),
    )(x_pad, w1t, b1r, w2t, b2r, w3t, b3r)

    # np.squeeze of the PyTorch (N, 1, H, W) output is (N, H, W) for N > 1; the
    # kernel emits that layout directly (lane-dense), reshaped here for free.
    return out.reshape(N, H, W)


def net_forward_reference(x_nchw, params):
    """Pure-JAX reference (matches PyTorch Conv2d semantics)."""
    (w1, b1), (w2, b2), (w3, b3) = params

    def conv(x, w, b):
        y = lax.conv_general_dilated(
            x, w, window_strides=(1, 1), padding=((1, 1), (1, 1)),
            dimension_numbers=("NCHW", "OIHW", "NCHW"),
            precision=lax.Precision.HIGHEST)
        return y + b.reshape(1, -1, 1, 1)

    y = conv(conv(conv(x_nchw, w1, b1), w2, b2), w3, b3)
    return jnp.squeeze(y, axis=1)


def init_params(key, input_dim=30, conv_dim=64, linear_dim=16):
    """Deterministic synthetic parameters with PyTorch Conv2d shapes."""
    ks = jax.random.split(key, 6)

    def make(kw, kb, cout, cin):
        fan_in = cin * 3 * 3
        bound = 1.0 / jnp.sqrt(fan_in)
        w = jax.random.uniform(kw, (cout, cin, 3, 3), jnp.float32, -bound, bound)
        b = jax.random.uniform(kb, (cout,), jnp.float32, -bound, bound)
        return w, b

    w1, b1 = make(ks[0], ks[1], conv_dim, input_dim)
    w2, b2 = make(ks[2], ks[3], linear_dim, conv_dim)
    w3, b3 = make(ks[4], ks[5], 1, linear_dim)
    return (w1, b1), (w2, b2), (w3, b3)


if __name__ == "__main__":
    key = jax.random.PRNGKey(0)
    k_params, k_x = jax.random.split(key)

    basic_day = 3
    input_dim = basic_day * 10   # 30
    N, H, W = 2, 16, 16

    params = init_params(k_params, input_dim=input_dim, conv_dim=64,
                         linear_dim=16)
    x = jax.random.normal(k_x, (N, input_dim, H, W), dtype=jnp.float32)

    out = jax.jit(net_forward)(x, params)
    out = jax.block_until_ready(out)
    assert out.shape == (N, H, W), out.shape

    ref = jax.block_until_ready(net_forward_reference(x, params))
    max_err = float(jnp.max(jnp.abs(out - ref)))
    assert max_err < 1e-4, f"max abs error vs reference: {max_err}"

    print("KERNEL_OK")
</pallas_src>

<mosaic_0001>
module attributes {stable_mosaic.version = 11 : i64} {
  func.func @_fused_net_kernel(%arg0: i32, %arg1: i32, %arg2: memref<1x18x18x128xf32, #tpu.memory_space<vmem>>, %arg3: memref<9x128x128xf32, #tpu.memory_space<vmem>>, %arg4: memref<1x128xf32, #tpu.memory_space<vmem>>, %arg5: memref<9x128x128xf32, #tpu.memory_space<vmem>>, %arg6: memref<1x128xf32, #tpu.memory_space<vmem>>, %arg7: memref<9x128xf32, #tpu.memory_space<vmem>>, %arg8: memref<1xf32, #tpu.memory_space<smem>>, %arg9: memref<1x1x256xf32, #tpu.memory_space<vmem>>, %arg10: memref<1x18x26x128xf32, #tpu.memory_space<vmem>>, %arg11: memref<1x18x26x128xf32, #tpu.memory_space<vmem>>) attributes {dimension_semantics = [#tpu.dimension_semantics<parallel>, #tpu.dimension_semantics<arbitrary>], iteration_bounds = array<i64: 2, 1>, scalar_prefetch = 0 : i64, scratch_operands = 2 : i64, tpu.core_type = #tpu.core_type<tc>, window_params = [{transform_indices = @transform_0, window_bounds = array<i64: 1, 18, 18, 128>}, {pipeline_mode = #tpu.pipeline_mode<synchronous>, transform_indices = @transform_1, window_bounds = array<i64: 9, 128, 128>}, {pipeline_mode = #tpu.pipeline_mode<synchronous>, transform_indices = @transform_2, window_bounds = array<i64: 1, 128>}, {pipeline_mode = #tpu.pipeline_mode<synchronous>, transform_indices = @transform_3, window_bounds = array<i64: 9, 128, 128>}, {pipeline_mode = #tpu.pipeline_mode<synchronous>, transform_indices = @transform_4, window_bounds = array<i64: 1, 128>}, {pipeline_mode = #tpu.pipeline_mode<synchronous>, transform_indices = @transform_5, window_bounds = array<i64: 9, 128>}, {transform_indices = @transform_6, window_bounds = array<i64: 1>}, {transform_indices = @transform_7, window_bounds = array<i64: 1, 1, 256>}]} {
    %c0_i32 = arith.constant 0 : i32
    %0 = arith.cmpi eq, %arg1, %c0_i32 : i32
    %1 = arith.extui %0 : i1 to i32
    %c0_i32_0 = arith.constant 0 : i32
    %2 = arith.cmpi ne, %1, %c0_i32_0 : i32
    scf.if %2 {
      %cst_206 = arith.constant 0.000000e+00 : f32
      %197 = vector.broadcast %cst_206 : f32 to vector<1x18x26x128xf32>
      %c0_207 = arith.constant 0 : index
      %c0_208 = arith.constant 0 : index
      %c0_209 = arith.constant 0 : index
      %c0_210 = arith.constant 0 : index
      %198 = vector.load %arg10[%c0_207, %c0_208, %c0_209, %c0_210] : memref<1x18x26x128xf32, #tpu.memory_space<vmem>>, vector<1x18x26x128xf32>
      tpu.vector_store %arg10[%c0_207, %c0_208, %c0_209, %c0_210], %197 {strides = array<i32>} : memref<1x18x26x128xf32, #tpu.memory_space<vmem>>, vector<1x18x26x128xf32>,
      %cst_211 = arith.constant 0.000000e+00 : f32
      %199 = vector.broadcast %cst_211 : f32 to vector<1x18x26x128xf32>
      %c0_212 = arith.constant 0 : index
      %c0_213 = arith.constant 0 : index
      %c0_214 = arith.constant 0 : index
      %c0_215 = arith.constant 0 : index
      %200 = vector.load %arg11[%c0_212, %c0_213, %c0_214, %c0_215] : memref<1x18x26x128xf32, #tpu.memory_space<vmem>>, vector<1x18x26x128xf32>
      tpu.vector_store %arg11[%c0_212, %c0_213, %c0_214, %c0_215], %199 {strides = array<i32>} : memref<1x18x26x128xf32, #tpu.memory_space<vmem>>, vector<1x18x26x128xf32>,
    } else {
    }
    %c0 = arith.constant 0 : index
    %c0_1 = arith.constant 0 : index
    %3 = vector.load %arg4[%c0, %c0_1] : memref<1x128xf32, #tpu.memory_space<vmem>>, vector<1x128xf32>
    %c0_2 = arith.constant 0 : index
    %c0_3 = arith.constant 0 : index
    %c0_4 = arith.constant 0 : index
    %c0_5 = arith.constant 0 : index
    %4 = vector.load %arg2[%c0_2, %c0_3, %c0_4, %c0_5] : memref<1x18x18x128xf32, #tpu.memory_space<vmem>>, vector<1x16x16x128xf32>
    %5 = vector.shape_cast %4 : vector<1x16x16x128xf32> to vector<256x128xf32>
    %c0_6 = arith.constant 0 : index
    %c0_7 = arith.constant 0 : index
    %c0_8 = arith.constant 0 : index
    %6 = vector.load %arg3[%c0_6, %c0_7, %c0_8] : memref<9x128x128xf32, #tpu.memory_space<vmem>>, vector<1x128x128xf32>
    %7 = vector.shape_cast %6 : vector<1x128x128xf32> to vector<128x128xf32>
    %cst = arith.constant dense<0.000000e+00> : vector<256x128xf32>
    %8 = tpu.matmul %5, %7, %cst {dimension_numbers = #tpu.dot_dimension_numbers<[1], [0], [0], [1], [0, 0, 1, 1], [], []>} : vector<256x128xf32>, vector<128x128xf32>, vector<256x128xf32> -> vector<256x128xf32>
    %c0_9 = arith.constant 0 : index
    %c0_10 = arith.constant 0 : index
    %c1 = arith.constant 1 : index
    %c0_11 = arith.constant 0 : index
    %9 = vector.load %arg2[%c0_9, %c0_10, %c1, %c0_11] : memref<1x18x18x128xf32, #tpu.memory_space<vmem>>, vector<1x16x16x128xf32>
    %10 = vector.shape_cast %9 : vector<1x16x16x128xf32> to vector<256x128xf32>
    %c1_12 = arith.constant 1 : index
    %c0_13 = arith.constant 0 : index
    %c0_14 = arith.constant 0 : index
    %11 = vector.load %arg3[%c1_12, %c0_13, %c0_14] : memref<9x128x128xf32, #tpu.memory_space<vmem>>, vector<1x128x128xf32>
    %12 = vector.shape_cast %11 : vector<1x128x128xf32> to vector<128x128xf32>
    %cst_15 = arith.constant dense<0.000000e+00> : vector<256x128xf32>
    %13 = tpu.matmul %10, %12, %cst_15 {dimension_numbers = #tpu.dot_dimension_numbers<[1], [0], [0], [1], [0, 0, 1, 1], [], []>} : vector<256x128xf32>, vector<128x128xf32>, vector<256x128xf32> -> vector<256x128xf32>
    %14 = arith.addf %8, %13 : vector<256x128xf32>
    %c0_16 = arith.constant 0 : index
    %c0_17 = arith.constant 0 : index
    %c2 = arith.constant 2 : index
    %c0_18 = arith.constant 0 : index
    %15 = vector.load %arg2[%c0_16, %c0_17, %c2, %c0_18] : memref<1x18x18x128xf32, #tpu.memory_space<vmem>>, vector<1x16x16x128xf32>
    %16 = vector.shape_cast %15 : vector<1x16x16x128xf32> to vector<256x128xf32>
    %c2_19 = arith.constant 2 : index
    %c0_20 = arith.constant 0 : index
    %c0_21 = arith.constant 0 : index
    %17 = vector.load %arg3[%c2_19, %c0_20, %c0_21] : memref<9x128x128xf32, #tpu.memory_space<vmem>>, vector<1x128x128xf32>
    %18 = vector.shape_cast %17 : vector<1x128x128xf32> to vector<128x128xf32>
    %cst_22 = arith.constant dense<0.000000e+00> : vector<256x128xf32>
    %19 = tpu.matmul %16, %18, %cst_22 {dimension_numbers = #tpu.dot_dimension_numbers<[1], [0], [0], [1], [0, 0, 1, 1], [], []>} : vector<256x128xf32>, vector<128x128xf32>, vector<256x128xf32> -> vector<256x128xf32>
    %20 = arith.addf %14, %19 : vector<256x128xf32>
    %c0_23 = arith.constant 0 : index
    %c1_24 = arith.constant 1 : index
    %c0_25 = arith.constant 0 : index
    %c0_26 = arith.constant 0 : index
    %21 = vector.load %arg2[%c0_23, %c1_24, %c0_25, %c0_26] : memref<1x18x18x128xf32, #tpu.memory_space<vmem>>, vector<1x16x16x128xf32>
    %22 = vector.shape_cast %21 : vector<1x16x16x128xf32> to vector<256x128xf32>
    %c3 = arith.constant 3 : index
    %c0_27 = arith.constant 0 : index
    %c0_28 = arith.constant 0 : index
    %23 = vector.load %arg3[%c3, %c0_27, %c0_28] : memref<9x128x128xf32, #tpu.memory_space<vmem>>, vector<1x128x128xf32>
    %24 = vector.shape_cast %23 : vector<1x128x128xf32> to vector<128x128xf32>
    %cst_29 = arith.constant dense<0.000000e+00> : vector<256x128xf32>
    %25 = tpu.matmul %22, %24, %cst_29 {dimension_numbers = #tpu.dot_dimension_numbers<[1], [0], [0], [1], [0, 0, 1, 1], [], []>} : vector<256x128xf32>, vector<128x128xf32>, vector<256x128xf32> -> vector<256x128xf32>
    %26 = arith.addf %20, %25 : vector<256x128xf32>
    %c0_30 = arith.constant 0 : index
    %c1_31 = arith.constant 1 : index
    %c1_32 = arith.constant 1 : index
    %c0_33 = arith.constant 0 : index
    %27 = vector.load %arg2[%c0_30, %c1_31, %c1_32, %c0_33] : memref<1x18x18x128xf32, #tpu.memory_space<vmem>>, vector<1x16x16x128xf32>
    %28 = vector.shape_cast %27 : vector<1x16x16x128xf32> to vector<256x128xf32>
    %c4 = arith.constant 4 : index
    %c0_34 = arith.constant 0 : index
    %c0_35 = arith.constant 0 : index
    %29 = vector.load %arg3[%c4, %c0_34, %c0_35] : memref<9x128x128xf32, #tpu.memory_space<vmem>>, vector<1x128x128xf32>
    %30 = vector.shape_cast %29 : vector<1x128x128xf32> to vector<128x128xf32>
    %cst_36 = arith.constant dense<0.000000e+00> : vector<256x128xf32>
    %31 = tpu.matmul %28, %30, %cst_36 {dimension_numbers = #tpu.dot_dimension_numbers<[1], [0], [0], [1], [0, 0, 1, 1], [], []>} : vector<256x128xf32>, vector<128x128xf32>, vector<256x128xf32> -> vector<256x128xf32>
    %32 = arith.addf %26, %31 : vector<256x128xf32>
    %c0_37 = arith.constant 0 : index
    %c1_38 = arith.constant 1 : index
    %c2_39 = arith.constant 2 : index
    %c0_40 = arith.constant 0 : index
    %33 = vector.load %arg2[%c0_37, %c1_38, %c2_39, %c0_40] : memref<1x18x18x128xf32, #tpu.memory_space<vmem>>, vector<1x16x16x128xf32>
    %34 = vector.shape_cast %33 : vector<1x16x16x128xf32> to vector<256x128xf32>
    %c5 = arith.constant 5 : index
    %c0_41 = arith.constant 0 : index
    %c0_42 = arith.constant 0 : index
    %35 = vector.load %arg3[%c5, %c0_41, %c0_42] : memref<9x128x128xf32, #tpu.memory_space<vmem>>, vector<1x128x128xf32>
    %36 = vector.shape_cast %35 : vector<1x128x128xf32> to vector<128x128xf32>
    %cst_43 = arith.constant dense<0.000000e+00> : vector<256x128xf32>
    %37 = tpu.matmul %34, %36, %cst_43 {dimension_numbers = #tpu.dot_dimension_numbers<[1], [0], [0], [1], [0, 0, 1, 1], [], []>} : vector<256x128xf32>, vector<128x128xf32>, vector<256x128xf32> -> vector<256x128xf32>
    %38 = arith.addf %32, %37 : vector<256x128xf32>
    %c0_44 = arith.constant 0 : index
    %c2_45 = arith.constant 2 : index
    %c0_46 = arith.constant 0 : index
    %c0_47 = arith.constant 0 : index
    %39 = vector.load %arg2[%c0_44, %c2_45, %c0_46, %c0_47] : memref<1x18x18x128xf32, #tpu.memory_space<vmem>>, vector<1x16x16x128xf32>
    %40 = vector.shape_cast %39 : vector<1x16x16x128xf32> to vector<256x128xf32>
    %c6 = arith.constant 6 : index
    %c0_48 = arith.constant 0 : index
    %c0_49 = arith.constant 0 : index
    %41 = vector.load %arg3[%c6, %c0_48, %c0_49] : memref<9x128x128xf32, #tpu.memory_space<vmem>>, vector<1x128x128xf32>
    %42 = vector.shape_cast %41 : vector<1x128x128xf32> to vector<128x128xf32>
    %cst_50 = arith.constant dense<0.000000e+00> : vector<256x128xf32>
    %43 = tpu.matmul %40, %42, %cst_50 {dimension_numbers = #tpu.dot_dimension_numbers<[1], [0], [0], [1], [0, 0, 1, 1], [], []>} : vector<256x128xf32>, vector<128x128xf32>, vector<256x128xf32> -> vector<256x128xf32>
    %44 = arith.addf %38, %43 : vector<256x128xf32>
    %c0_51 = arith.constant 0 : index
    %c2_52 = arith.constant 2 : index
    %c1_53 = arith.constant 1 : index
    %c0_54 = arith.constant 0 : index
    %45 = vector.load %arg2[%c0_51, %c2_52, %c1_53, %c0_54] : memref<1x18x18x128xf32, #tpu.memory_space<vmem>>, vector<1x16x16x128xf32>
    %46 = vector.shape_cast %45 : vector<1x16x16x128xf32> to vector<256x128xf32>
    %c7 = arith.constant 7 : index
    %c0_55 = arith.constant 0 : index
    %c0_56 = arith.constant 0 : index
    %47 = vector.load %arg3[%c7, %c0_55, %c0_56] : memref<9x128x128xf32, #tpu.memory_space<vmem>>, vector<1x128x128xf32>
    %48 = vector.shape_cast %47 : vector<1x128x128xf32> to vector<128x128xf32>
    %cst_57 = arith.constant dense<0.000000e+00> : vector<256x128xf32>
    %49 = tpu.matmul %46, %48, %cst_57 {dimension_numbers = #tpu.dot_dimension_numbers<[1], [0], [0], [1], [0, 0, 1, 1], [], []>} : vector<256x128xf32>, vector<128x128xf32>, vector<256x128xf32> -> vector<256x128xf32>
    %50 = arith.addf %44, %49 : vector<256x128xf32>
    %c0_58 = arith.constant 0 : index
    %c2_59 = arith.constant 2 : index
    %c2_60 = arith.constant 2 : index
    %c0_61 = arith.constant 0 : index
    %51 = vector.load %arg2[%c0_58, %c2_59, %c2_60, %c0_61] : memref<1x18x18x128xf32, #tpu.memory_space<vmem>>, vector<1x16x16x128xf32>
    %52 = vector.shape_cast %51 : vector<1x16x16x128xf32> to vector<256x128xf32>
    %c8 = arith.constant 8 : index
    %c0_62 = arith.constant 0 : index
    %c0_63 = arith.constant 0 : index
    %53 = vector.load %arg3[%c8, %c0_62, %c0_63] : memref<9x128x128xf32, #tpu.memory_space<vmem>>, vector<1x128x128xf32>
    %54 = vector.shape_cast %53 : vector<1x128x128xf32> to vector<128x128xf32>
    %cst_64 = arith.constant dense<0.000000e+00> : vector<256x128xf32>
    %55 = tpu.matmul %52, %54, %cst_64 {dimension_numbers = #tpu.dot_dimension_numbers<[1], [0], [0], [1], [0, 0, 1, 1], [], []>} : vector<256x128xf32>, vector<128x128xf32>, vector<256x128xf32> -> vector<256x128xf32>
    %56 = arith.addf %50, %55 : vector<256x128xf32>
    %57 = vector.broadcast %3 : vector<1x128xf32> to vector<256x128xf32>
    %58 = arith.addf %56, %57 : vector<256x128xf32>
    %59 = vector.shape_cast %58 : vector<256x128xf32> to vector<1x16x16x128xf32>
    %c0_65 = arith.constant 0 : index
    %c1_66 = arith.constant 1 : index
    %c8_67 = arith.constant 8 : index
    %c0_68 = arith.constant 0 : index
    %60 = vector.load %arg10[%c0_65, %c1_66, %c8_67, %c0_68] : memref<1x18x26x128xf32, #tpu.memory_space<vmem>>, vector<1x16x16x128xf32>
    tpu.vector_store %arg10[%c0_65, %c1_66, %c8_67, %c0_68], %59 {strides = array<i32>} : memref<1x18x26x128xf32, #tpu.memory_space<vmem>>, vector<1x16x16x128xf32>,
    %c0_69 = arith.constant 0 : index
    %c0_70 = arith.constant 0 : index
    %61 = vector.load %arg6[%c0_69, %c0_70] : memref<1x128xf32, #tpu.memory_space<vmem>>, vector<1x128xf32>
    %c0_71 = arith.constant 0 : index
    %c0_72 = arith.constant 0 : index
    %c7_73 = arith.constant 7 : index
    %c0_74 = arith.constant 0 : index
    %62 = vector.load %arg10[%c0_71, %c0_72, %c7_73, %c0_74] : memref<1x18x26x128xf32, #tpu.memory_space<vmem>>, vector<1x16x16x128xf32>
    %63 = vector.shape_cast %62 : vector<1x16x16x128xf32> to vector<256x128xf32>
    %c0_75 = arith.constant 0 : index
    %c0_76 = arith.constant 0 : index
    %c0_77 = arith.constant 0 : index
    %64 = vector.load %arg5[%c0_75, %c0_76, %c0_77] : memref<9x128x128xf32, #tpu.memory_space<vmem>>, vector<1x128x128xf32>
    %65 = vector.shape_cast %64 : vector<1x128x128xf32> to vector<128x128xf32>
    %cst_78 = arith.constant dense<0.000000e+00> : vector<256x128xf32>
    %66 = tpu.matmul %63, %65, %cst_78 {dimension_numbers = #tpu.dot_dimension_numbers<[1], [0], [0], [1], [0, 0, 1, 1], [], []>} : vector<256x128xf32>, vector<128x128xf32>, vector<256x128xf32> -> vector<256x128xf32>
    %c0_79 = arith.constant 0 : index
    %c0_80 = arith.constant 0 : index
    %c8_81 = arith.constant 8 : index
    %c0_82 = arith.constant 0 : index
    %67 = vector.load %arg10[%c0_79, %c0_80, %c8_81, %c0_82] : memref<1x18x26x128xf32, #tpu.memory_space<vmem>>, vector<1x16x16x128xf32>
    %68 = vector.shape_cast %67 : vector<1x16x16x128xf32> to vector<256x128xf32>
    %c1_83 = arith.constant 1 : index
    %c0_84 = arith.constant 0 : index
    %c0_85 = arith.constant 0 : index
    %69 = vector.load %arg5[%c1_83, %c0_84, %c0_85] : memref<9x128x128xf32, #tpu.memory_space<vmem>>, vector<1x128x128xf32>
    %70 = vector.shape_cast %69 : vector<1x128x128xf32> to vector<128x128xf32>
    %cst_86 = arith.constant dense<0.000000e+00> : vector<256x128xf32>
    %71 = tpu.matmul %68, %70, %cst_86 {dimension_numbers = #tpu.dot_dimension_numbers<[1], [0], [0], [1], [0, 0, 1, 1], [], []>} : vector<256x128xf32>, vector<128x128xf32>, vector<256x128xf32> -> vector<256x128xf32>
    %72 = arith.addf %66, %71 : vector<256x128xf32>
    %c0_87 = arith.constant 0 : index
    %c0_88 = arith.constant 0 : index
    %c9 = arith.constant 9 : index
    %c0_89 = arith.constant 0 : index
    %73 = vector.load %arg10[%c0_87, %c0_88, %c9, %c0_89] : memref<1x18x26x128xf32, #tpu.memory_space<vmem>>, vector<1x16x16x128xf32>
    %74 = vector.shape_cast %73 : vector<1x16x16x128xf32> to vector<256x128xf32>
    %c2_90 = arith.constant 2 : index
    %c0_91 = arith.constant 0 : index
    %c0_92 = arith.constant 0 : index
    %75 = vector.load %arg5[%c2_90, %c0_91, %c0_92] : memref<9x128x128xf32, #tpu.memory_space<vmem>>, vector<1x128x128xf32>
    %76 = vector.shape_cast %75 : vector<1x128x128xf32> to vector<128x128xf32>
    %cst_93 = arith.constant dense<0.000000e+00> : vector<256x128xf32>
    %77 = tpu.matmul %74, %76, %cst_93 {dimension_numbers = #tpu.dot_dimension_numbers<[1], [0], [0], [1], [0, 0, 1, 1], [], []>} : vector<256x128xf32>, vector<128x128xf32>, vector<256x128xf32> -> vector<256x128xf32>
    %78 = arith.addf %72, %77 : vector<256x128xf32>
    %c0_94 = arith.constant 0 : index
    %c1_95 = arith.constant 1 : index
    %c7_96 = arith.constant 7 : index
    %c0_97 = arith.constant 0 : index
    %79 = vector.load %arg10[%c0_94, %c1_95, %c7_96, %c0_97] : memref<1x18x26x128xf32, #tpu.memory_space<vmem>>, vector<1x16x16x128xf32>
    %80 = vector.shape_cast %79 : vector<1x16x16x128xf32> to vector<256x128xf32>
    %c3_98 = arith.constant 3 : index
    %c0_99 = arith.constant 0 : index
    %c0_100 = arith.constant 0 : index
    %81 = vector.load %arg5[%c3_98, %c0_99, %c0_100] : memref<9x128x128xf32, #tpu.memory_space<vmem>>, vector<1x128x128xf32>
    %82 = vector.shape_cast %81 : vector<1x128x128xf32> to vector<128x128xf32>
    %cst_101 = arith.constant dense<0.000000e+00> : vector<256x128xf32>
    %83 = tpu.matmul %80, %82, %cst_101 {dimension_numbers = #tpu.dot_dimension_numbers<[1], [0], [0], [1], [0, 0, 1, 1], [], []>} : vector<256x128xf32>, vector<128x128xf32>, vector<256x128xf32> -> vector<256x128xf32>
    %84 = arith.addf %78, %83 : vector<256x128xf32>
    %c0_102 = arith.constant 0 : index
    %c1_103 = arith.constant 1 : index
    %c8_104 = arith.constant 8 : index
    %c0_105 = arith.constant 0 : index
    %85 = vector.load %arg10[%c0_102, %c1_103, %c8_104, %c0_105] : memref<1x18x26x128xf32, #tpu.memory_space<vmem>>, vector<1x16x16x128xf32>
    %86 = vector.shape_cast %85 : vector<1x16x16x128xf32> to vector<256x128xf32>
    %c4_106 = arith.constant 4 : index
    %c0_107 = arith.constant 0 : index
    %c0_108 = arith.constant 0 : index
    %87 = vector.load %arg5[%c4_106, %c0_107, %c0_108] : memref<9x128x128xf32, #tpu.memory_space<vmem>>, vector<1x128x128xf32>
    %88 = vector.shape_cast %87 : vector<1x128x128xf32> to vector<128x128xf32>
    %cst_109 = arith.constant dense<0.000000e+00> : vector<256x128xf32>
    %89 = tpu.matmul %86, %88, %cst_109 {dimension_numbers = #tpu.dot_dimension_numbers<[1], [0], [0], [1], [0, 0, 1, 1], [], []>} : vector<256x128xf32>, vector<128x128xf32>, vector<256x128xf32> -> vector<256x128xf32>
    %90 = arith.addf %84, %89 : vector<256x128xf32>
    %c0_110 = arith.constant 0 : index
    %c1_111 = arith.constant 1 : index
    %c9_112 = arith.constant 9 : index
    %c0_113 = arith.constant 0 : index
    %91 = vector.load %arg10[%c0_110, %c1_111, %c9_112, %c0_113] : memref<1x18x26x128xf32, #tpu.memory_space<vmem>>, vector<1x16x16x128xf32>
    %92 = vector.shape_cast %91 : vector<1x16x16x128xf32> to vector<256x128xf32>
    %c5_114 = arith.constant 5 : index
    %c0_115 = arith.constant 0 : index
    %c0_116 = arith.constant 0 : index
    %93 = vector.load %arg5[%c5_114, %c0_115, %c0_116] : memref<9x128x128xf32, #tpu.memory_space<vmem>>, vector<1x128x128xf32>
    %94 = vector.shape_cast %93 : vector<1x128x128xf32> to vector<128x128xf32>
    %cst_117 = arith.constant dense<0.000000e+00> : vector<256x128xf32>
    %95 = tpu.matmul %92, %94, %cst_117 {dimension_numbers = #tpu.dot_dimension_numbers<[1], [0], [0], [1], [0, 0, 1, 1], [], []>} : vector<256x128xf32>, vector<128x128xf32>, vector<256x128xf32> -> vector<256x128xf32>
    %96 = arith.addf %90, %95 : vector<256x128xf32>
    %c0_118 = arith.constant 0 : index
    %c2_119 = arith.constant 2 : index
    %c7_120 = arith.constant 7 : index
    %c0_121 = arith.constant 0 : index
    %97 = vector.load %arg10[%c0_118, %c2_119, %c7_120, %c0_121] : memref<1x18x26x128xf32, #tpu.memory_space<vmem>>, vector<1x16x16x128xf32>
    %98 = vector.shape_cast %97 : vector<1x16x16x128xf32> to vector<256x128xf32>
    %c6_122 = arith.constant 6 : index
    %c0_123 = arith.constant 0 : index
    %c0_124 = arith.constant 0 : index
    %99 = vector.load %arg5[%c6_122, %c0_123, %c0_124] : memref<9x128x128xf32, #tpu.memory_space<vmem>>, vector<1x128x128xf32>
    %100 = vector.shape_cast %99 : vector<1x128x128xf32> to vector<128x128xf32>
    %cst_125 = arith.constant dense<0.000000e+00> : vector<256x128xf32>
    %101 = tpu.matmul %98, %100, %cst_125 {dimension_numbers = #tpu.dot_dimension_numbers<[1], [0], [0], [1], [0, 0, 1, 1], [], []>} : vector<256x128xf32>, vector<128x128xf32>, vector<256x128xf32> -> vector<256x128xf32>
    %102 = arith.addf %96, %101 : vector<256x128xf32>
    %c0_126 = arith.constant 0 : index
    %c2_127 = arith.constant 2 : index
    %c8_128 = arith.constant 8 : index
    %c0_129 = arith.constant 0 : index
    %103 = vector.load %arg10[%c0_126, %c2_127, %c8_128, %c0_129] : memref<1x18x26x128xf32, #tpu.memory_space<vmem>>, vector<1x16x16x128xf32>
    %104 = vector.shape_cast %103 : vector<1x16x16x128xf32> to vector<256x128xf32>
    %c7_130 = arith.constant 7 : index
    %c0_131 = arith.constant 0 : index
    %c0_132 = arith.constant 0 : index
    %105 = vector.load %arg5[%c7_130, %c0_131, %c0_132] : memref<9x128x128xf32, #tpu.memory_space<vmem>>, vector<1x128x128xf32>
    %106 = vector.shape_cast %105 : vector<1x128x128xf32> to vector<128x128xf32>
    %cst_133 = arith.constant dense<0.000000e+00> : vector<256x128xf32>
    %107 = tpu.matmul %104, %106, %cst_133 {dimension_numbers = #tpu.dot_dimension_numbers<[1], [0], [0], [1], [0, 0, 1, 1], [], []>} : vector<256x128xf32>, vector<128x128xf32>, vector<256x128xf32> -> vector<256x128xf32>
    %108 = arith.addf %102, %107 : vector<256x128xf32>
    %c0_134 = arith.constant 0 : index
    %c2_135 = arith.constant 2 : index
    %c9_136 = arith.constant 9 : index
    %c0_137 = arith.constant 0 : index
    %109 = vector.load %arg10[%c0_134, %c2_135, %c9_136, %c0_137] : memref<1x18x26x128xf32, #tpu.memory_space<vmem>>, vector<1x16x16x128xf32>
    %110 = vector.shape_cast %109 : vector<1x16x16x128xf32> to vector<256x128xf32>
    %c8_138 = arith.constant 8 : index
    %c0_139 = arith.constant 0 : index
    %c0_140 = arith.constant 0 : index
    %111 = vector.load %arg5[%c8_138, %c0_139, %c0_140] : memref<9x128x128xf32, #tpu.memory_space<vmem>>, vector<1x128x128xf32>
    %112 = vector.shape_cast %111 : vector<1x128x128xf32> to vector<128x128xf32>
    %cst_141 = arith.constant dense<0.000000e+00> : vector<256x128xf32>
    %113 = tpu.matmul %110, %112, %cst_141 {dimension_numbers = #tpu.dot_dimension_numbers<[1], [0], [0], [1], [0, 0, 1, 1], [], []>} : vector<256x128xf32>, vector<128x128xf32>, vector<256x128xf32> -> vector<256x128xf32>
    %114 = arith.addf %108, %113 : vector<256x128xf32>
    %115 = vector.broadcast %61 : vector<1x128xf32> to vector<256x128xf32>
    %116 = arith.addf %114, %115 : vector<256x128xf32>
    %117 = vector.shape_cast %116 : vector<256x128xf32> to vector<1x16x16x128xf32>
    %c0_142 = arith.constant 0 : index
    %c1_143 = arith.constant 1 : index
    %c8_144 = arith.constant 8 : index
    %c0_145 = arith.constant 0 : index
    %118 = vector.load %arg11[%c0_142, %c1_143, %c8_144, %c0_145] : memref<1x18x26x128xf32, #tpu.memory_space<vmem>>, vector<1x16x16x128xf32>
    tpu.vector_store %arg11[%c0_142, %c1_143, %c8_144, %c0_145], %117 {strides = array<i32>} : memref<1x18x26x128xf32, #tpu.memory_space<vmem>>, vector<1x16x16x128xf32>,
    %c0_146 = arith.constant 0 : index
    %c0_147 = arith.constant 0 : index
    %c7_148 = arith.constant 7 : index
    %c0_149 = arith.constant 0 : index
    %119 = vector.load %arg11[%c0_146, %c0_147, %c7_148, %c0_149] : memref<1x18x26x128xf32, #tpu.memory_space<vmem>>, vector<1x16x16x128xf32>
    %120 = vector.shape_cast %119 : vector<1x16x16x128xf32> to vector<256x128xf32>
    %c0_150 = arith.constant 0 : index
    %c0_151 = arith.constant 0 : index
    %121 = vector.load %arg7[%c0_150, %c0_151] : memref<9x128xf32, #tpu.memory_space<vmem>>, vector<1x128xf32>
    %122 = vector.shape_cast %121 : vector<1x128xf32> to vector<128xf32>
    %123 = vector.shape_cast %122 : vector<128xf32> to vector<1x128xf32>
    %124 = vector.broadcast %123 : vector<1x128xf32> to vector<256x128xf32>
    %125 = arith.mulf %120, %124 : vector<256x128xf32>
    %c0_152 = arith.constant 0 : index
    %c0_153 = arith.constant 0 : index
    %c8_154 = arith.constant 8 : index
    %c0_155 = arith.constant 0 : index
    %126 = vector.load %arg11[%c0_152, %c0_153, %c8_154, %c0_155] : memref<1x18x26x128xf32, #tpu.memory_space<vmem>>, vector<1x16x16x128xf32>
    %127 = vector.shape_cast %126 : vector<1x16x16x128xf32> to vector<256x128xf32>
    %c1_156 = arith.constant 1 : index
    %c0_157 = arith.constant 0 : index
    %128 = vector.load %arg7[%c1_156, %c0_157] : memref<9x128xf32, #tpu.memory_space<vmem>>, vector<1x128xf32>
    %129 = vector.shape_cast %128 : vector<1x128xf32> to vector<128xf32>
    %130 = vector.shape_cast %129 : vector<128xf32> to vector<1x128xf32>
    %131 = vector.broadcast %130 : vector<1x128xf32> to vector<256x128xf32>
    %132 = arith.mulf %127, %131 : vector<256x128xf32>
    %133 = arith.addf %125, %132 : vector<256x128xf32>
    %c0_158 = arith.constant 0 : index
    %c0_159 = arith.constant 0 : index
    %c9_160 = arith.constant 9 : index
    %c0_161 = arith.constant 0 : index
    %134 = vector.load %arg11[%c0_158, %c0_159, %c9_160, %c0_161] : memref<1x18x26x128xf32, #tpu.memory_space<vmem>>, vector<1x16x16x128xf32>
    %135 = vector.shape_cast %134 : vector<1x16x16x128xf32> to vector<256x128xf32>
    %c2_162 = arith.constant 2 : index
    %c0_163 = arith.constant 0 : index
    %136 = vector.load %arg7[%c2_162, %c0_163] : memref<9x128xf32, #tpu.memory_space<vmem>>, vector<1x128xf32>
    %137 = vector.shape_cast %136 : vector<1x128xf32> to vector<128xf32>
    %138 = vector.shape_cast %137 : vector<128xf32> to vector<1x128xf32>
    %139 = vector.broadcast %138 : vector<1x128xf32> to vector<256x128xf32>
    %140 = arith.mulf %135, %139 : vector<256x128xf32>
    %141 = arith.addf %133, %140 : vector<256x128xf32>
    %c0_164 = arith.constant 0 : index
    %c1_165 = arith.constant 1 : index
    %c7_166 = arith.constant 7 : index
    %c0_167 = arith.constant 0 : index
    %142 = vector.load %arg11[%c0_164, %c1_165, %c7_166, %c0_167] : memref<1x18x26x128xf32, #tpu.memory_space<vmem>>, vector<1x16x16x128xf32>
    %143 = vector.shape_cast %142 : vector<1x16x16x128xf32> to vector<256x128xf32>
    %c3_168 = arith.constant 3 : index
    %c0_169 = arith.constant 0 : index
    %144 = vector.load %arg7[%c3_168, %c0_169] : memref<9x128xf32, #tpu.memory_space<vmem>>, vector<1x128xf32>
    %145 = vector.shape_cast %144 : vector<1x128xf32> to vector<128xf32>
    %146 = vector.shape_cast %145 : vector<128xf32> to vector<1x128xf32>
    %147 = vector.broadcast %146 : vector<1x128xf32> to vector<256x128xf32>
    %148 = arith.mulf %143, %147 : vector<256x128xf32>
    %149 = arith.addf %141, %148 : vector<256x128xf32>
    %c0_170 = arith.constant 0 : index
    %c1_171 = arith.constant 1 : index
    %c8_172 = arith.constant 8 : index
    %c0_173 = arith.constant 0 : index
    %150 = vector.load %arg11[%c0_170, %c1_171, %c8_172, %c0_173] : memref<1x18x26x128xf32, #tpu.memory_space<vmem>>, vector<1x16x16x128xf32>
    %151 = vector.shape_cast %150 : vector<1x16x16x128xf32> to vector<256x128xf32>
    %c4_174 = arith.constant 4 : index
    %c0_175 = arith.constant 0 : index
    %152 = vector.load %arg7[%c4_174, %c0_175] : memref<9x128xf32, #tpu.memory_space<vmem>>, vector<1x128xf32>
    %153 = vector.shape_cast %152 : vector<1x128xf32> to vector<128xf32>
    %154 = vector.shape_cast %153 : vector<128xf32> to vector<1x128xf32>
    %155 = vector.broadcast %154 : vector<1x128xf32> to vector<256x128xf32>
    %156 = arith.mulf %151, %155 : vector<256x128xf32>
    %157 = arith.addf %149, %156 : vector<256x128xf32>
    %c0_176 = arith.constant 0 : index
    %c1_177 = arith.constant 1 : index
    %c9_178 = arith.constant 9 : index
    %c0_179 = arith.constant 0 : index
    %158 = vector.load %arg11[%c0_176, %c1_177, %c9_178, %c0_179] : memref<1x18x26x128xf32, #tpu.memory_space<vmem>>, vector<1x16x16x128xf32>
    %159 = vector.shape_cast %158 : vector<1x16x16x128xf32> to vector<256x128xf32>
    %c5_180 = arith.constant 5 : index
    %c0_181 = arith.constant 0 : index
    %160 = vector.load %arg7[%c5_180, %c0_181] : memref<9x128xf32, #tpu.memory_space<vmem>>, vector<1x128xf32>
    %161 = vector.shape_cast %160 : vector<1x128xf32> to vector<128xf32>
    %162 = vector.shape_cast %161 : vector<128xf32> to vector<1x128xf32>
    %163 = vector.broadcast %162 : vector<1x128xf32> to vector<256x128xf32>
    %164 = arith.mulf %159, %163 : vector<256x128xf32>
    %165 = arith.addf %157, %164 : vector<256x128xf32>
    %c0_182 = arith.constant 0 : index
    %c2_183 = arith.constant 2 : index
    %c7_184 = arith.constant 7 : index
    %c0_185 = arith.constant 0 : index
    %166 = vector.load %arg11[%c0_182, %c2_183, %c7_184, %c0_185] : memref<1x18x26x128xf32, #tpu.memory_space<vmem>>, vector<1x16x16x128xf32>
    %167 = vector.shape_cast %166 : vector<1x16x16x128xf32> to vector<256x128xf32>
    %c6_186 = arith.constant 6 : index
    %c0_187 = arith.constant 0 : index
    %168 = vector.load %arg7[%c6_186, %c0_187] : memref<9x128xf32, #tpu.memory_space<vmem>>, vector<1x128xf32>
    %169 = vector.shape_cast %168 : vector<1x128xf32> to vector<128xf32>
    %170 = vector.shape_cast %169 : vector<128xf32> to vector<1x128xf32>
    %171 = vector.broadcast %170 : vector<1x128xf32> to vector<256x128xf32>
    %172 = arith.mulf %167, %171 : vector<256x128xf32>
    %173 = arith.addf %165, %172 : vector<256x128xf32>
    %c0_188 = arith.constant 0 : index
    %c2_189 = arith.constant 2 : index
    %c8_190 = arith.constant 8 : index
    %c0_191 = arith.constant 0 : index
    %174 = vector.load %arg11[%c0_188, %c2_189, %c8_190, %c0_191] : memref<1x18x26x128xf32, #tpu.memory_space<vmem>>, vector<1x16x16x128xf32>
    %175 = vector.shape_cast %174 : vector<1x16x16x128xf32> to vector<256x128xf32>
    %c7_192 = arith.constant 7 : index
    %c0_193 = arith.constant 0 : index
    %176 = vector.load %arg7[%c7_192, %c0_193] : memref<9x128xf32, #tpu.memory_space<vmem>>, vector<1x128xf32>
    %177 = vector.shape_cast %176 : vector<1x128xf32> to vector<128xf32>
    %178 = vector.shape_cast %177 : vector<128xf32> to vector<1x128xf32>
    %179 = vector.broadcast %178 : vector<1x128xf32> to vector<256x128xf32>
    %180 = arith.mulf %175, %179 : vector<256x128xf32>
    %181 = arith.addf %173, %180 : vector<256x128xf32>
    %c0_194 = arith.constant 0 : index
    %c2_195 = arith.constant 2 : index
    %c9_196 = arith.constant 9 : index
    %c0_197 = arith.constant 0 : index
    %182 = vector.load %arg11[%c0_194, %c2_195, %c9_196, %c0_197] : memref<1x18x26x128xf32, #tpu.memory_space<vmem>>, vector<1x16x16x128xf32>
    %183 = vector.shape_cast %182 : vector<1x16x16x128xf32> to vector<256x128xf32>
    %c8_198 = arith.constant 8 : index
    %c0_199 = arith.constant 0 : index
    %184 = vector.load %arg7[%c8_198, %c0_199] : memref<9x128xf32, #tpu.memory_space<vmem>>, vector<1x128xf32>
    %185 = vector.shape_cast %184 : vector<1x128xf32> to vector<128xf32>
    %186 = vector.shape_cast %185 : vector<128xf32> to vector<1x128xf32>
    %187 = vector.broadcast %186 : vector<1x128xf32> to vector<256x128xf32>
    %188 = arith.mulf %183, %187 : vector<256x128xf32>
    %189 = arith.addf %181, %188 : vector<256x128xf32>
    %cst_200 = arith.constant 1.000000e+00 : f32
    %190 = vector.broadcast %cst_200 : f32 to vector<1x128xf32>
    %cst_201 = arith.constant dense<0.000000e+00> : vector<1x256xf32>
    %191 = tpu.matmul %190, %189, %cst_201 {dimension_numbers = #tpu.dot_dimension_numbers<[1], [1], [0], [0], [0, 0, 1, 0], [], []>} : vector<1x128xf32>, vector<256x128xf32>, vector<1x256xf32> -> vector<1x256xf32>
    %c0_202 = arith.constant 0 : index
    %192 = memref.load %arg8[%c0_202] : memref<1xf32, #tpu.memory_space<smem>>
    %193 = vector.broadcast %192 : f32 to vector<1x256xf32>
    %194 = arith.addf %191, %193 : vector<1x256xf32>
    %195 = vector.shape_cast %194 : vector<1x256xf32> to vector<1x1x256xf32>
    %c0_203 = arith.constant 0 : index
    %c0_204 = arith.constant 0 : index
    %c0_205 = arith.constant 0 : index
    %196 = vector.load %arg9[%c0_203, %c0_204, %c0_205] : memref<1x1x256xf32, #tpu.memory_space<vmem>>, vector<1x1x256xf32>
    tpu.vector_store %arg9[%c0_203, %c0_204, %c0_205], %195 {strides = array<i32>} : memref<1x1x256xf32, #tpu.memory_space<vmem>>, vector<1x1x256xf32>,
    return
  }
  func.func @transform_0(%arg0: i32, %arg1: i32) -> (i32, i32, i32, i32) {
    %c1_i32 = arith.constant 1 : i32
    %0 = arith.muli %arg0, %c1_i32 : i32
    %1 = arith.addi %0, %arg1 : i32
    %c0_i32 = arith.constant 0 : i32
    %c0_i32_0 = arith.constant 0 : i32
    %c0_i32_1 = arith.constant 0 : i32
    %c0_i32_2 = arith.constant 0 : i32
    return %1, %c0_i32, %c0_i32_0, %c0_i32_1 : i32, i32, i32, i32
  }
  func.func @transform_1(%arg0: i32, %arg1: i32) -> (i32, i32, i32) {
    %c0_i32 = arith.constant 0 : i32
    %c0_i32_0 = arith.constant 0 : i32
    %c0_i32_1 = arith.constant 0 : i32
    %c0_i32_2 = arith.constant 0 : i32
    return %c0_i32, %c0_i32_0, %c0_i32_1 : i32, i32, i32
  }
  func.func @transform_2(%arg0: i32, %arg1: i32) -> (i32, i32) {
    %c0_i32 = arith.constant 0 : i32
    %c0_i32_0 = arith.constant 0 : i32
    %c0_i32_1 = arith.constant 0 : i32
    return %c0_i32, %c0_i32_0 : i32, i32
  }
  func.func @transform_3(%arg0: i32, %arg1: i32) -> (i32, i32, i32) {
    %c0_i32 = arith.constant 0 : i32
    %c0_i32_0 = arith.constant 0 : i32
    %c0_i32_1 = arith.constant 0 : i32
    %c0_i32_2 = arith.constant 0 : i32
    return %c0_i32, %c0_i32_0, %c0_i32_1 : i32, i32, i32
  }
  func.func @transform_4(%arg0: i32, %arg1: i32) -> (i32, i32) {
    %c0_i32 = arith.constant 0 : i32
    %c0_i32_0 = arith.constant 0 : i32
    %c0_i32_1 = arith.constant 0 : i32
    return %c0_i32, %c0_i32_0 : i32, i32
  }
  func.func @transform_5(%arg0: i32, %arg1: i32) -> (i32, i32) {
    %c0_i32 = arith.constant 0 : i32
    %c0_i32_0 = arith.constant 0 : i32
    %c0_i32_1 = arith.constant 0 : i32
    return %c0_i32, %c0_i32_0 : i32, i32
  }
  func.func @transform_6(%arg0: i32, %arg1: i32) -> i32 {
    %c0_i32 = arith.constant 0 : i32
    %c0_i32_0 = arith.constant 0 : i32
    return %c0_i32 : i32
  }
  func.func @transform_7(%arg0: i32, %arg1: i32) -> (i32, i32, i32) {
    %c1_i32 = arith.constant 1 : i32
    %0 = arith.muli %arg0, %c1_i32 : i32
    %1 = arith.addi %0, %arg1 : i32
    %c0_i32 = arith.constant 0 : i32
    %c0_i32_0 = arith.constant 0 : i32
    %c0_i32_1 = arith.constant 0 : i32
    return %1, %c0_i32, %c0_i32_0 : i32, i32, i32
  }
}

</mosaic_0001>

<bundles_post_ra>
// kernel: net_forward.1
= control target key start
LH: loop header
LB: loop body
LE: loop exit
PB: predicated region body
PF: predicated region fallthrough
CT: control target
= control target key end

     0   :  { %s11049_s26 = smov 0   ;;  %s11051_s27 = smov 0   ;;  %s13995_s0 = inlined_call_operand.vmem [shape: f32[2,18,18,128], index: 0, kind: input, shape index: {}]   ;;  %s13996_s1 = inlined_call_operand.vmem [shape: f32[9,128,128], index: 1, kind: input, shape index: {}]   ;;  %s13997_s2 = inlined_call_operand.vmem [shape: f32[1,128], index: 2, kind: input, shape index: {}]   ;;  %s13998_s3 = inlined_call_operand.vmem [shape: f32[9,128,128], index: 3, kind: input, shape index: {}]   ;;  %s13999_s4 = inlined_call_operand.vmem [shape: f32[1,128], index: 4, kind: input, shape index: {}]   ;;  %s14000_s5 = inlined_call_operand.vmem [shape: f32[9,128], index: 5, kind: input, shape index: {}]   ;;  %s14001_s6 = inlined_call_operand.<no memory space> [shape: f32[1], index: 6, kind: input, shape index: {}]   ;;  %s14002_s7 = inlined_call_operand.vmem [shape: f32[2,1,256], index: 7, kind: output, shape index: {}]  }
   0x1   :  { %12 = sst [smem:[#allocation4]] %s14001_s6  ;;  %s11053_s28 = smov 0  }
   0x2 LB: > { %s30_s6 = sadd.s32 1, %s10997_s27  ;;  %p7018_p0 = scmp.ge.s32.totalorder %s11001_s28, 1  ;;  %s11001_s28 = sphi %s11053_s28, %s18_s28   ;;  %s10997_s27 = sphi %s11051_s27, %s14240_s27   ;;  %s10993_s26 = sphi %s11049_s26, %s14239_s26  }
   0x3   : > { %p32_p1 = scmp.ge.s32.totalorder %s30_s6, 2  ;;  %p256_p2 = scmp.lt.s32.totalorder %s11001_s28, 3 }
   0x5   : > { %s14242_s6 = smov (%p32_p1, %s30_s6), 0  ;;  %p257_p3 = pnand %p7018_p0, %p256_p2 }
   0x7   : > { %260 = sbr.rel (%p257_p3) target bundleno = 1888 (0x760), region = 48 }
   0xe   : > { %v7021_v0 = vld [vmem:[%s13996_s1 + $0x80] sm:$0xff]  ;;  %v7022_v1 = vld [vmem:[%s13996_s1 + $0x88] sm:$0xff]  ;;  %v7023_v2 = vld [vmem:[%s13996_s1 + $0x90] sm:$0xff]  ;;  %p290_p4 = scmp.lt.s32.totalorder %s10993_s26, 1  ;;  %s6853_s21 = sld [smem:[#allocation4]] }
   0xf   : > { %v9820_v3 = vpack.c.bf16 %v7022_v1, %v7021_v0  ;;  %v7024_v4 = vld [vmem:[%s13996_s1 + $0x98] sm:$0xff]  ;;  %v7025_v6 = vld [vmem:[%s13996_s1 + $0xa0] sm:$0xff]  ;;  %v7026_v7 = vld [vmem:[%s13996_s1 + $0xa8] sm:$0xff] }
  0x10   : > { %v9824_v5 = vpack.c.bf16 %v7024_v4, %v7023_v2  ;;  %s14244_s26 = smov (!%p290_p4, %s10993_s26), 1  ;;  %v9828_v8 = vpack.c.bf16 %v7026_v7, %v7025_v6  ;;  %v7027_v9 = vld [vmem:[%s13996_s1 + $0xb0] sm:$0xff]  ;;  %v7028_v10 = vld [vmem:[%s13996_s1 + $0xb8] sm:$0xff]  ;;  %v7029_v13 = vld [vmem:[%s13996_s1 + $0xc0] sm:$0xff] }
  0x11   : > { %9821 = vmatprep.subr.bf16.mxu0 %v9820_v3  ;;  %s10940_s18 = smul.u32 432, %s14244_s26  ;;  %v9832_v12 = vpack.c.bf16 %v7028_v10, %v7027_v9  ;;  %v7030_v14 = vld [vmem:[%s13996_s1 + $0xc8] sm:$0xff]  ;;  %v7031_v16 = vld [vmem:[%s13996_s1 + $0xd0] sm:$0xff]  ;;  %v7032_v17 = vld [vmem:[%s13996_s1 + $0xd8] sm:$0xff]  ;;  %s7020_s22 = sshll.u32 %s14244_s26, 1 }
  0x12   : > { %9823 = vmatpush3.bf16.msra.mxu0 %v9820_v3  ;;  %v9836_v15 = vpack.c.bf16 %v7030_v14, %v7029_v13  ;;  %v9840_v18 = vpack.c.bf16 %v7032_v17, %v7031_v16  ;;  %v7033_v19 = vld [vmem:[%s13996_s1 + $0xe0] sm:$0xff]  ;;  %v7034_v20 = vld [vmem:[%s13996_s1 + $0xe8] sm:$0xff]  ;;  %v7035_v22 = vld [vmem:[%s13996_s1 + $0xf0] sm:$0xff] }
  0x13   : > { %9825 = vmatprep.subr.bf16.mxu0 %v9824_v5  ;;  %s11097_s25 = scalar_lea.vmem %s13995_s0, %s10940_s18  ;;  %v9844_v21 = vpack.c.bf16 %v7034_v20, %v7033_v19  ;;  %v7036_v23 = vld [vmem:[%s13996_s1 + $0xf8] sm:$0xff]  ;;  %v483_v25 = vld [vmem:[%s13996_s1] sm:$0xff]  ;;  %v484_v26 = vld [vmem:[%s13996_s1 + $0x8] sm:$0xff] }
  0x14   : > { %v499_v11 = vld [vmem:[%s11097_s25 + $0x1] sm:$0xff]  ;;  %v9848_v24 = vpack.c.bf16 %v7036_v23, %v7035_v22  ;;  %v9852_v27 = vpack.c.bf16 %v484_v26, %v483_v25  ;;  %v485_v28 = vld [vmem:[%s13996_s1 + $0x10] sm:$0xff]  ;;  %v486_v29 = vld [vmem:[%s13996_s1 + $0x18] sm:$0xff] }
  0x15   : > { %8412 = vmatprep.mubr.f32.mxu0 %v499_v11  ;;  %v500_v30 = vld [vmem:[%s11097_s25 + $0x9] sm:$0xff]  ;;  %v11138_v31 = vld [vmem:[%s11097_s25 + $0x19] sm:$0xff]  ;;  %v9856_v32 = vpack.c.bf16 %v486_v29, %v485_v28  ;;  %v11148_v35 = vld [vmem:[%s11097_s25 + $0x21] sm:$0xff] }
  0x16   : > { %9827 = vmatpush3.bf16.msra.mxu0 %v9824_v5  ;;  %v487_v33 = vld [vmem:[%s13996_s1 + $0x20] sm:$0xff]  ;;  %v488_v34 = vld [vmem:[%s13996_s1 + $0x28] sm:$0xff]  ;;  %v11151_v36 = vld [vmem:[%s11097_s25 + $0x31] sm:$0xff] }
  0x17   : > { %9829 = vmatprep.subr.bf16.mxu0 %v9828_v8  ;;  %v9860_v37 = vpack.c.bf16 %v488_v34, %v487_v33  ;;  %v489_v38 = vld [vmem:[%s13996_s1 + $0x30] sm:$0xff]  ;;  %v490_v39 = vld [vmem:[%s13996_s1 + $0x38] sm:$0xff]  ;;  %v491_v43 = vld [vmem:[%s13996_s1 + $0x40] sm:$0xff] }
  0x18   : > { %v11162_v40 = vld [vmem:[%s11097_s25 + $0x39] sm:$0xff]  ;;  %v11165_v41 = vld [vmem:[%s11097_s25 + $0x49] sm:$0xff]  ;;  %v9864_v42 = vpack.c.bf16 %v490_v39, %v489_v38  ;;  %v11176_v45 = vld [vmem:[%s11097_s25 + $0x51] sm:$0xff] }
  0x19   : > { %v492_v44 = vld [vmem:[%s13996_s1 + $0x48] sm:$0xff]  ;;  %v493_v48 = vld [vmem:[%s13996_s1 + $0x50] sm:$0xff]  ;;  %v494_v49 = vld [vmem:[%s13996_s1 + $0x58] sm:$0xff] }
  0x1a   : > { %9831 = vmatpush3.bf16.msra.mxu0 %v9828_v8  ;;  %v11179_v46 = vld [vmem:[%s11097_s25 + $0x61] sm:$0xff]  ;;  %v9868_v47 = vpack.c.bf16 %v492_v44, %v491_v43  ;;  %v11190_v50 = vld [vmem:[%s11097_s25 + $0x69] sm:$0xff]  ;;  %v11193_v51 = vld [vmem:[%s11097_s25 + $0x79] sm:$0xff]  ;;  %v9872_v52 = vpack.c.bf16 %v494_v49, %v493_v48 }
  0x1b   : > { %9833 = vmatprep.subr.bf16.mxu0 %v9832_v12  ;;  %v495_v53 = vld [vmem:[%s13996_s1 + $0x60] sm:$0xff]  ;;  %v496_v54 = vld [vmem:[%s13996_s1 + $0x68] sm:$0xff]  ;;  %v11207_v56 = vld [vmem:[%s11097_s25 + $0x91] sm:$0xff] }
  0x1c   : > { %v11204_v55 = vld [vmem:[%s11097_s25 + $0x81] sm:$0xff]  ;;  %v9876_v57 = vpack.c.bf16 %v496_v54, %v495_v53  ;;  %v497_v58 = vld [vmem:[%s13996_s1 + $0x70] sm:$0xff]  ;;  %v498_v59 = vld [vmem:[%s13996_s1 + $0x78] sm:$0xff] }
  0x1d   : > { %v11218_v60 = vld [vmem:[%s11097_s25 + $0x99] sm:$0xff]  ;;  %v11221_v61 = vld [vmem:[%s11097_s25 + $0xa9] sm:$0xff]  ;;  %v9880_v62 = vpack.c.bf16 %v498_v59, %v497_v58  ;;  %v11232_v1 = vld [vmem:[%s11097_s25 + $0xb1] sm:$0xff] }
  0x1e   : > { %9835 = vmatpush3.bf16.msra.mxu0 %v9832_v12  ;;  %v7037_v63 = vld [vmem:[%s13996_s1 + $0x100] sm:$0xff]  ;;  %v7038_v0 = vld [vmem:[%s13996_s1 + $0x108] sm:$0xff]  ;;  %v11251_v7 = vld [vmem:[%s11097_s25 + $0xf1] sm:$0xff] }
  0x1f   : > { %9837 = vmatprep.subr.bf16.mxu0 %v9836_v15  ;;  %v11235_v2 = vld [vmem:[%s11097_s25 + $0xc1] sm:$0xff]  ;;  %v9884_v3 = vpack.c.bf16 %v7038_v0, %v7037_v63  ;;  %v11240_v4 = vld [vmem:[%s11097_s25 + $0xc9] sm:$0xff]  ;;  %v11243_v5 = vld [vmem:[%s11097_s25 + $0xd9] sm:$0xff] }
  0x20   : > { %v11248_v6 = vld [vmem:[%s11097_s25 + $0xe1] sm:$0xff]  ;;  %v11256_v8 = vld [vmem:[%s11097_s25 + $0xf9] sm:$0xff]  ;;  %v11259_v9 = vld [vmem:[%s11097_s25 + $0x109] sm:$0xff] }
  0x21   : > { %v11264_v10 = vld [vmem:[%s11097_s25 + $0x111] sm:$0xff]  ;;  %v11267_v11 = vld [vmem:[%s11097_s25 + $0x121] sm:$0xff]  ;;  %v11272_v12 = vld [vmem:[%s11097_s25 + $0x129] sm:$0xff] }
  0x22   : > { %9839 = vmatpush3.bf16.msra.mxu0 %v9836_v15  ;;  %14081 = vst [vmem:[#allocation5_spill] sm:$0xff] %v11272_v12  ;;  %v11275_v13 = vld [vmem:[%s11097_s25 + $0x139] sm:$0xff]  ;;  %v11280_v14 = vld [vmem:[%s11097_s25 + $0x141] sm:$0xff]  ;;  %v11283_v15 = vld [vmem:[%s11097_s25 + $0x151] sm:$0xff] }
  0x23   : > { %9841 = vmatprep.subr.bf16.mxu0 %v9840_v18  ;;  %14082 = vst [vmem:[#allocation6_spill] sm:$0xff] %v11275_v13  ;;  %14083 = vst [vmem:[#allocation7_spill] sm:$0xff] %v11280_v14  ;;  %v11288_v16 = vld [vmem:[%s11097_s25 + $0x159] sm:$0xff]  ;;  %v11291_v17 = vld [vmem:[%s11097_s25 + $0x169] sm:$0xff] }
  0x24   : > { %14084 = vst [vmem:[#allocation8_spill] sm:$0xff] %v11283_v15  ;;  %14085 = vst [vmem:[#allocation9_spill] sm:$0xff] %v11288_v16  ;;  %v451_v19 = vld [vmem:[%s11097_s25] sm:$0xff]  ;;  %v7039_v20 = vld [vmem:[%s13996_s1 + $0x110] sm:$0xff] }
  0x25   : > { %14086 = vst [vmem:[#allocation10_spill] sm:$0xff] %v11291_v17  ;;  %v452_v22 = vld [vmem:[%s11097_s25 + $0x8] sm:$0xff]  ;;  %v11308_v23 = vld [vmem:[%s11097_s25 + $0x18] sm:$0xff]  ;;  %v7041_v25 = vld [vmem:[%s13996_s1 + $0x120] sm:$0xff] }
  0x26   : > { %9843 = vmatpush3.bf16.msra.mxu0 %v9840_v18  ;;  %v11296_v18 = vld [vmem:[%s11097_s25 + $0x171] sm:$0xff]  ;;  %v7042_v26 = vld [vmem:[%s13996_s1 + $0x128] sm:$0xff]  ;;  %v7045_v38 = vld [vmem:[%s13996_s1 + $0x140] sm:$0xff] }
  0x27   : > { %9845 = vmatprep.subr.bf16.mxu0 %v9844_v21  ;;  %14087 = vst [vmem:[#allocation11_spill] sm:$0xff] %v11296_v18  ;;  %v11321_v28 = vld [vmem:[%s11097_s25 + $0x30] sm:$0xff]  ;;  %v9892_v29 = vpack.c.bf16 %v7042_v26, %v7041_v25  ;;  %v11332_v33 = vld [vmem:[%s11097_s25 + $0x38] sm:$0xff]  ;;  %v11335_v34 = vld [vmem:[%s11097_s25 + $0x48] sm:$0xff] }
  0x28   : > { %v7046_v39 = vld [vmem:[%s13996_s1 + $0x148] sm:$0xff]  ;;  %v11349_v43 = vld [vmem:[%s11097_s25 + $0x60] sm:$0xff]  ;;  %v7048_v48 = vld [vmem:[%s13996_s1 + $0x158] sm:$0xff] }
  0x29   : > { %v9900_v44 = vpack.c.bf16 %v7046_v39, %v7045_v38  ;;  %v11360_v49 = vld [vmem:[%s11097_s25 + $0x68] sm:$0xff]  ;;  %v7049_v54 = vld [vmem:[%s13996_s1 + $0x160] sm:$0xff]  ;;  %v11377_v59 = vld [vmem:[%s11097_s25 + $0x90] sm:$0xff] }
  0x2a   : > { %9847 = vmatpush3.bf16.msra.mxu0 %v9844_v21  ;;  %v7040_v21 = vld [vmem:[%s13996_s1 + $0x118] sm:$0xff]  ;;  %v11374_v58 = vld [vmem:[%s11097_s25 + $0x80] sm:$0xff]  ;;  %v7051_v63 = vld [vmem:[%s13996_s1 + $0x170] sm:$0xff] }
  0x2b   : > { %9849 = vmatprep.subr.bf16.mxu0 %v9848_v24  ;;  %v7052_v0 = vld [vmem:[%s13996_s1 + $0x178] sm:$0xff]  ;;  %v11405_v25 = vld [vmem:[%s11097_s25 + $0xc0] sm:$0xff]  ;;  %v11429_v39 = vld [vmem:[%s11097_s25 + $0x108] sm:$0xff] }
  0x2c   : > { %v11426_v38 = vld [vmem:[%s11097_s25 + $0xf8] sm:$0xff] }
  0x2e   : > { %9851 = vmatpush3.bf16.msra.mxu0 %v9848_v24  ;;  %v9888_v24 = vpack.c.bf16 %v7040_v21, %v7039_v20  ;;  %v9912_v20 = vpack.c.bf16 %v7052_v0, %v7051_v63  ;;  %v7085_v21 = vld [vmem:[%s13996_s1 + $0x180] sm:$0xff]  ;;  %v11461_v63 = vld [vmem:[%s11097_s25 + $0x168] sm:$0xff]  ;;  %v11466_v0 = vld [vmem:[%s11097_s25 + $0x170] sm:$0xff] }
  0x2f   : > { %9853 = vmatprep.subr.bf16.mxu0 %v9852_v27 }
  0x31   : > { %8413 = vmatmul.mubr.f32.vlgmr.msra.gmra.mrb[0].mxu0 %v500_v30  ;;  %v7043_v30 = vld [vmem:[%s13996_s1 + $0x130] sm:$0xff] }
  0x32   : > { %9855 = vmatpush3.bf16.msra.mxu0 %v9852_v27  ;;  %8415 = vmatprep.mubr.f32.mxu0 %v11138_v31  ;;  %v11318_v27 = vld [vmem:[%s11097_s25 + $0x20] sm:$0xff] }
  0x33   : > { %9857 = vmatprep.subr.bf16.mxu0 %v9856_v32 }
  0x35   : > { %8416 = vmatmul.mubr.f32.gmra.mrb[2].mxu0 %v11148_v35 }
  0x36   : > { %8418 = vmatprep.mubr.f32.mxu0 %v11151_v36  ;;  %9859 = vmatpush3.bf16.msra.mxu0 %v9856_v32  ;;  %v7044_v32 = vld [vmem:[%s13996_s1 + $0x138] sm:$0xff] }
  0x37   : > { %9861 = vmatprep.subr.bf16.mxu0 %v9860_v37 }
  0x39   : > { %8419 = vmatmul.mubr.f32.gmra.mrb[4].mxu0 %v11162_v40 }
  0x3a   : > { %8421 = vmatprep.mubr.f32.mxu0 %v11165_v41  ;;  %9863 = vmatpush3.bf16.msra.mxu0 %v9860_v37  ;;  %v9896_v37 = vpack.c.bf16 %v7044_v32, %v7043_v30  ;;  %v11413_v30 = vld [vmem:[%s11097_s25 + $0xd8] sm:$0xff]  ;;  %v11418_v32 = vld [vmem:[%s11097_s25 + $0xe0] sm:$0xff] }
  0x3b   : > { %9865 = vmatprep.subr.bf16.mxu0 %v9864_v42 }
  0x3d   : > { %8422 = vmatmul.mubr.f32.gmra.mrb[6].mxu0 %v11176_v45 }
  0x3e   : > { %8424 = vmatprep.mubr.f32.mxu0 %v11179_v46  ;;  %9867 = vmatpush3.bf16.msra.mxu0 %v9864_v42  ;;  %v11346_v42 = vld [vmem:[%s11097_s25 + $0x50] sm:$0xff] }
  0x3f   : > { %9869 = vmatprep.subr.bf16.mxu0 %v9868_v47 }
  0x41   : > { %8425 = vmatmul.mubr.f32.gmra.mrb[8].mxu0 %v11190_v50 }
  0x42   : > { %8427 = vmatprep.mubr.f32.mxu0 %v11193_v51  ;;  %9871 = vmatpush3.bf16.msra.mxu0 %v9868_v47  ;;  %v7047_v47 = vld [vmem:[%s13996_s1 + $0x150] sm:$0xff] }
  0x43   : > { %9873 = vmatprep.subr.bf16.mxu0 %v9872_v52  ;;  %v9904_v53 = vpack.c.bf16 %v7048_v48, %v7047_v47  ;;  %v11437_v47 = vld [vmem:[%s11097_s25 + $0x120] sm:$0xff]  ;;  %v11442_v48 = vld [vmem:[%s11097_s25 + $0x128] sm:$0xff] }
  0x45   : > { %8428 = vmatmul.mubr.f32.gmra.mrb[10].mxu0 %v11204_v55 }
  0x46   : > { %8430 = vmatprep.mubr.f32.mxu0 %v11207_v56  ;;  %9875 = vmatpush3.bf16.msra.mxu0 %v9872_v52  ;;  %v11363_v52 = vld [vmem:[%s11097_s25 + $0x78] sm:$0xff] }
  0x47   : > { %9877 = vmatprep.subr.bf16.mxu0 %v9876_v57 }
  0x49   : > { %8431 = vmatmul.mubr.f32.gmra.mrb[12].mxu0 %v11218_v60 }
  0x4a   : > { %8433 = vmatprep.mubr.f32.mxu0 %v11221_v61  ;;  %9879 = vmatpush3.bf16.msra.mxu0 %v9876_v57  ;;  %v7050_v57 = vld [vmem:[%s13996_s1 + $0x168] sm:$0xff] }
  0x4b   : > { %9881 = vmatprep.subr.bf16.mxu0 %v9880_v62 }
  0x4d   : > { %8434 = vmatmul.mubr.f32.gmra.mrb[14].mxu0 %v11232_v1 }
  0x4e   : > { %8436 = vmatprep.mubr.f32.mxu0 %v11235_v2  ;;  %9883 = vmatpush3.bf16.msra.mxu0 %v9880_v62  ;;  %v9908_v62 = vpack.c.bf16 %v7050_v57, %v7049_v54  ;;  %v11450_v54 = vld [vmem:[%s11097_s25 + $0x140] sm:$0xff]  ;;  %v11453_v57 = vld [vmem:[%s11097_s25 + $0x150] sm:$0xff] }
  0x4f   : > { %9885 = vmatprep.subr.bf16.mxu0 %v9884_v3 }
  0x51   : > { %8437 = vmatmul.mubr.f32.gmra.mrb[16].mxu0 %v11240_v4 }
  0x52   : > { %8439 = vmatprep.mubr.f32.mxu0 %v11243_v5 }
  0x55   : > { %8440 = vmatmul.mubr.f32.gmra.mrb[18].mxu0 %v11248_v6 }
  0x56   : > { %8442 = vmatprep.mubr.f32.mxu0 %v11251_v7 }
  0x59   : > { %8443 = vmatmul.mubr.f32.gmra.mrb[20].mxu0 %v11256_v8 }
  0x5a   : > { %8445 = vmatprep.mubr.f32.mxu0 %v11259_v9 }
  0x5d   : > { %8446 = vmatmul.mubr.f32.gmra.mrb[22].mxu0 %v11264_v10 }
  0x5e   : > { %8448 = vmatprep.mubr.f32.mxu0 %v11267_v11 }
  0x61   : > { %8449 = vmatmul.mubr.f32.gmra.mrb[24].mxu0 %v11272_v12  ;;  %v7092_v12 = vld [vmem:[%s13996_s1 + $0x1b8] sm:$0xff] }
  0x62   : > { %8451 = vmatprep.mubr.f32.mxu0 %v11275_v13  ;;  %v11488_v13 = vld [vmem:[%s11097_s25 + $0x22] sm:$0xff] }
  0x63   : > { %14089 = vst [vmem:[#allocation13_spill] sm:$0xff] %v11488_v13 }
  0x65   : > { %8452 = vmatmul.mubr.f32.gmra.mrb[26].mxu0 %v11280_v14  ;;  %v7090_v14 = vld [vmem:[%s13996_s1 + $0x1a8] sm:$0xff] }
  0x66   : > { %8454 = vmatprep.mubr.f32.mxu0 %v11283_v15  ;;  %v7089_v15 = vld [vmem:[%s13996_s1 + $0x1a0] sm:$0xff] }
  0x69   : > { %8455 = vmatmul.mubr.f32.gmra.mrb[28].mxu0 %v11288_v16 }
  0x6a   : > { %8457 = vmatprep.mubr.f32.mxu0 %v11291_v17  ;;  %v11478_v17 = vld [vmem:[%s11097_s25 + $0x1a] sm:$0xff] }
  0x6b   : > { %14088 = vst [vmem:[#allocation12_spill] sm:$0xff] %v11478_v17 }
  0x6d   : > { %8458 = vmatmul.mubr.f32.gmra.mrb[30].mxu0 %v11296_v18  ;;  %v999_v18 = vld [vmem:[%s11097_s25 + $0xa] sm:$0xff] }
  0x6e   : > { %8492 = vmatprep.mubr.f32.mxu0 %v451_v19  ;;  %v11391_v19 = vld [vmem:[%s11097_s25 + $0xa8] sm:$0xff] }
  0x71   : > { %8493 = vmatmul.mubr.f32.vlgmr.msra.gmra.mrb[0].mxu0 %v452_v22  ;;  %v7086_v22 = vld [vmem:[%s13996_s1 + $0x188] sm:$0xff] }
  0x72   : > { %9887 = vmatpush3.bf16.msra.mxu0 %v9884_v3  ;;  %8495 = vmatprep.mubr.f32.mxu0 %v11308_v23  ;;  %v11388_v3 = vld [vmem:[%s11097_s25 + $0x98] sm:$0xff]  ;;  %v9916_v26 = vpack.c.bf16 %v7086_v22, %v7085_v21  ;;  %v7087_v21 = vld [vmem:[%s13996_s1 + $0x190] sm:$0xff] }
  0x73   : > { %9889 = vmatprep.subr.bf16.mxu0 %v9888_v24  ;;  %v7088_v22 = vld [vmem:[%s13996_s1 + $0x198] sm:$0xff] }
  0x74   : > { %v9920_v16 = vpack.c.bf16 %v7088_v22, %v7087_v21  ;;  %v9924_v21 = vpack.c.bf16 %v7090_v14, %v7089_v15  ;;  %v7091_v22 = vld [vmem:[%s13996_s1 + $0x1b0] sm:$0xff]  ;;  %v7093_v15 = vld [vmem:[%s13996_s1 + $0x1c0] sm:$0xff] }
  0x75   : > { %8496 = vmatmul.mubr.f32.gmra.mrb[2].mxu0 %v11318_v27  ;;  %v9928_v14 = vpack.c.bf16 %v7092_v12, %v7091_v22  ;;  %v7095_v22 = vld [vmem:[%s13996_s1 + $0x1d0] sm:$0xff] }
  0x76   : > { %8498 = vmatprep.mubr.f32.mxu0 %v11321_v28  ;;  %9891 = vmatpush3.bf16.msra.mxu0 %v9888_v24  ;;  %v11402_v24 = vld [vmem:[%s11097_s25 + $0xb0] sm:$0xff] }
  0x77   : > { %9893 = vmatprep.subr.bf16.mxu0 %v9892_v29 }
  0x79   : > { %8499 = vmatmul.mubr.f32.gmra.mrb[4].mxu0 %v11332_v33 }
  0x7a   : > { %8501 = vmatprep.mubr.f32.mxu0 %v11335_v34  ;;  %9895 = vmatpush3.bf16.msra.mxu0 %v9892_v29  ;;  %v11410_v29 = vld [vmem:[%s11097_s25 + $0xc8] sm:$0xff] }
  0x7b   : > { %9897 = vmatprep.subr.bf16.mxu0 %v9896_v37 }
  0x7d   : > { %8502 = vmatmul.mubr.f32.gmra.mrb[6].mxu0 %v11346_v42 }
  0x7e   : > { %8504 = vmatprep.mubr.f32.mxu0 %v11349_v43  ;;  %9899 = vmatpush3.bf16.msra.mxu0 %v9896_v37  ;;  %v11421_v37 = vld [vmem:[%s11097_s25 + $0xf0] sm:$0xff] }
  0x7f   : > { %9901 = vmatprep.subr.bf16.mxu0 %v9900_v44 }
  0x81   : > { %8505 = vmatmul.mubr.f32.gmra.mrb[8].mxu0 %v11360_v49 }
  0x82   : > { %8507 = vmatprep.mubr.f32.mxu0 %v11363_v52  ;;  %9903 = vmatpush3.bf16.msra.mxu0 %v9900_v44  ;;  %v11434_v44 = vld [vmem:[%s11097_s25 + $0x110] sm:$0xff] }
  0x83   : > { %9905 = vmatprep.subr.bf16.mxu0 %v9904_v53 }
  0x85   : > { %8508 = vmatmul.mubr.f32.gmra.mrb[10].mxu0 %v11374_v58 }
  0x86   : > { %8510 = vmatprep.mubr.f32.mxu0 %v11377_v59  ;;  %9907 = vmatpush3.bf16.msra.mxu0 %v9904_v53  ;;  %v11445_v53 = vld [vmem:[%s11097_s25 + $0x138] sm:$0xff] }
  0x87   : > { %9909 = vmatprep.subr.bf16.mxu0 %v9908_v62 }
  0x89   : > { %8511 = vmatmul.mubr.f32.gmra.mrb[12].mxu0 %v11388_v3 }
  0x8a   : > { %8513 = vmatprep.mubr.f32.mxu0 %v11391_v19  ;;  %9911 = vmatpush3.bf16.msra.mxu0 %v9908_v62  ;;  %v11458_v62 = vld [vmem:[%s11097_s25 + $0x158] sm:$0xff] }
  0x8b   : > { %9913 = vmatprep.subr.bf16.mxu0 %v9912_v20 }
  0x8d   : > { %8514 = vmatmul.mubr.f32.gmra.mrb[14].mxu0 %v11402_v24 }
  0x8e   : > { %8516 = vmatprep.mubr.f32.mxu0 %v11405_v25  ;;  %9915 = vmatpush3.bf16.msra.mxu0 %v9912_v20  ;;  %v998_v20 = vld [vmem:[%s11097_s25 + $0x2] sm:$0xff] }
  0x8f   : > { %9917 = vmatprep.subr.bf16.mxu0 %v9916_v26 }
  0x91   : > { %8517 = vmatmul.mubr.f32.gmra.mrb[16].mxu0 %v11410_v29 }
  0x92   : > { %8519 = vmatprep.mubr.f32.mxu0 %v11413_v30 }
  0x95   : > { %8520 = vmatmul.mubr.f32.gmra.mrb[18].mxu0 %v11418_v32 }
  0x96   : > { %8522 = vmatprep.mubr.f32.mxu0 %v11421_v37 }
  0x99   : > { %8523 = vmatmul.mubr.f32.gmra.mrb[20].mxu0 %v11426_v38 }
  0x9a   : > { %8525 = vmatprep.mubr.f32.mxu0 %v11429_v39 }
  0x9d   : > { %8526 = vmatmul.mubr.f32.gmra.mrb[22].mxu0 %v11434_v44 }
  0x9e   : > { %8528 = vmatprep.mubr.f32.mxu0 %v11437_v47 }
  0xa1   : > { %8529 = vmatmul.mubr.f32.gmra.mrb[24].mxu0 %v11442_v48 }
  0xa2   : > { %8531 = vmatprep.mubr.f32.mxu0 %v11445_v53 }
  0xa5   : > { %8532 = vmatmul.mubr.f32.gmra.mrb[26].mxu0 %v11450_v54 }
  0xa6   : > { %8534 = vmatprep.mubr.f32.mxu0 %v11453_v57 }
  0xa9   : > { %8535 = vmatmul.mubr.f32.gmra.mrb[28].mxu0 %v11458_v62 }
  0xaa   : > { %8537 = vmatprep.mubr.f32.mxu0 %v11461_v63 }
  0xad   : > { %8538 = vmatmul.mubr.f32.gmra.mrb[30].mxu0 %v11466_v0 }
  0xae   : > { %8572 = vmatprep.mubr.f32.mxu0 %v998_v20  ;;  %v11491_v20 = vld [vmem:[%s11097_s25 + $0x32] sm:$0xff] }
  0xaf   : > { %14090 = vst [vmem:[#allocation14_spill] sm:$0xff] %v11491_v20 }
  0xb1   : > { %8573 = vmatmul.mubr.f32.vlgmr.msra.gmra.mrb[0].mxu0 %v999_v18  ;;  %v11502_v18 = vld [vmem:[%s11097_s25 + $0x3a] sm:$0xff] }
  0xb2   : > { %9919 = vmatpush3.bf16.msra.mxu0 %v9916_v26  ;;  %8575 = vmatprep.mubr.f32.mxu0 %v11478_v17  ;;  %14091 = vst [vmem:[#allocation15_spill] sm:$0xff] %v11502_v18  ;;  %v11505_v26 = vld [vmem:[%s11097_s25 + $0x4a] sm:$0xff] }
  0xb3   : > { %9921 = vmatprep.subr.bf16.mxu0 %v9920_v16  ;;  %14092 = vst [vmem:[#allocation16_spill] sm:$0xff] %v11505_v26  ;;  %v7094_v17 = vld [vmem:[%s13996_s1 + $0x1c8] sm:$0xff] }
  0xb4   : > { %v9932_v12 = vpack.c.bf16 %v7094_v17, %v7093_v15  ;;  %v7097_v15 = vld [vmem:[%s13996_s1 + $0x1e0] sm:$0xff] }
  0xb5   : > { %8576 = vmatmul.mubr.f32.gmra.mrb[2].mxu0 %v11488_v13  ;;  %v7096_v13 = vld [vmem:[%s13996_s1 + $0x1d8] sm:$0xff] }
  0xb6   : > { %8578 = vmatprep.mubr.f32.mxu0 %v11491_v20  ;;  %9923 = vmatpush3.bf16.msra.mxu0 %v9920_v16  ;;  %v11516_v20 = vld [vmem:[%s11097_s25 + $0x52] sm:$0xff]  ;;  %v11519_v16 = vld [vmem:[%s11097_s25 + $0x62] sm:$0xff]  ;;  %v9936_v17 = vpack.c.bf16 %v7096_v13, %v7095_v22 }
  0xb7   : > { %9925 = vmatprep.subr.bf16.mxu0 %v9924_v21  ;;  %14093 = vst [vmem:[#allocation17_spill] sm:$0xff] %v11516_v20  ;;  %14094 = vst [vmem:[#allocation18_spill] sm:$0xff] %v11519_v16  ;;  %v7099_v22 = vld [vmem:[%s13996_s1 + $0x1f0] sm:$0xff] }
  0xb9   : > { %8579 = vmatmul.mubr.f32.gmra.mrb[4].mxu0 %v11502_v18  ;;  %v7098_v18 = vld [vmem:[%s13996_s1 + $0x1e8] sm:$0xff] }
  0xba   : > { %8581 = vmatprep.mubr.f32.mxu0 %v11505_v26  ;;  %9927 = vmatpush3.bf16.msra.mxu0 %v9924_v21  ;;  %v11530_v26 = vld [vmem:[%s11097_s25 + $0x6a] sm:$0xff]  ;;  %v11533_v21 = vld [vmem:[%s11097_s25 + $0x7a] sm:$0xff]  ;;  %v9940_v13 = vpack.c.bf16 %v7098_v18, %v7097_v15 }
  0xbb   : > { %9929 = vmatprep.subr.bf16.mxu0 %v9928_v14  ;;  %14095 = vst [vmem:[#allocation19_spill] sm:$0xff] %v11530_v26  ;;  %14096 = vst [vmem:[#allocation20_spill] sm:$0xff] %v11533_v21  ;;  %v7133_v15 = vld [vmem:[%s13996_s1 + $0x200] sm:$0xff] }
  0xbd   : > { %8582 = vmatmul.mubr.f32.gmra.mrb[6].mxu0 %v11516_v20  ;;  %v7100_v20 = vld [vmem:[%s13996_s1 + $0x1f8] sm:$0xff] }
  0xbe   : > { %8584 = vmatprep.mubr.f32.mxu0 %v11519_v16  ;;  %9931 = vmatpush3.bf16.msra.mxu0 %v9928_v14  ;;  %v11544_v16 = vld [vmem:[%s11097_s25 + $0x82] sm:$0xff]  ;;  %v11547_v14 = vld [vmem:[%s11097_s25 + $0x92] sm:$0xff]  ;;  %v9944_v18 = vpack.c.bf16 %v7100_v20, %v7099_v22  ;;  %v11580_v22 = vld [vmem:[%s11097_s25 + $0xca] sm:$0xff] }
  0xbf   : > { %9933 = vmatprep.subr.bf16.mxu0 %v9932_v12  ;;  %14097 = vst [vmem:[#allocation21_spill] sm:$0xff] %v11547_v14  ;;  %14100 = vst [vmem:[#allocation24_spill] sm:$0xff] %v11580_v22 }
  0xc1   : > { %8585 = vmatmul.mubr.f32.gmra.mrb[8].mxu0 %v11530_v26  ;;  %v7134_v26 = vld [vmem:[%s13996_s1 + $0x208] sm:$0xff] }
  0xc2   : > { %8587 = vmatprep.mubr.f32.mxu0 %v11533_v21  ;;  %9935 = vmatpush3.bf16.msra.mxu0 %v9932_v12  ;;  %v11558_v21 = vld [vmem:[%s11097_s25 + $0x9a] sm:$0xff]  ;;  %v11561_v12 = vld [vmem:[%s11097_s25 + $0xaa] sm:$0xff]  ;;  %v9948_v20 = vpack.c.bf16 %v7134_v26, %v7133_v15  ;;  %v11591_v26 = vld [vmem:[%s11097_s25 + $0xf2] sm:$0xff] }
  0xc3   : > { %9937 = vmatprep.subr.bf16.mxu0 %v9936_v17  ;;  %14098 = vst [vmem:[#allocation22_spill] sm:$0xff] %v11558_v21  ;;  %14103 = vst [vmem:[#allocation27_spill] sm:$0xff] %v11591_v26  ;;  %v11599_v15 = vld [vmem:[%s11097_s25 + $0x10a] sm:$0xff] }
  0xc4   : > { %14105 = vst [vmem:[#allocation29_spill] sm:$0xff] %v11599_v15 }
  0xc5   : > { %8588 = vmatmul.mubr.f32.gmra.mrb[10].mxu0 %v11544_v16 }
  0xc6   : > { %8590 = vmatprep.mubr.f32.mxu0 %v11547_v14  ;;  %9939 = vmatpush3.bf16.msra.mxu0 %v9936_v17  ;;  %v11572_v17 = vld [vmem:[%s11097_s25 + $0xb2] sm:$0xff]  ;;  %v11575_v14 = vld [vmem:[%s11097_s25 + $0xc2] sm:$0xff] }
  0xc7   : > { %9941 = vmatprep.subr.bf16.mxu0 %v9940_v13  ;;  %14099 = vst [vmem:[#allocation23_spill] sm:$0xff] %v11575_v14 }
  0xc9   : > { %8591 = vmatmul.mubr.f32.gmra.mrb[12].mxu0 %v11558_v21  ;;  %v11583_v21 = vld [vmem:[%s11097_s25 + $0xda] sm:$0xff] }
  0xca   : > { %8593 = vmatprep.mubr.f32.mxu0 %v11561_v12  ;;  %9943 = vmatpush3.bf16.msra.mxu0 %v9940_v13  ;;  %14101 = vst [vmem:[#allocation25_spill] sm:$0xff] %v11583_v21  ;;  %v11588_v13 = vld [vmem:[%s11097_s25 + $0xe2] sm:$0xff] }
  0xcb   : > { %9945 = vmatprep.subr.bf16.mxu0 %v9944_v18  ;;  %14102 = vst [vmem:[#allocation26_spill] sm:$0xff] %v11588_v13 }
  0xcd   : > { %8594 = vmatmul.mubr.f32.gmra.mrb[14].mxu0 %v11572_v17 }
  0xce   : > { %8596 = vmatprep.mubr.f32.mxu0 %v11575_v14  ;;  %9947 = vmatpush3.bf16.msra.mxu0 %v9944_v18  ;;  %v11596_v18 = vld [vmem:[%s11097_s25 + $0xfa] sm:$0xff] }
  0xcf   : > { %9949 = vmatprep.subr.bf16.mxu0 %v9948_v20  ;;  %14104 = vst [vmem:[#allocation28_spill] sm:$0xff] %v11596_v18  ;;  %v11628_v14 = vld [vmem:[%s11097_s25 + $0x15a] sm:$0xff] }
  0xd0   : > { %14112 = vst [vmem:[#allocation36_spill] sm:$0xff] %v11628_v14 }
  0xd1   : > { %8597 = vmatmul.mubr.f32.gmra.mrb[16].mxu0 %v11580_v22  ;;  %v11607_v22 = vld [vmem:[%s11097_s25 + $0x122] sm:$0xff] }
  0xd2   : > { %8599 = vmatprep.mubr.f32.mxu0 %v11583_v21  ;;  %v11604_v21 = vld [vmem:[%s11097_s25 + $0x112] sm:$0xff]  ;;  %14107 = vst [vmem:[#allocation31_spill] sm:$0xff] %v11607_v22 }
  0xd3   : > { %14106 = vst [vmem:[#allocation30_spill] sm:$0xff] %v11604_v21 }
  0xd5   : > { %8600 = vmatmul.mubr.f32.gmra.mrb[18].mxu0 %v11588_v13  ;;  %v11615_v13 = vld [vmem:[%s11097_s25 + $0x13a] sm:$0xff] }
  0xd6   : > { %8602 = vmatprep.mubr.f32.mxu0 %v11591_v26  ;;  %v11612_v26 = vld [vmem:[%s11097_s25 + $0x12a] sm:$0xff]  ;;  %14109 = vst [vmem:[#allocation33_spill] sm:$0xff] %v11615_v13 }
  0xd7   : > { %14108 = vst [vmem:[#allocation32_spill] sm:$0xff] %v11612_v26 }
  0xd9   : > { %8603 = vmatmul.mubr.f32.gmra.mrb[20].mxu0 %v11596_v18  ;;  %v11620_v18 = vld [vmem:[%s11097_s25 + $0x142] sm:$0xff] }
  0xda   : > { %8605 = vmatprep.mubr.f32.mxu0 %v11599_v15  ;;  %14110 = vst [vmem:[#allocation34_spill] sm:$0xff] %v11620_v18  ;;  %v11623_v15 = vld [vmem:[%s11097_s25 + $0x152] sm:$0xff] }
  0xdb   : > { %14111 = vst [vmem:[#allocation35_spill] sm:$0xff] %v11623_v15 }
  0xdd   : > { %8606 = vmatmul.mubr.f32.gmra.mrb[22].mxu0 %v11604_v21  ;;  %v11631_v21 = vld [vmem:[%s11097_s25 + $0x16a] sm:$0xff] }
  0xde   : > { %8608 = vmatprep.mubr.f32.mxu0 %v11607_v22  ;;  %14113 = vst [vmem:[#allocation37_spill] sm:$0xff] %v11631_v21  ;;  %v11636_v22 = vld [vmem:[%s11097_s25 + $0x172] sm:$0xff] }
  0xe1   : > { %8609 = vmatmul.mubr.f32.gmra.mrb[24].mxu0 %v11612_v26 }
  0xe2   : > { %8611 = vmatprep.mubr.f32.mxu0 %v11615_v13  ;;  %v7135_v13 = vld [vmem:[%s13996_s1 + $0x210] sm:$0xff] }
  0xe5   : > { %8612 = vmatmul.mubr.f32.gmra.mrb[26].mxu0 %v11620_v18  ;;  %v7136_v18 = vld [vmem:[%s13996_s1 + $0x218] sm:$0xff] }
  0xe6   : > { %8614 = vmatprep.mubr.f32.mxu0 %v11623_v15  ;;  %v9952_v15 = vpack.c.bf16 %v7136_v18, %v7135_v13  ;;  %v7140_v13 = vld [vmem:[%s13996_s1 + $0x238] sm:$0xff]  ;;  %v7143_v18 = vld [vmem:[%s13996_s1 + $0x250] sm:$0xff] }
  0xe9   : > { %8615 = vmatmul.mubr.f32.gmra.mrb[28].mxu0 %v11628_v14  ;;  %v7137_v14 = vld [vmem:[%s13996_s1 + $0x220] sm:$0xff] }
  0xea   : > { %8617 = vmatprep.mubr.f32.mxu0 %v11631_v21  ;;  %v7138_v21 = vld [vmem:[%s13996_s1 + $0x228] sm:$0xff] }
  0xeb   : > { %v9956_v26 = vpack.c.bf16 %v7138_v21, %v7137_v14  ;;  %v7142_v21 = vld [vmem:[%s13996_s1 + $0x248] sm:$0xff] }
  0xed   : > { %8618 = vmatmul.mubr.f32.gmra.mrb[30].mxu0 %v11636_v22 }
  0xee   : > { %8652 = vmatprep.mubr.f32.mxu0 %v11308_v23  ;;  %v7139_v23 = vld [vmem:[%s13996_s1 + $0x230] sm:$0xff] }
  0xf1   : > { %8653 = vmatmul.mubr.f32.vlgmr.msra.gmra.mrb[0].mxu0 %v11318_v27  ;;  %v9960_v27 = vpack.c.bf16 %v7140_v13, %v7139_v23  ;;  %v7146_v13 = vld [vmem:[%s13996_s1 + $0x268] sm:$0xff] }
  0xf2   : > { %9951 = vmatpush3.bf16.msra.mxu0 %v9948_v20  ;;  %8655 = vmatprep.mubr.f32.mxu0 %v11321_v28  ;;  %v7141_v20 = vld [vmem:[%s13996_s1 + $0x240] sm:$0xff] }
  0xf3   : > { %9953 = vmatprep.subr.bf16.mxu0 %v9952_v15  ;;  %v9964_v14 = vpack.c.bf16 %v7142_v21, %v7141_v20  ;;  %v7148_v21 = vld [vmem:[%s13996_s1 + $0x278] sm:$0xff] }
  0xf5   : > { %8656 = vmatmul.mubr.f32.gmra.mrb[2].mxu0 %v11332_v33 }
  0xf6   : > { %8658 = vmatprep.mubr.f32.mxu0 %v11335_v34  ;;  %9955 = vmatpush3.bf16.msra.mxu0 %v9952_v15  ;;  %v7144_v15 = vld [vmem:[%s13996_s1 + $0x258] sm:$0xff] }
  0xf7   : > { %9957 = vmatprep.subr.bf16.mxu0 %v9956_v26  ;;  %v9968_v23 = vpack.c.bf16 %v7144_v15, %v7143_v18  ;;  %v7182_v15 = vld [vmem:[%s13996_s1 + $0x288] sm:$0xff] }
  0xf9   : > { %8659 = vmatmul.mubr.f32.gmra.mrb[4].mxu0 %v11346_v42 }
  0xfa   : > { %8661 = vmatprep.mubr.f32.mxu0 %v11349_v43  ;;  %9959 = vmatpush3.bf16.msra.mxu0 %v9956_v26  ;;  %v7145_v26 = vld [vmem:[%s13996_s1 + $0x260] sm:$0xff] }
  0xfb   : > { %9961 = vmatprep.subr.bf16.mxu0 %v9960_v27  ;;  %v9972_v20 = vpack.c.bf16 %v7146_v13, %v7145_v26  ;;  %v11722_v13 = vld [vmem:[%s11097_s25 + $0x188] sm:$0xff] }
  0xfd   : > { %8662 = vmatmul.mubr.f32.gmra.mrb[6].mxu0 %v11360_v49 }
  0xfe   : > { %8664 = vmatprep.mubr.f32.mxu0 %v11363_v52  ;;  %9963 = vmatpush3.bf16.msra.mxu0 %v9960_v27  ;;  %v7147_v27 = vld [vmem:[%s13996_s1 + $0x270] sm:$0xff] }
  0xff   : > { %9965 = vmatprep.subr.bf16.mxu0 %v9964_v14  ;;  %v9976_v18 = vpack.c.bf16 %v7148_v21, %v7147_v27  ;;  %v7184_v27 = vld [vmem:[%s13996_s1 + $0x298] sm:$0xff] }
 0x101   : > { %8665 = vmatmul.mubr.f32.gmra.mrb[8].mxu0 %v11374_v58 }
 0x102   : > { %8667 = vmatprep.mubr.f32.mxu0 %v11377_v59  ;;  %9967 = vmatpush3.bf16.msra.mxu0 %v9964_v14  ;;  %v7181_v14 = vld [vmem:[%s13996_s1 + $0x280] sm:$0xff] }
 0x103   : > { %9969 = vmatprep.subr.bf16.mxu0 %v9968_v23  ;;  %v9980_v26 = vpack.c.bf16 %v7182_v15, %v7181_v14  ;;  %v7186_v14 = vld [vmem:[%s13996_s1 + $0x2a8] sm:$0xff] }
 0x105   : > { %8668 = vmatmul.mubr.f32.gmra.mrb[10].mxu0 %v11388_v3 }
 0x106   : > { %8670 = vmatprep.mubr.f32.mxu0 %v11391_v19  ;;  %9971 = vmatpush3.bf16.msra.mxu0 %v9968_v23  ;;  %v11717_v23 = vld [vmem:[%s11097_s25 + $0x180] sm:$0xff] }
 0x107   : > { %9973 = vmatprep.subr.bf16.mxu0 %v9972_v20 }
 0x109   : > { %8671 = vmatmul.mubr.f32.gmra.mrb[12].mxu0 %v11402_v24 }
 0x10a   : > { %8673 = vmatprep.mubr.f32.mxu0 %v11405_v25  ;;  %9975 = vmatpush3.bf16.msra.mxu0 %v9972_v20  ;;  %v7183_v20 = vld [vmem:[%s13996_s1 + $0x290] sm:$0xff] }
 0x10b   : > { %9977 = vmatprep.subr.bf16.mxu0 %v9976_v18  ;;  %v9984_v21 = vpack.c.bf16 %v7184_v27, %v7183_v20  ;;  %v7188_v20 = vld [vmem:[%s13996_s1 + $0x2b8] sm:$0xff] }
 0x10c   : > { %v7192_v27 = vld [vmem:[%s13996_s1 + $0x2d8] sm:$0xff] }
 0x10d   : > { %8674 = vmatmul.mubr.f32.gmra.mrb[14].mxu0 %v11410_v29 }
 0x10e   : > { %8676 = vmatprep.mubr.f32.mxu0 %v11413_v30  ;;  %9979 = vmatpush3.bf16.msra.mxu0 %v9976_v18  ;;  %v7185_v18 = vld [vmem:[%s13996_s1 + $0x2a0] sm:$0xff] }
 0x10f   : > { %9981 = vmatprep.subr.bf16.mxu0 %v9980_v26  ;;  %v9988_v15 = vpack.c.bf16 %v7186_v14, %v7185_v18  ;;  %v7196_v18 = vld [vmem:[%s13996_s1 + $0x2f8] sm:$0xff]  ;;  %v7230_v14 = vld [vmem:[%s13996_s1 + $0x308] sm:$0xff] }
 0x111   : > { %8677 = vmatmul.mubr.f32.gmra.mrb[16].mxu0 %v11418_v32 }
 0x112   : > { %8679 = vmatprep.mubr.f32.mxu0 %v11421_v37 }
 0x115   : > { %8680 = vmatmul.mubr.f32.gmra.mrb[18].mxu0 %v11426_v38 }
 0x116   : > { %8682 = vmatprep.mubr.f32.mxu0 %v11429_v39 }
 0x119   : > { %8683 = vmatmul.mubr.f32.gmra.mrb[20].mxu0 %v11434_v44 }
 0x11a   : > { %8685 = vmatprep.mubr.f32.mxu0 %v11437_v47 }
 0x11d   : > { %8686 = vmatmul.mubr.f32.gmra.mrb[22].mxu0 %v11442_v48 }
 0x11e   : > { %8688 = vmatprep.mubr.f32.mxu0 %v11445_v53 }
 0x121   : > { %8689 = vmatmul.mubr.f32.gmra.mrb[24].mxu0 %v11450_v54 }
 0x122   : > { %8691 = vmatprep.mubr.f32.mxu0 %v11453_v57 }
 0x125   : > { %8692 = vmatmul.mubr.f32.gmra.mrb[26].mxu0 %v11458_v62 }
 0x126   : > { %8694 = vmatprep.mubr.f32.mxu0 %v11461_v63 }
 0x129   : > { %8695 = vmatmul.mubr.f32.gmra.mrb[28].mxu0 %v11466_v0 }
 0x12a   : > { %8697 = vmatprep.mubr.f32.mxu0 %v11717_v23 }
 0x12d   : > { %8698 = vmatmul.mubr.f32.gmra.mrb[30].mxu0 %v11722_v13 }
 0x12e   : > { %8732 = vmatprep.mubr.f32.mxu0 %v11138_v31  ;;  %v7187_v31 = vld [vmem:[%s13996_s1 + $0x2b0] sm:$0xff] }
 0x131   : > { %8733 = vmatmul.mubr.f32.vlgmr.msra.gmra.mrb[0].mxu0 %v11148_v35  ;;  %v9992_v35 = vpack.c.bf16 %v7188_v20, %v7187_v31  ;;  %v7233_v20 = vld [vmem:[%s13996_s1 + $0x320] sm:$0xff] }
 0x132   : > { %9983 = vmatpush3.bf16.msra.mxu0 %v9980_v26  ;;  %8735 = vmatprep.mubr.f32.mxu0 %v11151_v36  ;;  %v7189_v36 = vld [vmem:[%s13996_s1 + $0x2c0] sm:$0xff]  ;;  %v7190_v26 = vld [vmem:[%s13996_s1 + $0x2c8] sm:$0xff] }
 0x133   : > { %9985 = vmatprep.subr.bf16.mxu0 %v9984_v21 }
 0x135   : > { %8736 = vmatmul.mubr.f32.gmra.mrb[2].mxu0 %v11162_v40  ;;  %v9996_v40 = vpack.c.bf16 %v7190_v26, %v7189_v36  ;;  %v14122_v36 = vld [vmem:[#allocation13_spill] sm:$0xff]  ;;  %v14123_v26 = vld [vmem:[#allocation14_spill] sm:$0xff] }
 0x136   : > { %8738 = vmatprep.mubr.f32.mxu0 %v11165_v41  ;;  %9987 = vmatpush3.bf16.msra.mxu0 %v9984_v21  ;;  %v7191_v41 = vld [vmem:[%s13996_s1 + $0x2d0] sm:$0xff]  ;;  %v7194_v21 = vld [vmem:[%s13996_s1 + $0x2e8] sm:$0xff] }
 0x137   : > { %9989 = vmatprep.subr.bf16.mxu0 %v9988_v15 }
 0x139   : > { %8739 = vmatmul.mubr.f32.gmra.mrb[4].mxu0 %v11176_v45  ;;  %v10000_v45 = vpack.c.bf16 %v7192_v27, %v7191_v41  ;;  %v7235_v41 = vld [vmem:[%s13996_s1 + $0x330] sm:$0xff]  ;;  %v7236_v27 = vld [vmem:[%s13996_s1 + $0x338] sm:$0xff] }
 0x13a   : > { %8741 = vmatprep.mubr.f32.mxu0 %v11179_v46  ;;  %9991 = vmatpush3.bf16.msra.mxu0 %v9988_v15  ;;  %v7193_v46 = vld [vmem:[%s13996_s1 + $0x2e0] sm:$0xff]  ;;  %v14121_v15 = vld [vmem:[#allocation12_spill] sm:$0xff] }
 0x13b   : > { %9993 = vmatprep.subr.bf16.mxu0 %v9992_v35 }
 0x13d   : > { %8742 = vmatmul.mubr.f32.gmra.mrb[6].mxu0 %v11190_v50  ;;  %v10004_v50 = vpack.c.bf16 %v7194_v21, %v7193_v46  ;;  %v14125_v46 = vld [vmem:[#allocation16_spill] sm:$0xff]  ;;  %v10024_v21 = vpack.c.bf16 %v7236_v27, %v7235_v41  ;;  %v14136_v41 = vld [vmem:[#allocation27_spill] sm:$0xff] }
 0x13e   : > { %8744 = vmatprep.mubr.f32.mxu0 %v11193_v51  ;;  %9995 = vmatpush3.bf16.msra.mxu0 %v9992_v35  ;;  %v7195_v51 = vld [vmem:[%s13996_s1 + $0x2f0] sm:$0xff]  ;;  %v7234_v35 = vld [vmem:[%s13996_s1 + $0x328] sm:$0xff]  ;;  %v14137_v27 = vld [vmem:[#allocation28_spill] sm:$0xff] }
 0x13f   : > { %9997 = vmatprep.subr.bf16.mxu0 %v9996_v40 }
 0x141   : > { %8745 = vmatmul.mubr.f32.gmra.mrb[8].mxu0 %v11204_v55  ;;  %v10008_v55 = vpack.c.bf16 %v7196_v18, %v7195_v51  ;;  %v7238_v51 = vld [vmem:[%s13996_s1 + $0x348] sm:$0xff]  ;;  %v14126_v18 = vld [vmem:[#allocation17_spill] sm:$0xff] }
 0x142   : > { %8747 = vmatprep.mubr.f32.mxu0 %v11207_v56  ;;  %9999 = vmatpush3.bf16.msra.mxu0 %v9996_v40  ;;  %v7229_v56 = vld [vmem:[%s13996_s1 + $0x300] sm:$0xff]  ;;  %v10020_v40 = vpack.c.bf16 %v7234_v35, %v7233_v20  ;;  %v7278_v20 = vld [vmem:[%s13996_s1 + $0x388] sm:$0xff]  ;;  %v14132_v35 = vld [vmem:[#allocation23_spill] sm:$0xff] }
 0x143   : > { %10001 = vmatprep.subr.bf16.mxu0 %v10000_v45 }
 0x145   : > { %8748 = vmatmul.mubr.f32.gmra.mrb[10].mxu0 %v11218_v60  ;;  %v10012_v60 = vpack.c.bf16 %v7230_v14, %v7229_v56  ;;  %v7239_v14 = vld [vmem:[%s13996_s1 + $0x350] sm:$0xff] }
 0x146   : > { %8750 = vmatprep.mubr.f32.mxu0 %v11221_v61  ;;  %10003 = vmatpush3.bf16.msra.mxu0 %v10000_v45  ;;  %v14114_v61 = vld [vmem:[#allocation5_spill] sm:$0xff]  ;;  %v14124_v45 = vld [vmem:[#allocation15_spill] sm:$0xff] }
 0x147   : > { %10005 = vmatprep.subr.bf16.mxu0 %v10004_v50 }
 0x149   : > { %8751 = vmatmul.mubr.f32.gmra.mrb[12].mxu0 %v11232_v1  ;;  %v14115_v1 = vld [vmem:[#allocation6_spill] sm:$0xff] }
 0x14a   : > { %8753 = vmatprep.mubr.f32.mxu0 %v11235_v2  ;;  %10007 = vmatpush3.bf16.msra.mxu0 %v10004_v50  ;;  %v14116_v2 = vld [vmem:[#allocation7_spill] sm:$0xff]  ;;  %v7237_v50 = vld [vmem:[%s13996_s1 + $0x340] sm:$0xff] }
 0x14b   : > { %10009 = vmatprep.subr.bf16.mxu0 %v10008_v55  ;;  %v10028_v56 = vpack.c.bf16 %v7238_v51, %v7237_v50  ;;  %v14142_v50 = vld [vmem:[#allocation33_spill] sm:$0xff]  ;;  %v14143_v51 = vld [vmem:[#allocation34_spill] sm:$0xff] }
 0x14d   : > { %8754 = vmatmul.mubr.f32.gmra.mrb[14].mxu0 %v11240_v4  ;;  %v14117_v4 = vld [vmem:[#allocation8_spill] sm:$0xff] }
 0x14e   : > { %8756 = vmatprep.mubr.f32.mxu0 %v11243_v5  ;;  %10011 = vmatpush3.bf16.msra.mxu0 %v10008_v55  ;;  %v14118_v5 = vld [vmem:[#allocation9_spill] sm:$0xff]  ;;  %v14127_v55 = vld [vmem:[#allocation18_spill] sm:$0xff] }
 0x14f   : > { %10013 = vmatprep.subr.bf16.mxu0 %v10012_v60 }
 0x151   : > { %8757 = vmatmul.mubr.f32.gmra.mrb[16].mxu0 %v11248_v6  ;;  %v14119_v6 = vld [vmem:[#allocation10_spill] sm:$0xff] }
 0x152   : > { %8759 = vmatprep.mubr.f32.mxu0 %v11251_v7  ;;  %v11803_v7 = vld [vmem:[%s11097_s25 + $0x181] sm:$0xff] }
 0x155   : > { %8760 = vmatmul.mubr.f32.gmra.mrb[18].mxu0 %v11256_v8  ;;  %v14120_v8 = vld [vmem:[#allocation11_spill] sm:$0xff] }
 0x156   : > { %8762 = vmatprep.mubr.f32.mxu0 %v11259_v9  ;;  %v11808_v9 = vld [vmem:[%s11097_s25 + $0x189] sm:$0xff] }
 0x159   : > { %8763 = vmatmul.mubr.f32.gmra.mrb[20].mxu0 %v11264_v10  ;;  %v7231_v10 = vld [vmem:[%s13996_s1 + $0x310] sm:$0xff] }
 0x15a   : > { %8765 = vmatprep.mubr.f32.mxu0 %v11267_v11  ;;  %v7232_v11 = vld [vmem:[%s13996_s1 + $0x318] sm:$0xff] }
 0x15b   : > { %v10016_v31 = vpack.c.bf16 %v7232_v11, %v7231_v10  ;;  %v7243_v10 = vld [vmem:[%s13996_s1 + $0x370] sm:$0xff]  ;;  %v7244_v11 = vld [vmem:[%s13996_s1 + $0x378] sm:$0xff] }
 0x15d   : > { %8766 = vmatmul.mubr.f32.gmra.mrb[22].mxu0 %v14114_v61  ;;  %v14128_v61 = vld [vmem:[#allocation19_spill] sm:$0xff] }
 0x15e   : > { %8768 = vmatprep.mubr.f32.mxu0 %v14115_v1  ;;  %v14129_v1 = vld [vmem:[#allocation20_spill] sm:$0xff] }
 0x161   : > { %8769 = vmatmul.mubr.f32.gmra.mrb[24].mxu0 %v14116_v2 }
 0x162   : > { %8771 = vmatprep.mubr.f32.mxu0 %v14117_v4  ;;  %v7241_v4 = vld [vmem:[%s13996_s1 + $0x360] sm:$0xff] }
 0x165   : > { %8772 = vmatmul.mubr.f32.gmra.mrb[26].mxu0 %v14118_v5  ;;  %v7242_v5 = vld [vmem:[%s13996_s1 + $0x368] sm:$0xff] }
 0x166   : > { %8774 = vmatprep.mubr.f32.mxu0 %v14119_v6  ;;  %v14130_v6 = vld [vmem:[#allocation21_spill] sm:$0xff] }
 0x169   : > { %8775 = vmatmul.mubr.f32.gmra.mrb[28].mxu0 %v14120_v8  ;;  %v10036_v8 = vpack.c.bf16 %v7242_v5, %v7241_v4  ;;  %v7282_v4 = vld [vmem:[%s13996_s1 + $0x3a8] sm:$0xff] }
 0x16a   : > { %8777 = vmatprep.mubr.f32.mxu0 %v11803_v7 }
 0x16d   : > { %8778 = vmatmul.mubr.f32.gmra.mrb[30].mxu0 %v11808_v9 }
 0x16e   : > { %8812 = vmatprep.mubr.f32.mxu0 %v14121_v15  ;;  %v14131_v15 = vld [vmem:[#allocation22_spill] sm:$0xff] }
 0x171   : > { %8813 = vmatmul.mubr.f32.vlgmr.msra.gmra.mrb[0].mxu0 %v14122_v36 }
 0x172   : > { %10015 = vmatpush3.bf16.msra.mxu0 %v10012_v60  ;;  %8815 = vmatprep.mubr.f32.mxu0 %v14123_v26  ;;  %v7240_v60 = vld [vmem:[%s13996_s1 + $0x358] sm:$0xff] }
 0x173   : > { %10017 = vmatprep.subr.bf16.mxu0 %v10016_v31  ;;  %v10032_v2 = vpack.c.bf16 %v7240_v60, %v7239_v14  ;;  %v14133_v26 = vld [vmem:[#allocation24_spill] sm:$0xff]  ;;  %v11889_v14 = vld [vmem:[%s11097_s25 + $0x182] sm:$0xff]  ;;  %v11894_v60 = vld [vmem:[%s11097_s25 + $0x18a] sm:$0xff] }
 0x175   : > { %8816 = vmatmul.mubr.f32.gmra.mrb[2].mxu0 %v14124_v45  ;;  %v14139_v45 = vld [vmem:[#allocation30_spill] sm:$0xff] }
 0x176   : > { %8818 = vmatprep.mubr.f32.mxu0 %v14125_v46  ;;  %10019 = vmatpush3.bf16.msra.mxu0 %v10016_v31  ;;  %v7277_v31 = vld [vmem:[%s13996_s1 + $0x380] sm:$0xff]  ;;  %v14140_v46 = vld [vmem:[#allocation31_spill] sm:$0xff] }
 0x177   : > { %10021 = vmatprep.subr.bf16.mxu0 %v10020_v40  ;;  %v10044_v36 = vpack.c.bf16 %v7278_v20, %v7277_v31  ;;  %v7347_v31 = vld [vmem:[%s13998_s3 + $0xa8] sm:$0xff]  ;;  %v7248_v20 = vld [vmem:[%s11097_s25 + $0x51] sm:$0xff] }
 0x179   : > { %8819 = vmatmul.mubr.f32.gmra.mrb[4].mxu0 %v14126_v18  ;;  %v14144_v18 = vld [vmem:[#allocation35_spill] sm:$0xff] }
 0x17a   : > { %8821 = vmatprep.mubr.f32.mxu0 %v14127_v55  ;;  %10023 = vmatpush3.bf16.msra.mxu0 %v10020_v40  ;;  %v14135_v40 = vld [vmem:[#allocation26_spill] sm:$0xff]  ;;  %v14145_v55 = vld [vmem:[#allocation36_spill] sm:$0xff] }
 0x17b   : > { %10025 = vmatprep.subr.bf16.mxu0 %v10024_v21 }
 0x17d   : > { %8822 = vmatmul.mubr.f32.gmra.mrb[6].mxu0 %v14128_v61  ;;  %v7279_v61 = vld [vmem:[%s13996_s1 + $0x390] sm:$0xff] }
 0x17e   : > { %8824 = vmatprep.mubr.f32.mxu0 %v14129_v1  ;;  %10027 = vmatpush3.bf16.msra.mxu0 %v10024_v21  ;;  %v14141_v21 = vld [vmem:[#allocation32_spill] sm:$0xff] }
 0x17f   : > { %10029 = vmatprep.subr.bf16.mxu0 %v10028_v56  ;;  %v7280_v1 = vld [vmem:[%s13996_s1 + $0x398] sm:$0xff] }
 0x181   : > { %8825 = vmatmul.mubr.f32.gmra.mrb[8].mxu0 %v11544_v16  ;;  %v10040_v16 = vpack.c.bf16 %v7244_v11, %v7243_v10  ;;  %v7288_v10 = vld [vmem:[%s13996_s1 + $0x3d8] sm:$0xff]  ;;  %v7290_v11 = vld [vmem:[%s13996_s1 + $0x3e8] sm:$0xff] }
 0x182   : > { %8827 = vmatprep.mubr.f32.mxu0 %v14130_v6  ;;  %10031 = vmatpush3.bf16.msra.mxu0 %v10028_v56  ;;  %v14146_v56 = vld [vmem:[#allocation37_spill] sm:$0xff]  ;;  %v7284_v6 = vld [vmem:[%s13996_s1 + $0x3b8] sm:$0xff] }
 0x183   : > { %10033 = vmatprep.subr.bf16.mxu0 %v10032_v2 }
 0x185   : > { %8828 = vmatmul.mubr.f32.gmra.mrb[10].mxu0 %v14131_v15  ;;  %v7292_v15 = vld [vmem:[%s13996_s1 + $0x3f8] sm:$0xff] }
 0x186   : > { %8830 = vmatprep.mubr.f32.mxu0 %v11561_v12  ;;  %10035 = vmatpush3.bf16.msra.mxu0 %v10032_v2  ;;  %v14134_v12 = vld [vmem:[#allocation25_spill] sm:$0xff]  ;;  %v10048_v2 = vpack.c.bf16 %v7280_v1, %v7279_v61  ;;  %v7253_v61 = vld [vmem:[%s11097_s25 + $0x91] sm:$0xff] }
 0x187   : > { %10037 = vmatprep.subr.bf16.mxu0 %v10036_v8 }
 0x189   : > { %8831 = vmatmul.mubr.f32.gmra.mrb[12].mxu0 %v11572_v17  ;;  %v14138_v17 = vld [vmem:[#allocation29_spill] sm:$0xff] }
 0x18a   : > { %8833 = vmatprep.mubr.f32.mxu0 %v14132_v35  ;;  %10039 = vmatpush3.bf16.msra.mxu0 %v10036_v8  ;;  %v7286_v8 = vld [vmem:[%s13996_s1 + $0x3c8] sm:$0xff] }
 0x18b   : > { %10041 = vmatprep.subr.bf16.mxu0 %v10040_v16  ;;  %v7249_v35 = vld [vmem:[%s11097_s25 + $0x61] sm:$0xff] }
 0x18d   : > { %8834 = vmatmul.mubr.f32.gmra.mrb[14].mxu0 %v14133_v26  ;;  %v7331_v26 = vld [vmem:[%s13996_s1 + $0x430] sm:$0xff] }
 0x18e   : > { %8836 = vmatprep.mubr.f32.mxu0 %v14134_v12  ;;  %10043 = vmatpush3.bf16.msra.mxu0 %v10040_v16  ;;  %v7326_v16 = vld [vmem:[%s13996_s1 + $0x408] sm:$0xff] }
 0x18f   : > { %10045 = vmatprep.subr.bf16.mxu0 %v10044_v36 }
 0x191   : > { %8837 = vmatmul.mubr.f32.gmra.mrb[16].mxu0 %v14135_v40  ;;  %v7332_v40 = vld [vmem:[%s13996_s1 + $0x438] sm:$0xff] }
 0x192   : > { %8839 = vmatprep.mubr.f32.mxu0 %v14136_v41  ;;  %v7348_v41 = vld [vmem:[%s13998_s3 + $0xb0] sm:$0xff] }
 0x195   : > { %8840 = vmatmul.mubr.f32.gmra.mrb[18].mxu0 %v14137_v27  ;;  %v7349_v27 = vld [vmem:[%s13998_s3 + $0xb8] sm:$0xff] }
 0x196   : > { %8842 = vmatprep.mubr.f32.mxu0 %v14138_v17  ;;  %v7250_v17 = vld [vmem:[%s11097_s25 + $0x69] sm:$0xff] }
 0x199   : > { %8843 = vmatmul.mubr.f32.gmra.mrb[20].mxu0 %v14139_v45  ;;  %v7251_v45 = vld [vmem:[%s11097_s25 + $0x79] sm:$0xff] }
 0x19a   : > { %8845 = vmatprep.mubr.f32.mxu0 %v14140_v46  ;;  %v10088_v46 = vpack.c.bf16 %v7332_v40, %v7331_v26  ;;  %v7304_v26 = vld [vmem:[%s11097_s25 + $0xb2] sm:$0xff]  ;;  %v7306_v40 = vld [vmem:[%s11097_s25 + $0xca] sm:$0xff] }
 0x19d   : > { %8846 = vmatmul.mubr.f32.gmra.mrb[22].mxu0 %v14141_v21  ;;  %v7333_v21 = vld [vmem:[%s13996_s1 + $0x440] sm:$0xff] }
 0x19e   : > { %8848 = vmatprep.mubr.f32.mxu0 %v14142_v50  ;;  %v10120_v50 = vpack.c.bf16 %v7349_v27, %v7348_v41  ;;  %v7307_v41 = vld [vmem:[%s11097_s25 + $0xda] sm:$0xff]  ;;  %v7308_v27 = vld [vmem:[%s11097_s25 + $0xe2] sm:$0xff] }
 0x1a1   : > { %8849 = vmatmul.mubr.f32.gmra.mrb[24].mxu0 %v14143_v51  ;;  %v7334_v51 = vld [vmem:[%s13996_s1 + $0x448] sm:$0xff] }
 0x1a2   : > { %8851 = vmatprep.mubr.f32.mxu0 %v14144_v18  ;;  %v7350_v18 = vld [vmem:[%s13998_s3 + $0xc0] sm:$0xff]  ;;  %v10092_v1 = vpack.c.bf16 %v7334_v51, %v7333_v21  ;;  %v7312_v21 = vld [vmem:[%s11097_s25 + $0x112] sm:$0xff]  ;;  %v7314_v51 = vld [vmem:[%s11097_s25 + $0x12a] sm:$0xff] }
 0x1a5   : > { %8852 = vmatmul.mubr.f32.gmra.mrb[26].mxu0 %v14145_v55  ;;  %v7351_v55 = vld [vmem:[%s13998_s3 + $0xc8] sm:$0xff] }
 0x1a6   : > { %8854 = vmatprep.mubr.f32.mxu0 %v14146_v56  ;;  %v7252_v56 = vld [vmem:[%s11097_s25 + $0x81] sm:$0xff] }
 0x1a9   : > { %8855 = vmatmul.mubr.f32.gmra.mrb[28].mxu0 %v11636_v22  ;;  %v7281_v22 = vld [vmem:[%s13996_s1 + $0x3a0] sm:$0xff] }
 0x1aa   : > { %8857 = vmatprep.mubr.f32.mxu0 %v11889_v14  ;;  %v10052_v5 = vpack.c.bf16 %v7282_v4, %v7281_v22  ;;  %v10124_v22 = vpack.c.bf16 %v7351_v55, %v7350_v18  ;;  %v7336_v4 = vld [vmem:[%s13996_s1 + $0x458] sm:$0xff]  ;;  %v7316_v55 = vld [vmem:[%s11097_s25 + $0x142] sm:$0xff] }
 0x1ab   : > { %v7315_v18 = vld [vmem:[%s11097_s25 + $0x13a] sm:$0xff] }
 0x1ad   : > { %8858 = vmatmul.mubr.f32.gmra.mrb[30].mxu0 %v11894_v60 }
 0x1ae   : > { %8892 = vmatprep.mubr.f32.mxu0 %v11321_v28  ;;  %v7283_v28 = vld [vmem:[%s13996_s1 + $0x3b0] sm:$0xff] }
 0x1b1   : > { %8893 = vmatmul.mubr.f32.vlgmr.msra.gmra.mrb[0].mxu0 %v11332_v33  ;;  %v10056_v33 = vpack.c.bf16 %v7284_v6, %v7283_v28  ;;  %v7353_v28 = vld [vmem:[%s13998_s3 + $0xd8] sm:$0xff] }
 0x1b2   : > { %10047 = vmatpush3.bf16.msra.mxu0 %v10044_v36  ;;  %8895 = vmatprep.mubr.f32.mxu0 %v11335_v34  ;;  %v7285_v34 = vld [vmem:[%s13996_s1 + $0x3c0] sm:$0xff] }
 0x1b3   : > { %10049 = vmatprep.subr.bf16.mxu0 %v10048_v2  ;;  %v7254_v6 = vld [vmem:[%s11097_s25 + $0x99] sm:$0xff] }
 0x1b5   : > { %8896 = vmatmul.mubr.f32.gmra.mrb[2].mxu0 %v11346_v42  ;;  %v10060_v42 = vpack.c.bf16 %v7286_v8, %v7285_v34 }
 0x1b6   : > { %8898 = vmatprep.mubr.f32.mxu0 %v11349_v43  ;;  %10051 = vmatpush3.bf16.msra.mxu0 %v10048_v2  ;;  %v7287_v43 = vld [vmem:[%s13996_s1 + $0x3d0] sm:$0xff] }
 0x1b7   : > { %10053 = vmatprep.subr.bf16.mxu0 %v10052_v5  ;;  %v7335_v2 = vld [vmem:[%s13996_s1 + $0x450] sm:$0xff] }
 0x1b8   : > { %v10096_v34 = vpack.c.bf16 %v7336_v4, %v7335_v2  ;;  %v7320_v2 = vld [vmem:[%s11097_s25 + $0x172] sm:$0xff]  ;;  %v7324_v4 = vld [vmem:[%s11097_s25 + $0x1a2] sm:$0xff] }
 0x1b9   : > { %8899 = vmatmul.mubr.f32.gmra.mrb[4].mxu0 %v11360_v49  ;;  %v10064_v49 = vpack.c.bf16 %v7288_v10, %v7287_v43  ;;  %v7338_v43 = vld [vmem:[%s13996_s1 + $0x468] sm:$0xff]  ;;  %v7256_v10 = vld [vmem:[%s11097_s25 + $0xb1] sm:$0xff] }
 0x1ba   : > { %8901 = vmatprep.mubr.f32.mxu0 %v11363_v52  ;;  %10055 = vmatpush3.bf16.msra.mxu0 %v10052_v5  ;;  %v7289_v52 = vld [vmem:[%s13996_s1 + $0x3e0] sm:$0xff]  ;;  %v7352_v5 = vld [vmem:[%s13998_s3 + $0xd0] sm:$0xff] }
 0x1bb   : > { %10057 = vmatprep.subr.bf16.mxu0 %v10056_v33  ;;  %v10128_v8 = vpack.c.bf16 %v7353_v28, %v7352_v5  ;;  %v7354_v5 = vld [vmem:[%s13998_s3 + $0xe0] sm:$0xff]  ;;  %v7355_v28 = vld [vmem:[%s13998_s3 + $0xe8] sm:$0xff] }
 0x1bd   : > { %8902 = vmatmul.mubr.f32.gmra.mrb[6].mxu0 %v11374_v58  ;;  %v10068_v58 = vpack.c.bf16 %v7290_v11, %v7289_v52  ;;  %v7339_v11 = vld [vmem:[%s13996_s1 + $0x470] sm:$0xff] }
 0x1be   : > { %8904 = vmatprep.mubr.f32.mxu0 %v11377_v59  ;;  %10059 = vmatpush3.bf16.msra.mxu0 %v10056_v33  ;;  %v7291_v59 = vld [vmem:[%s13996_s1 + $0x3f0] sm:$0xff] }
 0x1bf   : > { %10061 = vmatprep.subr.bf16.mxu0 %v10060_v42  ;;  %v7255_v33 = vld [vmem:[%s11097_s25 + $0xa9] sm:$0xff] }
 0x1c1   : > { %8905 = vmatmul.mubr.f32.gmra.mrb[8].mxu0 %v11388_v3  ;;  %v10072_v3 = vpack.c.bf16 %v7292_v15, %v7291_v59  ;;  %v7258_v59 = vld [vmem:[%s11097_s25 + $0xc9] sm:$0xff]  ;;  %v7259_v15 = vld [vmem:[%s11097_s25 + $0xd9] sm:$0xff] }
 0x1c2   : > { %8907 = vmatprep.mubr.f32.mxu0 %v11391_v19  ;;  %10063 = vmatpush3.bf16.msra.mxu0 %v10060_v42  ;;  %v7325_v19 = vld [vmem:[%s13996_s1 + $0x400] sm:$0xff] }
 0x1c3   : > { %10065 = vmatprep.subr.bf16.mxu0 %v10064_v49  ;;  %v7337_v42 = vld [vmem:[%s13996_s1 + $0x460] sm:$0xff] }
 0x1c4   : > { %v10100_v52 = vpack.c.bf16 %v7338_v43, %v7337_v42  ;;  %v3248_v43 = vld [vmem:[%s13998_s3 + $0x10] sm:$0xff] }
 0x1c5   : > { %8908 = vmatmul.mubr.f32.gmra.mrb[10].mxu0 %v11402_v24  ;;  %v11960_v24 = vpack.c.bf16 %v7326_v16, %v7325_v19  ;;  %v7260_v19 = vld [vmem:[%s11097_s25 + $0xe1] sm:$0xff]  ;;  %v7261_v16 = vld [vmem:[%s11097_s25 + $0xf1] sm:$0xff] }
 0x1c6   : > { %8910 = vmatprep.mubr.f32.mxu0 %v11405_v25  ;;  %10067 = vmatpush3.bf16.msra.mxu0 %v10064_v49  ;;  %v7227_v25 = vld [vmem:[%s11097_s25 + $0x198] sm:$0xff]  ;;  %v7257_v49 = vld [vmem:[%s11097_s25 + $0xc1] sm:$0xff] }
 0x1c7   : > { %10069 = vmatprep.subr.bf16.mxu0 %v10068_v58 }
 0x1c9   : > { %8911 = vmatmul.mubr.f32.gmra.mrb[12].mxu0 %v11410_v29  ;;  %v7228_v29 = vld [vmem:[%s11097_s25 + $0x1a0] sm:$0xff] }
 0x1ca   : > { %8913 = vmatprep.mubr.f32.mxu0 %v11413_v30  ;;  %10071 = vmatpush3.bf16.msra.mxu0 %v10068_v58  ;;  %v7245_v30 = vld [vmem:[%s11097_s25 + $0x31] sm:$0xff] }
 0x1cb   : > { %10073 = vmatprep.subr.bf16.mxu0 %v10072_v3  ;;  %v7340_v58 = vld [vmem:[%s13996_s1 + $0x478] sm:$0xff] }
 0x1cd   : > { %8914 = vmatmul.mubr.f32.gmra.mrb[14].mxu0 %v11418_v32  ;;  %v11984_v32 = vld [vmem:[%s13996_s1 + $0x410] sm:$0xff] }
 0x1ce   : > { %8916 = vmatprep.mubr.f32.mxu0 %v11421_v37  ;;  %10075 = vmatpush3.bf16.msra.mxu0 %v10072_v3  ;;  %v11989_v37 = vld [vmem:[%s13996_s1 + $0x418] sm:$0xff]  ;;  %v10104_v3 = vpack.c.bf16 %v7340_v58, %v7339_v11  ;;  %v3252_v58 = vld [vmem:[%s13998_s3 + $0x30] sm:$0xff] }
 0x1cf   : > { %10077 = vmatprep.subr.bf16.mxu0 %v11960_v24 }
 0x1d1   : > { %8917 = vmatmul.mubr.f32.gmra.mrb[16].mxu0 %v11426_v38  ;;  %v7342_v38 = vld [vmem:[%s13998_s3 + $0x80] sm:$0xff] }
 0x1d2   : > { %8919 = vmatprep.mubr.f32.mxu0 %v11429_v39  ;;  %v7343_v39 = vld [vmem:[%s13998_s3 + $0x88] sm:$0xff] }
 0x1d5   : > { %8920 = vmatmul.mubr.f32.gmra.mrb[18].mxu0 %v11434_v44  ;;  %v12000_v44 = vld [vmem:[%s13998_s3 + $0x90] sm:$0xff] }
 0x1d6   : > { %8922 = vmatprep.mubr.f32.mxu0 %v11437_v47  ;;  %v12003_v47 = vld [vmem:[%s11097_s25 + $0x39] sm:$0xff] }
 0x1d9   : > { %8923 = vmatmul.mubr.f32.gmra.mrb[20].mxu0 %v11442_v48  ;;  %v12005_v48 = vpack.c.bf16 %v7343_v39, %v7342_v38  ;;  %v7268_v38 = vld [vmem:[%s11097_s25 + $0x141] sm:$0xff]  ;;  %v7269_v39 = vld [vmem:[%s11097_s25 + $0x151] sm:$0xff] }
 0x1da   : > { %8925 = vmatprep.mubr.f32.mxu0 %v11445_v53  ;;  %v12010_v53 = vld [vmem:[%s13998_s3 + $0x98] sm:$0xff] }
 0x1db   : > { %10109 = vmatprep.subr.bf16.mxu1 %v12005_v48 }
 0x1dc   : > { %10111 = vmatpush3.bf16.msra.mxu1 %v12005_v48  ;;  %v7272_v48 = vld [vmem:[%s11097_s25 + $0x171] sm:$0xff] }
 0x1dd   : > { %8926 = vmatmul.mubr.f32.gmra.mrb[22].mxu0 %v11450_v54  ;;  %v11003_v54 = vmov 0.0  }
 0x1de   : > { %8928 = vmatprep.mubr.f32.mxu0 %v11453_v57  ;;  %306 = vst [vmem:[#allocation2] sm:$0xff] %v11003_v54  ;;  %307 = vst [vmem:[#allocation2 + $0x8] sm:$0xff] %v11003_v54  ;;  %9132 = vmatprep.mubr.f32.mxu1 %v11003_v54  ;;  %v7247_v57 = vld [vmem:[%s11097_s25 + $0x49] sm:$0xff] }
 0x1df   : > { %308 = vst [vmem:[#allocation2 + $0x10] sm:$0xff] %v11003_v54  ;;  %309 = vst [vmem:[#allocation2 + $0x18] sm:$0x3] %v11003_v54 }
 0x1e0   : > { %310 = vst [vmem:[#allocation2 + $0x20] sm:$0xff] %v11003_v54  ;;  %313 = vst [vmem:[#allocation2 + $0x38] sm:$0x3] %v11003_v54 }
 0x1e1   : > { %8929 = vmatmul.mubr.f32.gmra.mrb[24].mxu0 %v11458_v62  ;;  %314 = vst [vmem:[#allocation2 + $0x40] sm:$0xff] %v11003_v54  ;;  %317 = vst [vmem:[#allocation2 + $0x58] sm:$0x3] %v11003_v54  ;;  %v10080_v62 = vpack.c.bf16 %v11989_v37, %v11984_v32  ;;  %v7266_v32 = vld [vmem:[%s11097_s25 + $0x129] sm:$0xff]  ;;  %v7267_v37 = vld [vmem:[%s11097_s25 + $0x139] sm:$0xff] }
 0x1e2   : > { %8931 = vmatprep.mubr.f32.mxu0 %v11461_v63  ;;  %318 = vst [vmem:[#allocation2 + $0x60] sm:$0xff] %v11003_v54  ;;  %321 = vst [vmem:[#allocation2 + $0x78] sm:$0x3] %v11003_v54  ;;  %v7329_v63 = vld [vmem:[%s13996_s1 + $0x420] sm:$0xff] }
 0x1e3   : > { %322 = vst [vmem:[#allocation2 + $0x80] sm:$0xff] %v11003_v54  ;;  %325 = vst [vmem:[#allocation2 + $0x98] sm:$0x3] %v11003_v54 }
 0x1e4   : > { %326 = vst [vmem:[#allocation2 + $0xa0] sm:$0xff] %v11003_v54  ;;  %329 = vst [vmem:[#allocation2 + $0xb8] sm:$0x3] %v11003_v54 }
 0x1e5   : > { %8932 = vmatmul.mubr.f32.gmra.mrb[26].mxu0 %v11466_v0  ;;  %330 = vst [vmem:[#allocation2 + $0xc0] sm:$0xff] %v11003_v54  ;;  %333 = vst [vmem:[#allocation2 + $0xd8] sm:$0x3] %v11003_v54  ;;  %v10112_v0 = vpack.c.bf16 %v12010_v53, %v12000_v44  ;;  %v7270_v44 = vld [vmem:[%s11097_s25 + $0x159] sm:$0xff] }
 0x1e6   : > { %8934 = vmatprep.mubr.f32.mxu0 %v11717_v23  ;;  %334 = vst [vmem:[#allocation2 + $0xe0] sm:$0xff] %v11003_v54  ;;  %337 = vst [vmem:[#allocation2 + $0xf8] sm:$0x3] %v11003_v54  ;;  %v7330_v23 = vld [vmem:[%s13996_s1 + $0x428] sm:$0xff]  ;;  %v7275_v53 = vld [vmem:[%s11097_s25 + $0x199] sm:$0xff] }
 0x1e7   : > { %338 = vst [vmem:[#allocation2 + $0x100] sm:$0xff] %v11003_v54  ;;  %341 = vst [vmem:[#allocation2 + $0x118] sm:$0x3] %v11003_v54  ;;  %v10084_v36 = vpack.c.bf16 %v7330_v23, %v7329_v63  ;;  %10113 = vmatprep.subr.bf16.mxu1 %v10112_v0  ;;  %v7294_v63 = vld [vmem:[%s11097_s25 + $0x3a] sm:$0xff]  ;;  %v7296_v23 = vld [vmem:[%s11097_s25 + $0x52] sm:$0xff] }
 0x1e8   : > { %342 = vst [vmem:[#allocation2 + $0x120] sm:$0xff] %v11003_v54  ;;  %345 = vst [vmem:[#allocation2 + $0x138] sm:$0x3] %v11003_v54  ;;  %10115 = vmatpush3.bf16.msra.mxu1 %v10112_v0  ;;  %v7295_v0 = vld [vmem:[%s11097_s25 + $0x4a] sm:$0xff] }
 0x1e9   : > { %8935 = vmatmul.mubr.f32.gmra.mrb[28].mxu0 %v11722_v13  ;;  %346 = vst [vmem:[#allocation2 + $0x140] sm:$0xff] %v11003_v54  ;;  %349 = vst [vmem:[#allocation2 + $0x158] sm:$0x3] %v11003_v54  ;;  %v7346_v13 = vld [vmem:[%s13998_s3 + $0xa0] sm:$0xff] }
 0x1ea   : > { %8937 = vmatprep.mubr.f32.mxu0 %v7227_v25  ;;  %350 = vst [vmem:[#allocation2 + $0x160] sm:$0xff] %v11003_v54  ;;  %353 = vst [vmem:[#allocation2 + $0x178] sm:$0x3] %v11003_v54  ;;  %v10116_v12 = vpack.c.bf16 %v7347_v31, %v7346_v13  ;;  %v7263_v25 = vld [vmem:[%s11097_s25 + $0x109] sm:$0xff]  ;;  %v7299_v13 = vld [vmem:[%s11097_s25 + $0x7a] sm:$0xff] }
 0x1eb   : > { %354 = vst [vmem:[#allocation2 + $0x180] sm:$0xff] %v11003_v54  ;;  %357 = vst [vmem:[#allocation2 + $0x198] sm:$0x3] %v11003_v54  ;;  %v7300_v31 = vld [vmem:[%s11097_s25 + $0x82] sm:$0xff] }
 0x1ec   : > { %358 = vst [vmem:[#allocation2 + $0x1a0] sm:$0xff] %v11003_v54  ;;  %361 = vst [vmem:[#allocation2 + $0x1b8] sm:$0x3] %v11003_v54  ;;  %10117 = vmatprep.subr.bf16.mxu1 %v10116_v12 }
 0x1ed   : > { %8938 = vmatmul.mubr.f32.gmra.mrb[30].mxu0 %v7228_v29  ;;  %362 = vst [vmem:[#allocation2 + $0x1c0] sm:$0xff] %v11003_v54  ;;  %365 = vst [vmem:[#allocation2 + $0x1d8] sm:$0x3] %v11003_v54  ;;  %10119 = vmatpush3.bf16.msra.mxu1 %v10116_v12  ;;  %v7264_v29 = vld [vmem:[%s11097_s25 + $0x111] sm:$0xff]  ;;  %v7305_v12 = vld [vmem:[%s11097_s25 + $0xc2] sm:$0xff] }
 0x1ee   : > { %8972 = vmatprep.mubr.f32.mxu0 %v7245_v30  ;;  %366 = vst [vmem:[#allocation2 + $0x1e0] sm:$0xff] %v11003_v54  ;;  %369 = vst [vmem:[#allocation2 + $0x1f8] sm:$0x3] %v11003_v54  ;;  %10121 = vmatprep.subr.bf16.mxu1 %v10120_v50  ;;  %v7265_v30 = vld [vmem:[%s11097_s25 + $0x121] sm:$0xff] }
 0x1ef   : > { %370 = vst [vmem:[#allocation2 + $0x200] sm:$0xff] %v11003_v54  ;;  %373 = vst [vmem:[#allocation2 + $0x218] sm:$0x3] %v11003_v54 }
 0x1f0   : > { %374 = vst [vmem:[#allocation2 + $0x220] sm:$0xff] %v11003_v54  ;;  %375 = vst [vmem:[#allocation2 + $0x228] sm:$0xff] %v11003_v54 }
 0x1f1   : > { %376 = vst [vmem:[#allocation2 + $0x230] sm:$0xff] %v11003_v54  ;;  %377 = vst [vmem:[#allocation2 + $0x238] sm:$0x3] %v11003_v54  ;;  %8973 = vmatmul.mubr.f32.vlgmr.msra.gmra.mrb[0].mxu0 %v12003_v47  ;;  %10123 = vmatpush3.bf16.msra.mxu1 %v10120_v50  ;;  %v7271_v47 = vld [vmem:[%s11097_s25 + $0x169] sm:$0xff] }
 0x1f2   : > { %378 = vst [vmem:[#allocation3] sm:$0xff] %v11003_v54  ;;  %379 = vst [vmem:[#allocation3 + $0x8] sm:$0xff] %v11003_v54  ;;  %10079 = vmatpush3.bf16.msra.mxu0 %v11960_v24  ;;  %8975 = vmatprep.mubr.f32.mxu0 %v7247_v57  ;;  %v7262_v24 = vld [vmem:[%s11097_s25 + $0xf9] sm:$0xff]  ;;  %v7276_v57 = vld [vmem:[%s11097_s25 + $0x1a1] sm:$0xff] }
 0x1f3   : > { %380 = vst [vmem:[#allocation3 + $0x10] sm:$0xff] %v11003_v54  ;;  %381 = vst [vmem:[#allocation3 + $0x18] sm:$0x3] %v11003_v54  ;;  %10081 = vmatprep.subr.bf16.mxu0 %v10080_v62  ;;  %10125 = vmatprep.subr.bf16.mxu1 %v10124_v22  ;;  %v7313_v50 = vld [vmem:[%s11097_s25 + $0x122] sm:$0xff] }
 0x1f4   : > { %382 = vst [vmem:[#allocation3 + $0x20] sm:$0xff] %v11003_v54  ;;  %385 = vst [vmem:[#allocation3 + $0x38] sm:$0x3] %v11003_v54 }
 0x1f5   : > { %386 = vst [vmem:[#allocation3 + $0x40] sm:$0xff] %v11003_v54  ;;  %389 = vst [vmem:[#allocation3 + $0x58] sm:$0x3] %v11003_v54  ;;  %8976 = vmatmul.mubr.f32.gmra.mrb[2].mxu0 %v7248_v20  ;;  %10127 = vmatpush3.bf16.msra.mxu1 %v10124_v22  ;;  %v7301_v20 = vld [vmem:[%s11097_s25 + $0x92] sm:$0xff]  ;;  %v7323_v22 = vld [vmem:[%s11097_s25 + $0x19a] sm:$0xff] }
 0x1f6   : > { %390 = vst [vmem:[#allocation3 + $0x60] sm:$0xff] %v11003_v54  ;;  %393 = vst [vmem:[#allocation3 + $0x78] sm:$0x3] %v11003_v54  ;;  %8978 = vmatprep.mubr.f32.mxu0 %v7249_v35  ;;  %10083 = vmatpush3.bf16.msra.mxu0 %v10080_v62  ;;  %v7293_v62 = vld [vmem:[%s11097_s25 + $0x32] sm:$0xff]  ;;  %v7302_v35 = vld [vmem:[%s11097_s25 + $0x9a] sm:$0xff] }
 0x1f7   : > { %394 = vst [vmem:[#allocation3 + $0x80] sm:$0xff] %v11003_v54  ;;  %397 = vst [vmem:[#allocation3 + $0x98] sm:$0x3] %v11003_v54  ;;  %10085 = vmatprep.subr.bf16.mxu0 %v10084_v36  ;;  %10129 = vmatprep.subr.bf16.mxu1 %v10128_v8 }
 0x1f8   : > { %398 = vst [vmem:[#allocation3 + $0xa0] sm:$0xff] %v11003_v54  ;;  %401 = vst [vmem:[#allocation3 + $0xb8] sm:$0x3] %v11003_v54 }
 0x1f9   : > { %402 = vst [vmem:[#allocation3 + $0xc0] sm:$0xff] %v11003_v54  ;;  %405 = vst [vmem:[#allocation3 + $0xd8] sm:$0x3] %v11003_v54  ;;  %8979 = vmatmul.mubr.f32.gmra.mrb[4].mxu0 %v7250_v17  ;;  %10131 = vmatpush3.bf16.msra.mxu1 %v10128_v8  ;;  %v7309_v17 = vld [vmem:[%s11097_s25 + $0xf2] sm:$0xff]  ;;  %v3247_v8 = vld [vmem:[%s13998_s3 + $0x8] sm:$0xff] }
 0x1fa   : > { %406 = vst [vmem:[#allocation3 + $0xe0] sm:$0xff] %v11003_v54  ;;  %409 = vst [vmem:[#allocation3 + $0xf8] sm:$0x3] %v11003_v54  ;;  %8981 = vmatprep.mubr.f32.mxu0 %v7251_v45  ;;  %10087 = vmatpush3.bf16.msra.mxu0 %v10084_v36  ;;  %v7303_v36 = vld [vmem:[%s11097_s25 + $0xaa] sm:$0xff]  ;;  %v7310_v45 = vld [vmem:[%s11097_s25 + $0xfa] sm:$0xff] }
 0x1fb   : > { %410 = vst [vmem:[#allocation3 + $0x100] sm:$0xff] %v11003_v54  ;;  %413 = vst [vmem:[#allocation3 + $0x118] sm:$0x3] %v11003_v54  ;;  %10089 = vmatprep.subr.bf16.mxu0 %v10088_v46 }
 0x1fc   : > { %414 = vst [vmem:[#allocation3 + $0x120] sm:$0xff] %v11003_v54  ;;  %417 = vst [vmem:[#allocation3 + $0x138] sm:$0x3] %v11003_v54 }
 0x1fd   : > { %418 = vst [vmem:[#allocation3 + $0x140] sm:$0xff] %v11003_v54  ;;  %421 = vst [vmem:[#allocation3 + $0x158] sm:$0x3] %v11003_v54  ;;  %8982 = vmatmul.mubr.f32.gmra.mrb[6].mxu0 %v7252_v56  ;;  %v7317_v56 = vld [vmem:[%s11097_s25 + $0x152] sm:$0xff] }
 0x1fe   : > { %422 = vst [vmem:[#allocation3 + $0x160] sm:$0xff] %v11003_v54  ;;  %425 = vst [vmem:[#allocation3 + $0x178] sm:$0x3] %v11003_v54  ;;  %8984 = vmatprep.mubr.f32.mxu0 %v7253_v61  ;;  %10091 = vmatpush3.bf16.msra.mxu0 %v10088_v46  ;;  %v7311_v46 = vld [vmem:[%s11097_s25 + $0x10a] sm:$0xff]  ;;  %v7318_v61 = vld [vmem:[%s11097_s25 + $0x15a] sm:$0xff] }
 0x1ff   : > { %426 = vst [vmem:[#allocation3 + $0x180] sm:$0xff] %v11003_v54  ;;  %429 = vst [vmem:[#allocation3 + $0x198] sm:$0x3] %v11003_v54  ;;  %10093 = vmatprep.subr.bf16.mxu0 %v10092_v1 }
 0x200   : > { %430 = vst [vmem:[#allocation3 + $0x1a0] sm:$0xff] %v11003_v54  ;;  %433 = vst [vmem:[#allocation3 + $0x1b8] sm:$0x3] %v11003_v54 }
 0x201   : > { %434 = vst [vmem:[#allocation3 + $0x1c0] sm:$0xff] %v11003_v54  ;;  %437 = vst [vmem:[#allocation3 + $0x1d8] sm:$0x3] %v11003_v54  ;;  %8985 = vmatmul.mubr.f32.gmra.mrb[8].mxu0 %v7254_v6  ;;  %v10132_v6 = vpack.c.bf16 %v7355_v28, %v7354_v5 }
 0x202   : > { %438 = vst [vmem:[#allocation3 + $0x1e0] sm:$0xff] %v11003_v54  ;;  %441 = vst [vmem:[#allocation3 + $0x1f8] sm:$0x3] %v11003_v54  ;;  %8987 = vmatprep.mubr.f32.mxu0 %v7255_v33  ;;  %10095 = vmatpush3.bf16.msra.mxu0 %v10092_v1  ;;  %v7319_v1 = vld [vmem:[%s11097_s25 + $0x16a] sm:$0xff] }
 0x203   : > { %442 = vst [vmem:[#allocation3 + $0x200] sm:$0xff] %v11003_v54  ;;  %445 = vst [vmem:[#allocation3 + $0x218] sm:$0x3] %v11003_v54  ;;  %10097 = vmatprep.subr.bf16.mxu0 %v10096_v34  ;;  %10133 = vmatprep.subr.bf16.mxu1 %v10132_v6 }
 0x204   : > { %446 = vst [vmem:[#allocation3 + $0x220] sm:$0xff] %v11003_v54  ;;  %447 = vst [vmem:[#allocation3 + $0x228] sm:$0xff] %v11003_v54  ;;  %10135 = vmatpush3.bf16.msra.mxu1 %v10132_v6 }
 0x205   : > { %448 = vst [vmem:[#allocation3 + $0x230] sm:$0xff] %v11003_v54  ;;  %449 = vst [vmem:[#allocation3 + $0x238] sm:$0x3] %v11003_v54  ;;  %8988 = vmatmul.mubr.f32.gmra.mrb[10].mxu0 %v7256_v10  ;;  %v3249_v10 = vld [vmem:[%s13998_s3 + $0x18] sm:$0xff] }
 0x206   : > { %8990 = vmatprep.mubr.f32.mxu0 %v7257_v49  ;;  %10099 = vmatpush3.bf16.msra.mxu0 %v10096_v34  ;;  %v3246_v34 = vld [vmem:[%s13998_s3] sm:$0xff] }
 0x207   : > { %10101 = vmatprep.subr.bf16.mxu0 %v10100_v52  ;;  %v10140_v42 = vpack.c.bf16 %v3247_v8, %v3246_v34  ;;  %v3250_v49 = vld [vmem:[%s13998_s3 + $0x20] sm:$0xff] }
 0x209   : > { %8991 = vmatmul.mubr.f32.gmra.mrb[12].mxu0 %v7258_v59  ;;  %v3253_v59 = vld [vmem:[%s13998_s3 + $0x38] sm:$0xff] }
 0x20a   : > { %8993 = vmatprep.mubr.f32.mxu0 %v7259_v15  ;;  %10103 = vmatpush3.bf16.msra.mxu0 %v10100_v52  ;;  %v3251_v52 = vld [vmem:[%s13998_s3 + $0x28] sm:$0xff]  ;;  %v10152_v15 = vpack.c.bf16 %v3253_v59, %v3252_v58 }
 0x20b   : > { %10105 = vmatprep.subr.bf16.mxu0 %v10104_v3  ;;  %v10148_v11 = vpack.c.bf16 %v3251_v52, %v3250_v49 }
 0x20d   : > { %8994 = vmatmul.mubr.f32.gmra.mrb[14].mxu0 %v7260_v19  ;;  %v3255_v19 = vld [vmem:[%s13998_s3 + $0x48] sm:$0xff] }
 0x20e   : > { %8996 = vmatprep.mubr.f32.mxu0 %v7261_v16  ;;  %10107 = vmatpush3.bf16.msra.mxu0 %v10104_v3  ;;  %v3254_v3 = vld [vmem:[%s13998_s3 + $0x40] sm:$0xff] }
 0x20f   : > { %v10156_v16 = vpack.c.bf16 %v3255_v19, %v3254_v3 }
 0x211   : > { %8997 = vmatmul.mubr.f32.gmra.mrb[16].mxu0 %v7262_v24  ;;  %v3256_v24 = vld [vmem:[%s13998_s3 + $0x50] sm:$0xff] }
 0x212   : > { %8999 = vmatprep.mubr.f32.mxu0 %v7263_v25  ;;  %v3257_v25 = vld [vmem:[%s13998_s3 + $0x58] sm:$0xff] }
 0x215   : > { %9000 = vmatmul.mubr.f32.gmra.mrb[18].mxu0 %v7264_v29  ;;  %v10160_v29 = vpack.c.bf16 %v3257_v25, %v3256_v24 }
 0x216   : > { %9002 = vmatprep.mubr.f32.mxu0 %v7265_v30  ;;  %v3258_v30 = vld [vmem:[%s13998_s3 + $0x60] sm:$0xff] }
 0x219   : > { %9003 = vmatmul.mubr.f32.gmra.mrb[20].mxu0 %v7266_v32  ;;  %v3259_v32 = vld [vmem:[%s13998_s3 + $0x68] sm:$0xff] }
 0x21a   : > { %9005 = vmatprep.mubr.f32.mxu0 %v7267_v37  ;;  %v10164_v37 = vpack.c.bf16 %v3259_v32, %v3258_v30 }
 0x21d   : > { %9006 = vmatmul.mubr.f32.gmra.mrb[22].mxu0 %v7268_v38  ;;  %v3260_v38 = vld [vmem:[%s13998_s3 + $0x70] sm:$0xff] }
 0x21e   : > { %9008 = vmatprep.mubr.f32.mxu0 %v7269_v39  ;;  %v3261_v39 = vld [vmem:[%s13998_s3 + $0x78] sm:$0xff] }
 0x221   : > { %9009 = vmatmul.mubr.f32.gmra.mrb[24].mxu0 %v7270_v44  ;;  %v10168_v44 = vpack.c.bf16 %v3261_v39, %v3260_v38 }
 0x222   : > { %9011 = vmatprep.mubr.f32.mxu0 %v7271_v47  ;;  %v7358_v47 = vld [vmem:[%s13998_s3 + $0x100] sm:$0xff] }
 0x225   : > { %9012 = vmatmul.mubr.f32.gmra.mrb[26].mxu0 %v7272_v48  ;;  %v7359_v48 = vld [vmem:[%s13998_s3 + $0x108] sm:$0xff] }
 0x226   : > { %9014 = vmatprep.mubr.f32.mxu0 %v11803_v7  ;;  %v7297_v7 = vld [vmem:[%s11097_s25 + $0x62] sm:$0xff] }
 0x229   : > { %9015 = vmatmul.mubr.f32.gmra.mrb[28].mxu0 %v11808_v9  ;;  %v7298_v9 = vld [vmem:[%s11097_s25 + $0x6a] sm:$0xff]  ;;  %s300_s25 = scalar_lea.vmem %s14002_s7, %s7020_s22 }
 0x22a   : > { %9017 = vmatprep.mubr.f32.mxu0 %v7275_v53  ;;  %v12290_v53 = vpack.c.bf16 %v7359_v48, %v7358_v47  ;;  %v3214_v47 = vld [vmem:[#allocation2 + $0x7] sm:$0xff] }
 0x22d   : > { %9018 = vmatmul.mubr.f32.gmra.mrb[30].mxu0 %v7276_v57  ;;  %v12296_v57 = vld [vmem:[%s13997_s2] ss:$0 sm:$0xff] }
 0x22e   : > { %9052 = vmatprep.mubr.f32.mxu0 %v7293_v62 }
 0x231   : > { %9053 = vmatmul.mubr.f32.vlgmr.msra.gmra.mrb[0].mxu0 %v7294_v63 }
 0x232   : > { %9055 = vmatprep.mubr.f32.mxu0 %v7295_v0 }
 0x235   : > { %9056 = vmatmul.mubr.f32.gmra.mrb[2].mxu0 %v7296_v23 }
 0x236   : > { %9058 = vmatprep.mubr.f32.mxu0 %v7297_v7 }
 0x239   : > { %9059 = vmatmul.mubr.f32.gmra.mrb[4].mxu0 %v7298_v9 }
 0x23a   : > { %9061 = vmatprep.mubr.f32.mxu0 %v7299_v13 }
 0x23d   : > { %9062 = vmatmul.mubr.f32.gmra.mrb[6].mxu0 %v7300_v31 }
 0x23e   : > { %9064 = vmatprep.mubr.f32.mxu0 %v7301_v20 }
 0x241   : > { %9065 = vmatmul.mubr.f32.gmra.mrb[8].mxu0 %v7302_v35 }
 0x242   : > { %9067 = vmatprep.mubr.f32.mxu0 %v7303_v36 }
 0x245   : > { %9068 = vmatmul.mubr.f32.gmra.mrb[10].mxu0 %v7304_v26 }
 0x246   : > { %9070 = vmatprep.mubr.f32.mxu0 %v7305_v12 }
 0x249   : > { %9071 = vmatmul.mubr.f32.gmra.mrb[12].mxu0 %v7306_v40 }
 0x24a   : > { %9073 = vmatprep.mubr.f32.mxu0 %v7307_v41 }
 0x24d   : > { %9074 = vmatmul.mubr.f32.gmra.mrb[14].mxu0 %v7308_v27 }
 0x24e   : > { %9076 = vmatprep.mubr.f32.mxu0 %v7309_v17 }
 0x251   : > { %9077 = vmatmul.mubr.f32.gmra.mrb[16].mxu0 %v7310_v45 }
 0x252   : > { %9079 = vmatprep.mubr.f32.mxu0 %v7311_v46 }
 0x255   : > { %9080 = vmatmul.mubr.f32.gmra.mrb[18].mxu0 %v7312_v21 }
 0x256   : > { %9082 = vmatprep.mubr.f32.mxu0 %v7313_v50 }
 0x259   : > { %9083 = vmatmul.mubr.f32.gmra.mrb[20].mxu0 %v7314_v51 }
 0x25a   : > { %9085 = vmatprep.mubr.f32.mxu0 %v7315_v18 }
 0x25d   : > { %9086 = vmatmul.mubr.f32.gmra.mrb[22].mxu0 %v7316_v55 }
 0x25e   : > { %9088 = vmatprep.mubr.f32.mxu0 %v7317_v56 }
 0x261   : > { %9089 = vmatmul.mubr.f32.gmra.mrb[24].mxu0 %v7318_v61 }
 0x262   : > { %9091 = vmatprep.mubr.f32.mxu0 %v7319_v1 }
 0x265   : > { %9092 = vmatmul.mubr.f32.gmra.mrb[26].mxu0 %v7320_v2 }
 0x266   : > { %9094 = vmatprep.mubr.f32.mxu0 %v11889_v14  ;;  %v7356_v14 = vld [vmem:[%s13998_s3 + $0xf0] sm:$0xff] }
 0x269   : > { %9095 = vmatmul.mubr.f32.gmra.mrb[28].mxu0 %v11894_v60  ;;  %v7357_v60 = vld [vmem:[%s13998_s3 + $0xf8] sm:$0xff] }
 0x26a   : > { %9097 = vmatprep.mubr.f32.mxu0 %v7323_v22  ;;  %v10136_v33 = vpack.c.bf16 %v7357_v60, %v7356_v14 }
 0x26c   : > { %10137 = vmatprep.subr.bf16.mxu1 %v10136_v33 }
 0x26d   : > { %9098 = vmatmul.mubr.f32.gmra.mrb[30].mxu0 %v7324_v4  ;;  %10139 = vmatpush3.bf16.msra.mxu1 %v10136_v33 }
 0x26e   : > { %10141 = vmatprep.subr.bf16.mxu1 %v10140_v42 }
 0x270   : > { %9133 = vmatmul.mubr.f32.vlgmr.msra.gmra.mrb[0].mxu1 %v11003_v54  ;;  %v10144_v54 = vpack.c.bf16 %v3249_v10, %v3248_v43 }
 0x271   : > { %10143 = vmatpush3.bf16.msra.mxu1 %v10140_v42 }
 0x272   : > { %10145 = vmatprep.subr.bf16.mxu1 %v10144_v54 }
 0x275   : > { %10147 = vmatpush3.bf16.msra.mxu1 %v10144_v54 }
 0x276   : > { %10149 = vmatprep.subr.bf16.mxu1 %v10148_v11 }
 0x279   : > { %10151 = vmatpush3.bf16.msra.mxu1 %v10148_v11 }
 0x27a   : > { %10153 = vmatprep.subr.bf16.mxu1 %v10152_v15 }
 0x27d   : > { %10155 = vmatpush3.bf16.msra.mxu1 %v10152_v15 }
 0x27e   : > { %10157 = vmatprep.subr.bf16.mxu1 %v10156_v16 }
 0x281   : > { %10159 = vmatpush3.bf16.msra.mxu1 %v10156_v16 }
 0x282   : > { %10161 = vmatprep.subr.bf16.mxu1 %v10160_v29 }
 0x285   : > { %10163 = vmatpush3.bf16.msra.mxu1 %v10160_v29 }
 0x286   : > { %10165 = vmatprep.subr.bf16.mxu1 %v10164_v37 }
 0x289   : > { %10167 = vmatpush3.bf16.msra.mxu1 %v10164_v37 }
 0x28a   : > { %10169 = vmatprep.subr.bf16.mxu1 %v10168_v44 }
 0x28d   : > { %10171 = vmatpush3.bf16.msra.mxu1 %v10168_v44 }
 0x28e   : > { %10173 = vmatprep.subr.bf16.mxu1 %v12290_v53 }
 0x304   : > { %v9054_v62 = vpop.f32.mrb[0].mxu0 }
 0x305   : > { %v3149_v63 = vadd.f32 %v9054_v62, %v12296_v57  ;;  %v2951_v0 = vpop.f32.mrb[1].mxu0  ;;  %v7360_v62 = vld [vmem:[%s13998_s3 + $0x110] sm:$0xff] }
 0x306   : > { %v3148_v23 = vadd.f32 %v12296_v57, %v2951_v0 }
 0x307   : > { %3182 = vst [vmem:[#allocation2 + $0x30] sm:$0xff] %v3149_v63 }
 0x308   : > { %3181 = vst [vmem:[#allocation2 + $0x28] sm:$0xff] %v3148_v23  ;;  %v9057_v7 = vpop.f32.mrb[2].mxu0  ;;  %9135 = vmatprep.mubr.f32.mxu1 %v3148_v23 }
 0x309   : > { %v3151_v9 = vadd.f32 %v9057_v7, %v12296_v57  ;;  %v2961_v13 = vpop.f32.mrb[3].mxu0  ;;  %9136 = vmatmul.mubr.f32.gmra.mrb[2].mxu1 %v3149_v63  ;;  %v7361_v63 = vld [vmem:[%s13998_s3 + $0x118] sm:$0xff] }
 0x30a   : > { %v3150_v31 = vadd.f32 %v12296_v57, %v2961_v13  ;;  %v10176_v13 = vpack.c.bf16 %v7361_v63, %v7360_v62 }
 0x30b   : > { %3184 = vst [vmem:[#allocation2 + $0x50] sm:$0xff] %v3151_v9 }
 0x30c   : > { %3183 = vst [vmem:[#allocation2 + $0x48] sm:$0xff] %v3150_v31  ;;  %v9060_v20 = vpop.f32.mrb[4].mxu0  ;;  %9138 = vmatprep.mubr.f32.mxu1 %v3150_v31  ;;  %v7362_v31 = vld [vmem:[%s13998_s3 + $0x120] sm:$0xff] }
 0x30d   : > { %v3153_v35 = vadd.f32 %v9060_v20, %v12296_v57  ;;  %v2971_v36 = vpop.f32.mrb[5].mxu0  ;;  %9139 = vmatmul.mubr.f32.gmra.mrb[4].mxu1 %v3151_v9  ;;  %v3215_v9 = vld [vmem:[#allocation2 + $0xf] sm:$0xff] }
 0x30e   : > { %v12304_v26 = vadd.f32 %v12296_v57, %v2971_v36  ;;  %v7363_v20 = vld [vmem:[%s13998_s3 + $0x128] sm:$0xff] }
 0x30f   : > { %3186 = vst [vmem:[#allocation2 + $0x70] sm:$0xff] %v3153_v35  ;;  %v12452_v36 = vld [vmem:[#allocation2 + $0x2f] sm:$0xff] }
 0x310   : > { %3185 = vst [vmem:[#allocation2 + $0x68] sm:$0xff] %v12304_v26  ;;  %v9063_v12 = vpop.f32.mrb[6].mxu0  ;;  %9141 = vmatprep.mubr.f32.mxu1 %v12304_v26 }
 0x311   : > { %v12309_v40 = vadd.f32 %v9063_v12, %v12296_v57  ;;  %v2981_v41 = vpop.f32.mrb[7].mxu0  ;;  %9142 = vmatmul.mubr.f32.gmra.mrb[6].mxu1 %v3153_v35  ;;  %v12448_v35 = vld [vmem:[#allocation2 + $0x27] sm:$0xff]  ;;  %v7364_v12 = vld [vmem:[%s13998_s3 + $0x130] sm:$0xff] }
 0x312   : > { %v12312_v27 = vadd.f32 %v12296_v57, %v2981_v41  ;;  %v7365_v41 = vld [vmem:[%s13998_s3 + $0x138] sm:$0xff] }
 0x313   : > { %3188 = vst [vmem:[#allocation2 + $0x90] sm:$0xff] %v12309_v40 }
 0x314   : > { %3187 = vst [vmem:[#allocation2 + $0x88] sm:$0xff] %v12312_v27  ;;  %v9066_v17 = vpop.f32.mrb[8].mxu0  ;;  %9144 = vmatprep.mubr.f32.mxu1 %v12312_v27 }
 0x315   : > { %v12318_v45 = vadd.f32 %v9066_v17, %v12296_v57  ;;  %v2991_v46 = vpop.f32.mrb[9].mxu0  ;;  %9145 = vmatmul.mubr.f32.gmra.mrb[8].mxu1 %v12309_v40  ;;  %v12461_v17 = vld [vmem:[#allocation2 + $0x47] sm:$0xff] }
 0x316   : > { %v12322_v21 = vadd.f32 %v12296_v57, %v2991_v46  ;;  %v12464_v46 = vld [vmem:[#allocation2 + $0x4f] sm:$0xff] }
 0x317   : > { %3190 = vst [vmem:[#allocation2 + $0xb0] sm:$0xff] %v12318_v45 }
 0x318   : > { %3189 = vst [vmem:[#allocation2 + $0xa8] sm:$0xff] %v12322_v21  ;;  %v9069_v50 = vpop.f32.mrb[10].mxu0  ;;  %9147 = vmatprep.mubr.f32.mxu1 %v12322_v21 }
 0x319   : > { %v12328_v51 = vadd.f32 %v9069_v50, %v12296_v57  ;;  %v3001_v18 = vpop.f32.mrb[11].mxu0  ;;  %9148 = vmatmul.mubr.f32.gmra.mrb[10].mxu1 %v12318_v45  ;;  %v7366_v50 = vld [vmem:[%s13998_s3 + $0x140] sm:$0xff] }
 0x31a   : > { %v12332_v55 = vadd.f32 %v12296_v57, %v3001_v18  ;;  %v7367_v18 = vld [vmem:[%s13998_s3 + $0x148] sm:$0xff] }
 0x31b   : > { %3192 = vst [vmem:[#allocation2 + $0xd0] sm:$0xff] %v12328_v51 }
 0x31c   : > { %3191 = vst [vmem:[#allocation2 + $0xc8] sm:$0xff] %v12332_v55  ;;  %v9072_v56 = vpop.f32.mrb[12].mxu0  ;;  %9150 = vmatprep.mubr.f32.mxu1 %v12332_v55 }
 0x31d   : > { %v12338_v61 = vadd.f32 %v9072_v56, %v12296_v57  ;;  %v3011_v1 = vpop.f32.mrb[13].mxu0  ;;  %9151 = vmatmul.mubr.f32.gmra.mrb[12].mxu1 %v12328_v51  ;;  %v12473_v56 = vld [vmem:[#allocation2 + $0x67] sm:$0xff] }
 0x31e   : > { %v12342_v2 = vadd.f32 %v12296_v57, %v3011_v1  ;;  %v10188_v1 = vpack.c.bf16 %v7367_v18, %v7366_v50 }
 0x31f   : > { %3194 = vst [vmem:[#allocation2 + $0xf0] sm:$0xff] %v12338_v61 }
 0x320   : > { %3193 = vst [vmem:[#allocation2 + $0xe8] sm:$0xff] %v12342_v2  ;;  %v9075_v22 = vpop.f32.mrb[14].mxu0  ;;  %9153 = vmatprep.mubr.f32.mxu1 %v12342_v2 }
 0x321   : > { %v12348_v4 = vadd.f32 %v9075_v22, %v12296_v57  ;;  %v3021_v5 = vpop.f32.mrb[15].mxu0  ;;  %9154 = vmatmul.mubr.f32.gmra.mrb[14].mxu1 %v12338_v61  ;;  %v12476_v22 = vld [vmem:[#allocation2 + $0x6f] sm:$0xff] }
 0x322   : > { %v12352_v28 = vadd.f32 %v12296_v57, %v3021_v5  ;;  %v7368_v5 = vld [vmem:[%s13998_s3 + $0x150] sm:$0xff] }
 0x323   : > { %3196 = vst [vmem:[#allocation2 + $0x110] sm:$0xff] %v12348_v4 }
 0x324   : > { %3195 = vst [vmem:[#allocation2 + $0x108] sm:$0xff] %v12352_v28  ;;  %v9078_v6 = vpop.f32.mrb[16].mxu0  ;;  %9156 = vmatprep.mubr.f32.mxu1 %v12352_v28 }
 0x325   : > { %v12358_v14 = vadd.f32 %v9078_v6, %v12296_v57  ;;  %v3031_v60 = vpop.f32.mrb[17].mxu0  ;;  %9157 = vmatmul.mubr.f32.gmra.mrb[16].mxu1 %v12348_v4  ;;  %v7369_v6 = vld [vmem:[%s13998_s3 + $0x158] sm:$0xff] }
 0x326   : > { %v12362_v33 = vadd.f32 %v12296_v57, %v3031_v60  ;;  %v12485_v60 = vld [vmem:[#allocation2 + $0x87] sm:$0xff] }
 0x327   : > { %3198 = vst [vmem:[#allocation2 + $0x130] sm:$0xff] %v12358_v14  ;;  %v12521_v62 = vld [vmem:[#allocation2 + $0xe7] sm:$0xff] }
 0x328   : > { %3197 = vst [vmem:[#allocation2 + $0x128] sm:$0xff] %v12362_v33  ;;  %v9081_v34 = vpop.f32.mrb[18].mxu0  ;;  %9159 = vmatprep.mubr.f32.mxu1 %v12362_v33 }
 0x329   : > { %v12368_v8 = vadd.f32 %v9081_v34, %v12296_v57  ;;  %v3041_v42 = vpop.f32.mrb[19].mxu0  ;;  %9160 = vmatmul.mubr.f32.gmra.mrb[18].mxu1 %v12358_v14  ;;  %v10192_v34 = vpack.c.bf16 %v7369_v6, %v7368_v5 }
 0x32a   : > { %v12372_v43 = vadd.f32 %v12296_v57, %v3041_v42  ;;  %v12488_v42 = vld [vmem:[#allocation2 + $0x8f] sm:$0xff] }
 0x32b   : > { %3200 = vst [vmem:[#allocation2 + $0x150] sm:$0xff] %v12368_v8 }
 0x32c   : > { %3199 = vst [vmem:[#allocation2 + $0x148] sm:$0xff] %v12372_v43  ;;  %v9084_v10 = vpop.f32.mrb[20].mxu0  ;;  %9162 = vmatprep.mubr.f32.mxu1 %v12372_v43 }
 0x32d   : > { %v12378_v54 = vadd.f32 %v9084_v10, %v12296_v57  ;;  %v3051_v49 = vpop.f32.mrb[21].mxu0  ;;  %9163 = vmatmul.mubr.f32.gmra.mrb[20].mxu1 %v12368_v8  ;;  %v7370_v10 = vld [vmem:[%s13998_s3 + $0x160] sm:$0xff] }
 0x32e   : > { %v12382_v52 = vadd.f32 %v12296_v57, %v3051_v49  ;;  %v7371_v49 = vld [vmem:[%s13998_s3 + $0x168] sm:$0xff] }
 0x32f   : > { %3202 = vst [vmem:[#allocation2 + $0x170] sm:$0xff] %v12378_v54 }
 0x330   : > { %3201 = vst [vmem:[#allocation2 + $0x168] sm:$0xff] %v12382_v52  ;;  %v9087_v11 = vpop.f32.mrb[22].mxu0  ;;  %9165 = vmatprep.mubr.f32.mxu1 %v12382_v52 }
 0x331   : > { %v12388_v58 = vadd.f32 %v9087_v11, %v12296_v57  ;;  %v3061_v59 = vpop.f32.mrb[23].mxu0  ;;  %9166 = vmatmul.mubr.f32.gmra.mrb[22].mxu1 %v12378_v54  ;;  %v12497_v11 = vld [vmem:[#allocation2 + $0xa7] sm:$0xff] }
 0x332   : > { %v12392_v15 = vadd.f32 %v12296_v57, %v3061_v59  ;;  %v10196_v59 = vpack.c.bf16 %v7371_v49, %v7370_v10  ;;  %v3761_v49 = vld [vmem:[#allocation2 + $0x9] sm:$0xff] }
 0x333   : > { %3204 = vst [vmem:[#allocation2 + $0x190] sm:$0xff] %v12388_v58 }
 0x334   : > { %3203 = vst [vmem:[#allocation2 + $0x188] sm:$0xff] %v12392_v15  ;;  %v9090_v3 = vpop.f32.mrb[24].mxu0  ;;  %9168 = vmatprep.mubr.f32.mxu1 %v12392_v15 }
 0x335   : > { %v12398_v19 = vadd.f32 %v9090_v3, %v12296_v57  ;;  %v3071_v16 = vpop.f32.mrb[25].mxu0  ;;  %9169 = vmatmul.mubr.f32.gmra.mrb[24].mxu1 %v12388_v58  ;;  %v12500_v3 = vld [vmem:[#allocation2 + $0xaf] sm:$0xff] }
 0x336   : > { %v12402_v24 = vadd.f32 %v12296_v57, %v3071_v16  ;;  %v7372_v16 = vld [vmem:[%s13998_s3 + $0x170] sm:$0xff] }
 0x337   : > { %3206 = vst [vmem:[#allocation2 + $0x1b0] sm:$0xff] %v12398_v19 }
 0x338   : > { %3205 = vst [vmem:[#allocation2 + $0x1a8] sm:$0xff] %v12402_v24  ;;  %v9093_v25 = vpop.f32.mrb[26].mxu0  ;;  %9171 = vmatprep.mubr.f32.mxu1 %v12402_v24 }
 0x339   : > { %v12408_v29 = vadd.f32 %v9093_v25, %v12296_v57  ;;  %v3081_v30 = vpop.f32.mrb[27].mxu0  ;;  %9172 = vmatmul.mubr.f32.gmra.mrb[26].mxu1 %v12398_v19  ;;  %v7373_v25 = vld [vmem:[%s13998_s3 + $0x178] sm:$0xff] }
 0x33a   : > { %v12412_v32 = vadd.f32 %v12296_v57, %v3081_v30  ;;  %v12509_v30 = vld [vmem:[#allocation2 + $0xc7] sm:$0xff] }
 0x33b   : > { %3208 = vst [vmem:[#allocation2 + $0x1d0] sm:$0xff] %v12408_v29  ;;  %v12551_v50 = vld [vmem:[#allocation2 + $0x187] sm:$0xff]  ;;  %v12554_v18 = vld [vmem:[#allocation2 + $0x18f] sm:$0xff] }
 0x33c   : > { %3207 = vst [vmem:[#allocation2 + $0x1c8] sm:$0xff] %v12412_v32  ;;  %v9096_v37 = vpop.f32.mrb[28].mxu0  ;;  %9174 = vmatprep.mubr.f32.mxu1 %v12412_v32 }
 0x33d   : > { %v12418_v38 = vadd.f32 %v9096_v37, %v12296_v57  ;;  %v3091_v39 = vpop.f32.mrb[29].mxu0  ;;  %9175 = vmatmul.mubr.f32.gmra.mrb[28].mxu1 %v12408_v29  ;;  %v10200_v37 = vpack.c.bf16 %v7373_v25, %v7372_v16  ;;  %v7376_v16 = vld [vmem:[%s13998_s3 + $0x190] sm:$0xff]  ;;  %v7377_v25 = vld [vmem:[%s13998_s3 + $0x198] sm:$0xff] }
 0x33e   : > { %v12422_v44 = vadd.f32 %v12296_v57, %v3091_v39  ;;  %v12512_v39 = vld [vmem:[#allocation2 + $0xcf] sm:$0xff] }
 0x33f   : > { %14147 = vst [vmem:[#allocation5_spill] sm:$0xff] %v12418_v38  ;;  %3210 = vst [vmem:[#allocation2 + $0x1f0] sm:$0xff] %v12418_v38  ;;  %v12560_v5 = vld [vmem:[#allocation2 + $0x1af] sm:$0xff] }
 0x340   : > { %14148 = vst [vmem:[#allocation6_spill] sm:$0xff] %v12422_v44  ;;  %3209 = vst [vmem:[#allocation2 + $0x1e8] sm:$0xff] %v12422_v44  ;;  %v9099_v48 = vpop.f32.mrb[30].mxu0  ;;  %9177 = vmatprep.mubr.f32.mxu1 %v12422_v44  ;;  %v12590_v44 = vld [vmem:[#allocation2 + $0x31] sm:$0xff] }
 0x341   : > { %v12434_v0 = vadd.f32 %v9099_v48, %v12296_v57  ;;  %v3101_v23 = vpop.f32.mrb[31].mxu0  ;;  %9178 = vmatmul.mubr.f32.gmra.mrb[30].mxu1 %v12418_v38  ;;  %v7375_v48 = vld [vmem:[%s13998_s3 + $0x188] sm:$0xff]  ;;  %14153 = vst [vmem:[#allocation11_spill] sm:$0xff] %v12590_v44 }
 0x342   : > { %v12438_v7 = vadd.f32 %v12296_v57, %v3101_v23  ;;  %9212 = vmatprep.mubr.f32.mxu1 %v3214_v47  ;;  %v10180_v57 = vpack.c.bf16 %v7363_v20, %v7362_v31  ;;  %v7374_v47 = vld [vmem:[%s13998_s3 + $0x180] sm:$0xff]  ;;  %v12524_v23 = vld [vmem:[#allocation2 + $0xef] sm:$0xff] }
 0x343   : > { %14149 = vst [vmem:[#allocation7_spill] sm:$0xff] %v12434_v0  ;;  %3212 = vst [vmem:[#allocation2 + $0x210] sm:$0xff] %v12434_v0  ;;  %v10204_v63 = vpack.c.bf16 %v7375_v48, %v7374_v47  ;;  %v12533_v31 = vld [vmem:[#allocation2 + $0x127] sm:$0xff]  ;;  %v12536_v20 = vld [vmem:[#allocation2 + $0x12f] sm:$0xff]  ;;  %v10208_v47 = vpack.c.bf16 %v7377_v25, %v7376_v16 }
 0x344   : > { %14150 = vst [vmem:[#allocation8_spill] sm:$0xff] %v12438_v7  ;;  %3211 = vst [vmem:[#allocation2 + $0x208] sm:$0xff] %v12438_v7  ;;  %v12563_v6 = vld [vmem:[#allocation2 + $0x1c7] sm:$0xff]  ;;  %v7381_v16 = vld [vmem:[%s13998_s3 + $0x1b8] sm:$0xff] }
 0x345   : > { %9213 = vmatmul.mubr.f32.vlgmr.msra.gmra.mrb[0].mxu1 %v3215_v9  ;;  %v12527_v9 = vld [vmem:[#allocation2 + $0x107] sm:$0xff] }
 0x346   : > { %9215 = vmatprep.mubr.f32.mxu1 %v12448_v35  ;;  %10175 = vmatpush3.bf16.msra.mxu1 %v12290_v53  ;;  %v10184_v53 = vpack.c.bf16 %v7365_v41, %v7364_v12  ;;  %v12542_v12 = vld [vmem:[#allocation2 + $0x14f] sm:$0xff]  ;;  %v12545_v41 = vld [vmem:[#allocation2 + $0x167] sm:$0xff] }
 0x347   : > { %10177 = vmatprep.subr.bf16.mxu1 %v10176_v13  ;;  %v12569_v10 = vld [vmem:[#allocation2 + $0x1e7] sm:$0xff] }
 0x348   : > { %14151 = vst [vmem:[#allocation9_spill] sm:$0xff] %v12569_v10  ;;  %v7378_v48 = vld [vmem:[%s13998_s3 + $0x1a0] sm:$0xff]  ;;  %v7379_v0 = vld [vmem:[%s13998_s3 + $0x1a8] sm:$0xff] }
 0x349   : > { %9216 = vmatmul.mubr.f32.gmra.mrb[2].mxu1 %v12452_v36  ;;  %v12587_v7 = vld [vmem:[#allocation2 + $0x29] sm:$0xff]  ;;  %v10212_v38 = vpack.c.bf16 %v7379_v0, %v7378_v48  ;;  %v12602_v0 = vld [vmem:[#allocation2 + $0x51] sm:$0xff] }
 0x34a   : > { %9218 = vmatprep.mubr.f32.mxu1 %v12461_v17  ;;  %10179 = vmatpush3.bf16.msra.mxu1 %v10176_v13  ;;  %v12530_v13 = vld [vmem:[#allocation2 + $0x10f] sm:$0xff]  ;;  %14155 = vst [vmem:[#allocation13_spill] sm:$0xff] %v12602_v0 }
 0x34b   : > { %10181 = vmatprep.subr.bf16.mxu1 %v10180_v57  ;;  %v12599_v25 = vld [vmem:[#allocation2 + $0x49] sm:$0xff] }
 0x34c   : > { %14154 = vst [vmem:[#allocation12_spill] sm:$0xff] %v12599_v25  ;;  %v7383_v48 = vld [vmem:[%s13998_s3 + $0x1c8] sm:$0xff] }
 0x34d   : > { %9219 = vmatmul.mubr.f32.gmra.mrb[4].mxu1 %v12464_v46 }
 0x34e   : > { %9221 = vmatprep.mubr.f32.mxu1 %v12473_v56  ;;  %10183 = vmatpush3.bf16.msra.mxu1 %v10180_v57  ;;  %v12539_v57 = vld [vmem:[#allocation2 + $0x147] sm:$0xff] }
 0x34f   : > { %10185 = vmatprep.subr.bf16.mxu1 %v10184_v53 }
 0x351   : > { %9222 = vmatmul.mubr.f32.gmra.mrb[6].mxu1 %v12476_v22 }
 0x352   : > { %9224 = vmatprep.mubr.f32.mxu1 %v12485_v60  ;;  %10187 = vmatpush3.bf16.msra.mxu1 %v10184_v53  ;;  %v12548_v53 = vld [vmem:[#allocation2 + $0x16f] sm:$0xff] }
 0x353   : > { %10189 = vmatprep.subr.bf16.mxu1 %v10188_v1 }
 0x355   : > { %9225 = vmatmul.mubr.f32.gmra.mrb[8].mxu1 %v12488_v42 }
 0x356   : > { %9227 = vmatprep.mubr.f32.mxu1 %v12497_v11  ;;  %10191 = vmatpush3.bf16.msra.mxu1 %v10188_v1  ;;  %v12557_v1 = vld [vmem:[#allocation2 + $0x1a7] sm:$0xff] }
 0x357   : > { %10193 = vmatprep.subr.bf16.mxu1 %v10192_v34 }
 0x359   : > { %9228 = vmatmul.mubr.f32.gmra.mrb[10].mxu1 %v12500_v3 }
 0x35a   : > { %9230 = vmatprep.mubr.f32.mxu1 %v12509_v30  ;;  %10195 = vmatpush3.bf16.msra.mxu1 %v10192_v34  ;;  %v12566_v34 = vld [vmem:[#allocation2 + $0x1cf] sm:$0xff] }
 0x35b   : > { %10197 = vmatprep.subr.bf16.mxu1 %v10196_v59 }
 0x35d   : > { %9231 = vmatmul.mubr.f32.gmra.mrb[12].mxu1 %v12512_v39 }
 0x35e   : > { %9233 = vmatprep.mubr.f32.mxu1 %v12521_v62  ;;  %10199 = vmatpush3.bf16.msra.mxu1 %v10196_v59  ;;  %v12572_v59 = vld [vmem:[#allocation2 + $0x1ef] sm:$0xff] }
 0x35f   : > { %10201 = vmatprep.subr.bf16.mxu1 %v10200_v37  ;;  %14152 = vst [vmem:[#allocation10_spill] sm:$0xff] %v12572_v59 }
 0x361   : > { %9234 = vmatmul.mubr.f32.gmra.mrb[14].mxu1 %v12524_v23 }
 0x362   : > { %9236 = vmatprep.mubr.f32.mxu1 %v12527_v9  ;;  %10203 = vmatpush3.bf16.msra.mxu1 %v10200_v37  ;;  %v3762_v37 = vld [vmem:[#allocation2 + $0x11] sm:$0xff] }
 0x363   : > { %10205 = vmatprep.subr.bf16.mxu1 %v10204_v63 }
 0x365   : > { %9237 = vmatmul.mubr.f32.gmra.mrb[16].mxu1 %v12530_v13 }
 0x366   : > { %9239 = vmatprep.mubr.f32.mxu1 %v12533_v31 }
 0x369   : > { %9240 = vmatmul.mubr.f32.gmra.mrb[18].mxu1 %v12536_v20 }
 0x36a   : > { %9242 = vmatprep.mubr.f32.mxu1 %v12539_v57 }
 0x36d   : > { %9243 = vmatmul.mubr.f32.gmra.mrb[20].mxu1 %v12542_v12 }
 0x36e   : > { %9245 = vmatprep.mubr.f32.mxu1 %v12545_v41 }
 0x371   : > { %9246 = vmatmul.mubr.f32.gmra.mrb[22].mxu1 %v12548_v53 }
 0x372   : > { %9248 = vmatprep.mubr.f32.mxu1 %v12551_v50 }
 0x375   : > { %9249 = vmatmul.mubr.f32.gmra.mrb[24].mxu1 %v12554_v18 }
 0x376   : > { %9251 = vmatprep.mubr.f32.mxu1 %v12557_v1 }
 0x379   : > { %9252 = vmatmul.mubr.f32.gmra.mrb[26].mxu1 %v12560_v5 }
 0x37a   : > { %9254 = vmatprep.mubr.f32.mxu1 %v12563_v6 }
 0x37d   : > { %9255 = vmatmul.mubr.f32.gmra.mrb[28].mxu1 %v12566_v34 }
 0x37e   : > { %9257 = vmatprep.mubr.f32.mxu1 %v12569_v10 }
 0x381   : > { %9258 = vmatmul.mubr.f32.gmra.mrb[30].mxu1 %v12572_v59 }
 0x382   : > { %9292 = vmatprep.mubr.f32.mxu1 %v3761_v49  ;;  %v7380_v49 = vld [vmem:[%s13998_s3 + $0x1b0] sm:$0xff] }
 0x385   : > { %9293 = vmatmul.mubr.f32.vlgmr.msra.gmra.mrb[0].mxu1 %v3762_v37  ;;  %v7382_v37 = vld [vmem:[%s13998_s3 + $0x1c0] sm:$0xff] }
 0x386   : > { %9295 = vmatprep.mubr.f32.mxu1 %v12587_v7  ;;  %10207 = vmatpush3.bf16.msra.mxu1 %v10204_v63  ;;  %v10216_v63 = vpack.c.bf16 %v7381_v16, %v7380_v49  ;;  %v12614_v49 = vld [vmem:[#allocation2 + $0x71] sm:$0xff] }
 0x387   : > { %10209 = vmatprep.subr.bf16.mxu1 %v10208_v47  ;;  %14157 = vst [vmem:[#allocation15_spill] sm:$0xff] %v12614_v49  ;;  %v7384_v16 = vld [vmem:[%s13998_s3 + $0x1d0] sm:$0xff] }
 0x389   : > { %9296 = vmatmul.mubr.f32.gmra.mrb[2].mxu1 %v12590_v44  ;;  %v12611_v44 = vld [vmem:[#allocation2 + $0x69] sm:$0xff] }
 0x38a   : > { %9298 = vmatprep.mubr.f32.mxu1 %v12599_v25  ;;  %10211 = vmatpush3.bf16.msra.mxu1 %v10208_v47  ;;  %14156 = vst [vmem:[#allocation14_spill] sm:$0xff] %v12611_v44  ;;  %v10220_v47 = vpack.c.bf16 %v7383_v48, %v7382_v37  ;;  %v7385_v25 = vld [vmem:[%s13998_s3 + $0x1d8] sm:$0xff]  ;;  %v7386_v48 = vld [vmem:[%s13998_s3 + $0x1e0] sm:$0xff] }
 0x38b   : > { %10213 = vmatprep.subr.bf16.mxu1 %v10212_v38  ;;  %v12626_v37 = vld [vmem:[#allocation2 + $0x91] sm:$0xff] }
 0x38c   : > { %14159 = vst [vmem:[#allocation17_spill] sm:$0xff] %v12626_v37 }
 0x38d   : > { %9299 = vmatmul.mubr.f32.gmra.mrb[4].mxu1 %v12602_v0  ;;  %v12623_v0 = vld [vmem:[#allocation2 + $0x89] sm:$0xff] }
 0x38e   : > { %9301 = vmatprep.mubr.f32.mxu1 %v12611_v44  ;;  %10215 = vmatpush3.bf16.msra.mxu1 %v10212_v38  ;;  %14158 = vst [vmem:[#allocation16_spill] sm:$0xff] %v12623_v0  ;;  %v10224_v38 = vpack.c.bf16 %v7385_v25, %v7384_v16  ;;  %v7387_v44 = vld [vmem:[%s13998_s3 + $0x1e8] sm:$0xff]  ;;  %v12638_v25 = vld [vmem:[#allocation2 + $0xb1] sm:$0xff] }
 0x38f   : > { %10217 = vmatprep.subr.bf16.mxu1 %v10216_v63  ;;  %14161 = vst [vmem:[#allocation19_spill] sm:$0xff] %v12638_v25  ;;  %v7388_v16 = vld [vmem:[%s13998_s3 + $0x1f0] sm:$0xff] }
 0x391   : > { %9302 = vmatmul.mubr.f32.gmra.mrb[6].mxu1 %v12614_v49  ;;  %v12635_v49 = vld [vmem:[#allocation2 + $0xa9] sm:$0xff] }
 0x392   : > { %9304 = vmatprep.mubr.f32.mxu1 %v12623_v0  ;;  %10219 = vmatpush3.bf16.msra.mxu1 %v10216_v63  ;;  %14160 = vst [vmem:[#allocation18_spill] sm:$0xff] %v12635_v49  ;;  %v10228_v63 = vpack.c.bf16 %v7387_v44, %v7386_v48  ;;  %v7389_v0 = vld [vmem:[%s13998_s3 + $0x1f8] sm:$0xff]  ;;  %v7390_v48 = vld [vmem:[%s13998_s3 + $0x200] sm:$0xff] }
 0x393   : > { %10221 = vmatprep.subr.bf16.mxu1 %v10220_v47  ;;  %v12650_v44 = vld [vmem:[#allocation2 + $0xd1] sm:$0xff] }
 0x394   : > { %14163 = vst [vmem:[#allocation21_spill] sm:$0xff] %v12650_v44 }
 0x395   : > { %9305 = vmatmul.mubr.f32.gmra.mrb[8].mxu1 %v12626_v37  ;;  %v12647_v37 = vld [vmem:[#allocation2 + $0xc9] sm:$0xff] }
 0x396   : > { %9307 = vmatprep.mubr.f32.mxu1 %v12635_v49  ;;  %10223 = vmatpush3.bf16.msra.mxu1 %v10220_v47  ;;  %14162 = vst [vmem:[#allocation20_spill] sm:$0xff] %v12647_v37  ;;  %v10232_v47 = vpack.c.bf16 %v7389_v0, %v7388_v16  ;;  %v7391_v49 = vld [vmem:[%s13998_s3 + $0x208] sm:$0xff]  ;;  %v12662_v0 = vld [vmem:[#allocation2 + $0xf1] sm:$0xff] }
 0x397   : > { %10225 = vmatprep.subr.bf16.mxu1 %v10224_v38  ;;  %v12665_v16 = vld [vmem:[#allocation2 + $0x109] sm:$0xff] }
 0x398   : > { %14164 = vst [vmem:[#allocation22_spill] sm:$0xff] %v12665_v16 }
 0x399   : > { %9308 = vmatmul.mubr.f32.gmra.mrb[10].mxu1 %v12638_v25  ;;  %v12659_v25 = vld [vmem:[#allocation2 + $0xe9] sm:$0xff] }
 0x39a   : > { %9310 = vmatprep.mubr.f32.mxu1 %v12647_v37  ;;  %10227 = vmatpush3.bf16.msra.mxu1 %v10224_v38  ;;  %v10236_v38 = vpack.c.bf16 %v7391_v49, %v7390_v48  ;;  %v12668_v37 = vld [vmem:[#allocation2 + $0x111] sm:$0xff]  ;;  %v12677_v49 = vld [vmem:[#allocation2 + $0x149] sm:$0xff] }
 0x39b   : > { %10229 = vmatprep.subr.bf16.mxu1 %v10228_v63  ;;  %14165 = vst [vmem:[#allocation23_spill] sm:$0xff] %v12668_v37  ;;  %14168 = vst [vmem:[#allocation26_spill] sm:$0xff] %v12677_v49  ;;  %v12680_v48 = vld [vmem:[#allocation2 + $0x151] sm:$0xff] }
 0x39c   : > { %14169 = vst [vmem:[#allocation27_spill] sm:$0xff] %v12680_v48 }
 0x39d   : > { %9311 = vmatmul.mubr.f32.gmra.mrb[12].mxu1 %v12650_v44  ;;  %v12671_v44 = vld [vmem:[#allocation2 + $0x129] sm:$0xff] }
 0x39e   : > { %9313 = vmatprep.mubr.f32.mxu1 %v12659_v25  ;;  %10231 = vmatpush3.bf16.msra.mxu1 %v10228_v63  ;;  %14166 = vst [vmem:[#allocation24_spill] sm:$0xff] %v12671_v44  ;;  %v12674_v63 = vld [vmem:[#allocation2 + $0x131] sm:$0xff] }
 0x39f   : > { %10233 = vmatprep.subr.bf16.mxu1 %v10232_v47  ;;  %14167 = vst [vmem:[#allocation25_spill] sm:$0xff] %v12674_v63 }
 0x3a1   : > { %9314 = vmatmul.mubr.f32.gmra.mrb[14].mxu1 %v12662_v0 }
 0x3a2   : > { %9316 = vmatprep.mubr.f32.mxu1 %v12665_v16  ;;  %10235 = vmatpush3.bf16.msra.mxu1 %v10232_v47  ;;  %v12683_v47 = vld [vmem:[#allocation2 + $0x169] sm:$0xff] }
 0x3a3   : > { %10237 = vmatprep.subr.bf16.mxu1 %v10236_v38  ;;  %14170 = vst [vmem:[#allocation28_spill] sm:$0xff] %v12683_v47 }
 0x3a5   : > { %9317 = vmatmul.mubr.f32.gmra.mrb[16].mxu1 %v12668_v37  ;;  %v12686_v37 = vld [vmem:[#allocation2 + $0x171] sm:$0xff] }
 0x3a6   : > { %9319 = vmatprep.mubr.f32.mxu1 %v12671_v44  ;;  %14171 = vst [vmem:[#allocation29_spill] sm:$0xff] %v12686_v37  ;;  %v12689_v44 = vld [vmem:[#allocation2 + $0x189] sm:$0xff] }
 0x3a7   : > { %14172 = vst [vmem:[#allocation30_spill] sm:$0xff] %v12689_v44 }
 0x3a9   : > { %9320 = vmatmul.mubr.f32.gmra.mrb[18].mxu1 %v12674_v63  ;;  %v12692_v63 = vld [vmem:[#allocation2 + $0x191] sm:$0xff] }
 0x3aa   : > { %9322 = vmatprep.mubr.f32.mxu1 %v12677_v49  ;;  %14173 = vst [vmem:[#allocation31_spill] sm:$0xff] %v12692_v63  ;;  %v12695_v49 = vld [vmem:[#allocation2 + $0x1a9] sm:$0xff] }
 0x3ab   : > { %14174 = vst [vmem:[#allocation32_spill] sm:$0xff] %v12695_v49 }
 0x3ad   : > { %9323 = vmatmul.mubr.f32.gmra.mrb[20].mxu1 %v12680_v48  ;;  %v12698_v48 = vld [vmem:[#allocation2 + $0x1b1] sm:$0xff] }
 0x3ae   : > { %9325 = vmatprep.mubr.f32.mxu1 %v12683_v47  ;;  %14175 = vst [vmem:[#allocation33_spill] sm:$0xff] %v12698_v48  ;;  %v12701_v47 = vld [vmem:[#allocation2 + $0x1c9] sm:$0xff] }
 0x3af   : > { %14176 = vst [vmem:[#allocation34_spill] sm:$0xff] %v12701_v47 }
 0x3b1   : > { %9326 = vmatmul.mubr.f32.gmra.mrb[22].mxu1 %v12686_v37  ;;  %v12704_v37 = vld [vmem:[#allocation2 + $0x1d1] sm:$0xff] }
 0x3b2   : > { %9328 = vmatprep.mubr.f32.mxu1 %v12689_v44  ;;  %14177 = vst [vmem:[#allocation35_spill] sm:$0xff] %v12704_v37  ;;  %v12707_v44 = vld [vmem:[#allocation2 + $0x1e9] sm:$0xff] }
 0x3b3   : > { %14178 = vst [vmem:[#allocation36_spill] sm:$0xff] %v12707_v44 }
 0x3b5   : > { %9329 = vmatmul.mubr.f32.gmra.mrb[24].mxu1 %v12692_v63  ;;  %v12710_v63 = vld [vmem:[#allocation2 + $0x1f1] sm:$0xff] }
 0x3b6   : > { %9331 = vmatprep.mubr.f32.mxu1 %v12695_v49  ;;  %v7392_v49 = vld [vmem:[%s13998_s3 + $0x210] sm:$0xff] }
 0x3b9   : > { %9332 = vmatmul.mubr.f32.gmra.mrb[26].mxu1 %v12698_v48  ;;  %v7393_v48 = vld [vmem:[%s13998_s3 + $0x218] sm:$0xff] }
 0x3ba   : > { %9334 = vmatprep.mubr.f32.mxu1 %v12701_v47  ;;  %v10240_v47 = vpack.c.bf16 %v7393_v48, %v7392_v49  ;;  %v7397_v49 = vld [vmem:[%s13998_s3 + $0x238] sm:$0xff]  ;;  %v7400_v48 = vld [vmem:[%s13998_s3 + $0x250] sm:$0xff] }
 0x3bd   : > { %9335 = vmatmul.mubr.f32.gmra.mrb[28].mxu1 %v12704_v37  ;;  %v7394_v37 = vld [vmem:[%s13998_s3 + $0x220] sm:$0xff] }
 0x3be   : > { %9337 = vmatprep.mubr.f32.mxu1 %v12707_v44  ;;  %v7395_v44 = vld [vmem:[%s13998_s3 + $0x228] sm:$0xff] }
 0x3bf   : > { %v10244_v16 = vpack.c.bf16 %v7395_v44, %v7394_v37  ;;  %v7399_v37 = vld [vmem:[%s13998_s3 + $0x248] sm:$0xff] }
 0x3c1   : > { %9338 = vmatmul.mubr.f32.gmra.mrb[30].mxu1 %v12710_v63 }
 0x3c2   : > { %9372 = vmatprep.mubr.f32.mxu1 %v12448_v35  ;;  %v7396_v35 = vld [vmem:[%s13998_s3 + $0x230] sm:$0xff] }
 0x3c5   : > { %9373 = vmatmul.mubr.f32.vlgmr.msra.gmra.mrb[0].mxu1 %v12452_v36  ;;  %v10248_v36 = vpack.c.bf16 %v7397_v49, %v7396_v35  ;;  %v7403_v49 = vld [vmem:[%s13998_s3 + $0x268] sm:$0xff] }
 0x3c6   : > { %9375 = vmatprep.mubr.f32.mxu1 %v12461_v17  ;;  %10239 = vmatpush3.bf16.msra.mxu1 %v10236_v38  ;;  %v7398_v38 = vld [vmem:[%s13998_s3 + $0x240] sm:$0xff] }
 0x3c7   : > { %10241 = vmatprep.subr.bf16.mxu1 %v10240_v47  ;;  %v10252_v44 = vpack.c.bf16 %v7399_v37, %v7398_v38  ;;  %v7405_v37 = vld [vmem:[%s13998_s3 + $0x278] sm:$0xff] }
 0x3c9   : > { %9376 = vmatmul.mubr.f32.gmra.mrb[2].mxu1 %v12464_v46 }
 0x3ca   : > { %9378 = vmatprep.mubr.f32.mxu1 %v12473_v56  ;;  %10243 = vmatpush3.bf16.msra.mxu1 %v10240_v47  ;;  %v7401_v47 = vld [vmem:[%s13998_s3 + $0x258] sm:$0xff] }
 0x3cb   : > { %10245 = vmatprep.subr.bf16.mxu1 %v10244_v16  ;;  %v10256_v35 = vpack.c.bf16 %v7401_v47, %v7400_v48  ;;  %v7407_v47 = vld [vmem:[%s13998_s3 + $0x288] sm:$0xff] }
 0x3cd   : > { %9379 = vmatmul.mubr.f32.gmra.mrb[4].mxu1 %v12476_v22 }
 0x3ce   : > { %9381 = vmatprep.mubr.f32.mxu1 %v12485_v60  ;;  %10247 = vmatpush3.bf16.msra.mxu1 %v10244_v16  ;;  %v7402_v16 = vld [vmem:[%s13998_s3 + $0x260] sm:$0xff] }
 0x3cf   : > { %10249 = vmatprep.subr.bf16.mxu1 %v10248_v36  ;;  %v10260_v38 = vpack.c.bf16 %v7403_v49, %v7402_v16  ;;  %v12794_v49 = vld [vmem:[#allocation2 + $0x20f] sm:$0xff] }
 0x3d0   : > { %14180 = vst [vmem:[#allocation38_spill] sm:$0xff] %v12794_v49 }
 0x3d1   : > { %9382 = vmatmul.mubr.f32.gmra.mrb[6].mxu1 %v12488_v42 }
 0x3d2   : > { %9384 = vmatprep.mubr.f32.mxu1 %v12497_v11  ;;  %10251 = vmatpush3.bf16.msra.mxu1 %v10248_v36  ;;  %v7404_v36 = vld [vmem:[%s13998_s3 + $0x270] sm:$0xff] }
 0x3d3   : > { %10253 = vmatprep.subr.bf16.mxu1 %v10252_v44  ;;  %v10264_v48 = vpack.c.bf16 %v7405_v37, %v7404_v36  ;;  %v7409_v36 = vld [vmem:[%s13998_s3 + $0x298] sm:$0xff]  ;;  %v4373_v37 = vld [vmem:[#allocation2 + $0x28] sm:$0xff] }
 0x3d5   : > { %9385 = vmatmul.mubr.f32.gmra.mrb[8].mxu1 %v12500_v3 }
 0x3d6   : > { %9387 = vmatprep.mubr.f32.mxu1 %v12509_v30  ;;  %10255 = vmatpush3.bf16.msra.mxu1 %v10252_v44  ;;  %v7406_v44 = vld [vmem:[%s13998_s3 + $0x280] sm:$0xff] }
 0x3d7   : > { %10257 = vmatprep.subr.bf16.mxu1 %v10256_v35  ;;  %v10268_v16 = vpack.c.bf16 %v7407_v47, %v7406_v44  ;;  %v4374_v44 = vld [vmem:[#allocation2 + $0x30] sm:$0xff]  ;;  %v7410_v47 = vld [vmem:[%s13998_s3 + $0x2a0] sm:$0xff] }
 0x3d9   : > { %9388 = vmatmul.mubr.f32.gmra.mrb[10].mxu1 %v12512_v39 }
 0x3da   : > { %9390 = vmatprep.mubr.f32.mxu1 %v12521_v62  ;;  %10259 = vmatpush3.bf16.msra.mxu1 %v10256_v35  ;;  %v12791_v35 = vld [vmem:[#allocation2 + $0x207] sm:$0xff] }
 0x3db   : > { %10261 = vmatprep.subr.bf16.mxu1 %v10260_v38  ;;  %14179 = vst [vmem:[#allocation37_spill] sm:$0xff] %v12791_v35 }
 0x3dd   : > { %9391 = vmatmul.mubr.f32.gmra.mrb[12].mxu1 %v12524_v23 }
 0x3de   : > { %9393 = vmatprep.mubr.f32.mxu1 %v12527_v9  ;;  %10263 = vmatpush3.bf16.msra.mxu1 %v10260_v38  ;;  %v7408_v38 = vld [vmem:[%s13998_s3 + $0x290] sm:$0xff] }
 0x3df   : > { %10265 = vmatprep.subr.bf16.mxu1 %v10264_v48 }
 0x3e1   : > { %9394 = vmatmul.mubr.f32.gmra.mrb[14].mxu1 %v12530_v13 }
 0x3e2   : > { %9396 = vmatprep.mubr.f32.mxu1 %v12533_v31  ;;  %10267 = vmatpush3.bf16.msra.mxu1 %v10264_v48  ;;  %v10272_v48 = vpack.c.bf16 %v7409_v36, %v7408_v38  ;;  %v7412_v38 = vld [vmem:[%s13998_s3 + $0x2b0] sm:$0xff]  ;;  %v7413_v36 = vld [vmem:[%s13998_s3 + $0x2b8] sm:$0xff] }
 0x3e3   : > { %10269 = vmatprep.subr.bf16.mxu1 %v10268_v16 }
 0x3e5   : > { %9397 = vmatmul.mubr.f32.gmra.mrb[16].mxu1 %v12536_v20 }
 0x3e6   : > { %9399 = vmatprep.mubr.f32.mxu1 %v12539_v57 }
 0x3e9   : > { %9400 = vmatmul.mubr.f32.gmra.mrb[18].mxu1 %v12542_v12 }
 0x3ea   : > { %9402 = vmatprep.mubr.f32.mxu1 %v12545_v41 }
 0x3ed   : > { %9403 = vmatmul.mubr.f32.gmra.mrb[20].mxu1 %v12548_v53 }
 0x3ee   : > { %9405 = vmatprep.mubr.f32.mxu1 %v12551_v50 }
 0x3f1   : > { %9406 = vmatmul.mubr.f32.gmra.mrb[22].mxu1 %v12554_v18 }
 0x3f2   : > { %9408 = vmatprep.mubr.f32.mxu1 %v12557_v1 }
 0x3f5   : > { %9409 = vmatmul.mubr.f32.gmra.mrb[24].mxu1 %v12560_v5 }
 0x3f6   : > { %9411 = vmatprep.mubr.f32.mxu1 %v12563_v6 }
 0x3f9   : > { %9412 = vmatmul.mubr.f32.gmra.mrb[26].mxu1 %v12566_v34 }
 0x3fa   : > { %9414 = vmatprep.mubr.f32.mxu1 %v12569_v10  ;;  %v12812_v10 = vld [vmem:[#allocation2 + $0x50] sm:$0xff] }
 0x3fd   : > { %9415 = vmatmul.mubr.f32.gmra.mrb[28].mxu1 %v12572_v59  ;;  %v12809_v59 = vld [vmem:[#allocation2 + $0x48] sm:$0xff] }
 0x3fe   : > { %9417 = vmatprep.mubr.f32.mxu1 %v12791_v35  ;;  %v7411_v35 = vld [vmem:[%s13998_s3 + $0x2a8] sm:$0xff] }
 0x401   : > { %9418 = vmatmul.mubr.f32.gmra.mrb[30].mxu1 %v12794_v49  ;;  %v10276_v49 = vpack.c.bf16 %v7411_v35, %v7410_v47  ;;  %v7414_v35 = vld [vmem:[%s13998_s3 + $0x2c0] sm:$0xff]  ;;  %v7417_v47 = vld [vmem:[%s13998_s3 + $0x2d8] sm:$0xff] }
 0x402   : > { %9452 = vmatprep.mubr.f32.mxu1 %v4373_v37  ;;  %v10280_v37 = vpack.c.bf16 %v7413_v36, %v7412_v38  ;;  %v7421_v36 = vld [vmem:[%s13998_s3 + $0x2f8] sm:$0xff] }
 0x405   : > { %9453 = vmatmul.mubr.f32.vlgmr.msra.gmra.mrb[0].mxu1 %v4374_v44  ;;  %v7415_v44 = vld [vmem:[%s13998_s3 + $0x2c8] sm:$0xff] }
 0x406   : > { %9455 = vmatprep.mubr.f32.mxu1 %v12809_v59  ;;  %10271 = vmatpush3.bf16.msra.mxu1 %v10268_v16  ;;  %v12822_v16 = vld [vmem:[#allocation2 + $0x70] sm:$0xff] }
 0x407   : > { %10273 = vmatprep.subr.bf16.mxu1 %v10272_v48 }
 0x409   : > { %9456 = vmatmul.mubr.f32.gmra.mrb[2].mxu1 %v12812_v10 }
 0x40a   : > { %9458 = vmatprep.mubr.f32.mxu1 %v12304_v26  ;;  %10275 = vmatpush3.bf16.msra.mxu1 %v10272_v48  ;;  %v10284_v26 = vpack.c.bf16 %v7415_v44, %v7414_v35  ;;  %v7416_v48 = vld [vmem:[%s13998_s3 + $0x2d0] sm:$0xff]  ;;  %v7430_v35 = vld [vmem:[%s13998_s3 + $0x340] sm:$0xff]  ;;  %v7431_v44 = vld [vmem:[%s13998_s3 + $0x348] sm:$0xff] }
 0x40b   : > { %10277 = vmatprep.subr.bf16.mxu1 %v10276_v49  ;;  %v10288_v38 = vpack.c.bf16 %v7417_v47, %v7416_v48  ;;  %v14190_v48 = vld [vmem:[#allocation16_spill] sm:$0xff]  ;;  %v10316_v47 = vpack.c.bf16 %v7431_v44, %v7430_v35  ;;  %v14208_v35 = vld [vmem:[#allocation34_spill] sm:$0xff]  ;;  %v14209_v44 = vld [vmem:[#allocation35_spill] sm:$0xff] }
 0x40d   : > { %9459 = vmatmul.mubr.f32.gmra.mrb[4].mxu1 %v12822_v16 }
 0x40e   : > { %9461 = vmatprep.mubr.f32.mxu1 %v12312_v27  ;;  %10279 = vmatpush3.bf16.msra.mxu1 %v10276_v49  ;;  %v7418_v27 = vld [vmem:[%s13998_s3 + $0x2e0] sm:$0xff]  ;;  %v7419_v49 = vld [vmem:[%s13998_s3 + $0x2e8] sm:$0xff] }
 0x40f   : > { %10281 = vmatprep.subr.bf16.mxu1 %v10280_v37 }
 0x411   : > { %9462 = vmatmul.mubr.f32.gmra.mrb[6].mxu1 %v12309_v40  ;;  %v10292_v40 = vpack.c.bf16 %v7419_v49, %v7418_v27  ;;  %v7433_v27 = vld [vmem:[%s13998_s3 + $0x358] sm:$0xff]  ;;  %v14191_v49 = vld [vmem:[#allocation17_spill] sm:$0xff] }
 0x412   : > { %9464 = vmatprep.mubr.f32.mxu1 %v12322_v21  ;;  %10283 = vmatpush3.bf16.msra.mxu1 %v10280_v37  ;;  %v7420_v21 = vld [vmem:[%s13998_s3 + $0x2f0] sm:$0xff]  ;;  %v7423_v37 = vld [vmem:[%s13998_s3 + $0x308] sm:$0xff] }
 0x413   : > { %10285 = vmatprep.subr.bf16.mxu1 %v10284_v26 }
 0x415   : > { %9465 = vmatmul.mubr.f32.gmra.mrb[8].mxu1 %v12318_v45  ;;  %v10296_v45 = vpack.c.bf16 %v7421_v36, %v7420_v21  ;;  %v7434_v36 = vld [vmem:[%s13998_s3 + $0x360] sm:$0xff] }
 0x416   : > { %9467 = vmatprep.mubr.f32.mxu1 %v12332_v55  ;;  %10287 = vmatpush3.bf16.msra.mxu1 %v10284_v26  ;;  %v7422_v55 = vld [vmem:[%s13998_s3 + $0x300] sm:$0xff]  ;;  %v14189_v26 = vld [vmem:[#allocation15_spill] sm:$0xff] }
 0x417   : > { %10289 = vmatprep.subr.bf16.mxu1 %v10288_v38 }
 0x419   : > { %9468 = vmatmul.mubr.f32.gmra.mrb[10].mxu1 %v12328_v51  ;;  %v10300_v51 = vpack.c.bf16 %v7423_v37, %v7422_v55  ;;  %v14193_v55 = vld [vmem:[#allocation19_spill] sm:$0xff]  ;;  %v14194_v37 = vld [vmem:[#allocation20_spill] sm:$0xff] }
 0x41a   : > { %9470 = vmatprep.mubr.f32.mxu1 %v12342_v2  ;;  %10291 = vmatpush3.bf16.msra.mxu1 %v10288_v38  ;;  %v14182_v2 = vld [vmem:[#allocation5_spill] sm:$0xff]  ;;  %v7432_v38 = vld [vmem:[%s13998_s3 + $0x350] sm:$0xff] }
 0x41b   : > { %10293 = vmatprep.subr.bf16.mxu1 %v10292_v40  ;;  %v10320_v21 = vpack.c.bf16 %v7433_v27, %v7432_v38  ;;  %v7440_v38 = vld [vmem:[%s13998_s3 + $0x390] sm:$0xff]  ;;  %v7441_v27 = vld [vmem:[%s13998_s3 + $0x398] sm:$0xff] }
 0x41d   : > { %9471 = vmatmul.mubr.f32.gmra.mrb[12].mxu1 %v12338_v61  ;;  %v14181_v61 = vld [vmem:[#allocation6_spill] sm:$0xff] }
 0x41e   : > { %9473 = vmatprep.mubr.f32.mxu1 %v12352_v28  ;;  %10295 = vmatpush3.bf16.msra.mxu1 %v10292_v40  ;;  %v7424_v28 = vld [vmem:[%s13998_s3 + $0x310] sm:$0xff]  ;;  %v14192_v40 = vld [vmem:[#allocation18_spill] sm:$0xff] }
 0x41f   : > { %10297 = vmatprep.subr.bf16.mxu1 %v10296_v45 }
 0x421   : > { %9474 = vmatmul.mubr.f32.gmra.mrb[14].mxu1 %v12348_v4  ;;  %v14183_v4 = vld [vmem:[#allocation8_spill] sm:$0xff] }
 0x422   : > { %9476 = vmatprep.mubr.f32.mxu1 %v12362_v33  ;;  %10299 = vmatpush3.bf16.msra.mxu1 %v10296_v45  ;;  %v14184_v33 = vld [vmem:[#allocation7_spill] sm:$0xff]  ;;  %v7435_v45 = vld [vmem:[%s13998_s3 + $0x368] sm:$0xff] }
 0x423   : > { %10301 = vmatprep.subr.bf16.mxu1 %v10300_v51 }
 0x425   : > { %9477 = vmatmul.mubr.f32.gmra.mrb[16].mxu1 %v12358_v14  ;;  %v7425_v14 = vld [vmem:[%s13998_s3 + $0x318] sm:$0xff] }
 0x426   : > { %9479 = vmatprep.mubr.f32.mxu1 %v12372_v43  ;;  %v7426_v43 = vld [vmem:[%s13998_s3 + $0x320] sm:$0xff] }
 0x429   : > { %9480 = vmatmul.mubr.f32.gmra.mrb[18].mxu1 %v12368_v8  ;;  %v10304_v8 = vpack.c.bf16 %v7425_v14, %v7424_v28  ;;  %v7438_v14 = vld [vmem:[%s13998_s3 + $0x380] sm:$0xff] }
 0x42a   : > { %9482 = vmatprep.mubr.f32.mxu1 %v12382_v52  ;;  %v14185_v52 = vld [vmem:[#allocation11_spill] sm:$0xff] }
 0x42d   : > { %9483 = vmatmul.mubr.f32.gmra.mrb[20].mxu1 %v12378_v54  ;;  %v7427_v54 = vld [vmem:[%s13998_s3 + $0x328] sm:$0xff] }
 0x42e   : > { %9485 = vmatprep.mubr.f32.mxu1 %v12392_v15  ;;  %v10308_v15 = vpack.c.bf16 %v7427_v54, %v7426_v43  ;;  %v14197_v54 = vld [vmem:[#allocation23_spill] sm:$0xff] }
 0x431   : > { %9486 = vmatmul.mubr.f32.gmra.mrb[22].mxu1 %v12388_v58  ;;  %v14186_v58 = vld [vmem:[#allocation12_spill] sm:$0xff] }
 0x432   : > { %9488 = vmatprep.mubr.f32.mxu1 %v12402_v24  ;;  %v7429_v24 = vld [vmem:[%s13998_s3 + $0x338] sm:$0xff] }
 0x435   : > { %9489 = vmatmul.mubr.f32.gmra.mrb[24].mxu1 %v12398_v19  ;;  %v7428_v19 = vld [vmem:[%s13998_s3 + $0x330] sm:$0xff] }
 0x436   : > { %9491 = vmatprep.mubr.f32.mxu1 %v12412_v32  ;;  %v14188_v32 = vld [vmem:[#allocation14_spill] sm:$0xff] }
 0x439   : > { %9492 = vmatmul.mubr.f32.gmra.mrb[26].mxu1 %v12408_v29  ;;  %v14187_v29 = vld [vmem:[#allocation13_spill] sm:$0xff] }
 0x43a   : > { %9494 = vmatprep.mubr.f32.mxu1 %v14181_v61  ;;  %v7436_v61 = vld [vmem:[%s13998_s3 + $0x370] sm:$0xff] }
 0x43d   : > { %9495 = vmatmul.mubr.f32.gmra.mrb[28].mxu1 %v14182_v2  ;;  %v7437_v2 = vld [vmem:[%s13998_s3 + $0x378] sm:$0xff] }
 0x43e   : > { %9497 = vmatprep.mubr.f32.mxu1 %v14183_v4  ;;  %v14195_v4 = vld [vmem:[#allocation21_spill] sm:$0xff]  ;;  %v10328_v28 = vpack.c.bf16 %v7437_v2, %v7436_v61  ;;  %v7455_v61 = vld [vmem:[%s13998_s3 + $0x408] sm:$0xff] }
 0x43f   : > { %v5296_v2 = vld [vmem:[#allocation2 + $0x88] sm:$0xff] }
 0x441   : > { %9498 = vmatmul.mubr.f32.gmra.mrb[30].mxu1 %v14184_v33  ;;  %v7439_v33 = vld [vmem:[%s13998_s3 + $0x388] sm:$0xff] }
 0x442   : > { %9532 = vmatprep.mubr.f32.mxu1 %v12587_v7  ;;  %v10312_v7 = vpack.c.bf16 %v7429_v24, %v7428_v19  ;;  %v10332_v43 = vpack.c.bf16 %v7439_v33, %v7438_v14  ;;  %v14202_v19 = vld [vmem:[#allocation28_spill] sm:$0xff]  ;;  %v14204_v24 = vld [vmem:[#allocation30_spill] sm:$0xff] }
 0x443   : > { %v7463_v14 = vld [vmem:[%s13998_s3 + $0x448] sm:$0xff] }
 0x444   : > { %v5298_v33 = vld [vmem:[#allocation2 + $0xa8] sm:$0xff] }
 0x445   : > { %9533 = vmatmul.mubr.f32.vlgmr.msra.gmra.mrb[0].mxu1 %v14185_v52  ;;  %v14199_v52 = vld [vmem:[#allocation25_spill] sm:$0xff] }
 0x446   : > { %9535 = vmatprep.mubr.f32.mxu1 %v14186_v58  ;;  %10303 = vmatpush3.bf16.msra.mxu1 %v10300_v51  ;;  %v10324_v51 = vpack.c.bf16 %v7435_v45, %v7434_v36  ;;  %v14200_v58 = vld [vmem:[#allocation26_spill] sm:$0xff]  ;;  %v7445_v36 = vld [vmem:[%s13998_s3 + $0x3b8] sm:$0xff] }
 0x447   : > { %10305 = vmatprep.subr.bf16.mxu1 %v10304_v8  ;;  %v7447_v45 = vld [vmem:[%s13998_s3 + $0x3c8] sm:$0xff] }
 0x449   : > { %9536 = vmatmul.mubr.f32.gmra.mrb[2].mxu1 %v14187_v29  ;;  %v14205_v29 = vld [vmem:[#allocation31_spill] sm:$0xff] }
 0x44a   : > { %9538 = vmatprep.mubr.f32.mxu1 %v14188_v32  ;;  %10307 = vmatpush3.bf16.msra.mxu1 %v10304_v8  ;;  %v14196_v8 = vld [vmem:[#allocation22_spill] sm:$0xff]  ;;  %v14206_v32 = vld [vmem:[#allocation32_spill] sm:$0xff] }
 0x44b   : > { %10309 = vmatprep.subr.bf16.mxu1 %v10308_v15 }
 0x44d   : > { %9539 = vmatmul.mubr.f32.gmra.mrb[4].mxu1 %v14189_v26  ;;  %v14210_v26 = vld [vmem:[#allocation36_spill] sm:$0xff] }
 0x44e   : > { %9541 = vmatprep.mubr.f32.mxu1 %v14190_v48  ;;  %10311 = vmatpush3.bf16.msra.mxu1 %v10308_v15  ;;  %v14201_v15 = vld [vmem:[#allocation27_spill] sm:$0xff] }
 0x44f   : > { %10313 = vmatprep.subr.bf16.mxu1 %v10312_v7  ;;  %v12959_v48 = vld [vmem:[#allocation2 + $0x209] sm:$0xff] }
 0x451   : > { %9542 = vmatmul.mubr.f32.gmra.mrb[6].mxu1 %v14191_v49  ;;  %v10336_v49 = vpack.c.bf16 %v7441_v27, %v7440_v38  ;;  %v5306_v38 = vld [vmem:[#allocation2 + $0x128] sm:$0xff]  ;;  %v5307_v27 = vld [vmem:[#allocation2 + $0x130] sm:$0xff] }
 0x452   : > { %9544 = vmatprep.mubr.f32.mxu1 %v14192_v40  ;;  %10315 = vmatpush3.bf16.msra.mxu1 %v10312_v7  ;;  %v14207_v7 = vld [vmem:[#allocation33_spill] sm:$0xff]  ;;  %v7443_v40 = vld [vmem:[%s13998_s3 + $0x3a8] sm:$0xff] }
 0x453   : > { %10317 = vmatprep.subr.bf16.mxu1 %v10316_v47 }
 0x455   : > { %9545 = vmatmul.mubr.f32.gmra.mrb[8].mxu1 %v14193_v55  ;;  %v7449_v55 = vld [vmem:[%s13998_s3 + $0x3d8] sm:$0xff] }
 0x456   : > { %9547 = vmatprep.mubr.f32.mxu1 %v14194_v37  ;;  %10319 = vmatpush3.bf16.msra.mxu1 %v10316_v47  ;;  %v12962_v47 = vld [vmem:[#allocation2 + $0x211] sm:$0xff]  ;;  %v7451_v37 = vld [vmem:[%s13998_s3 + $0x3e8] sm:$0xff] }
 0x457   : > { %10321 = vmatprep.subr.bf16.mxu1 %v10320_v21 }
 0x459   : > { %9548 = vmatmul.mubr.f32.gmra.mrb[10].mxu1 %v14195_v4  ;;  %v5297_v4 = vld [vmem:[#allocation2 + $0x90] sm:$0xff] }
 0x45a   : > { %9550 = vmatprep.mubr.f32.mxu1 %v12659_v25  ;;  %10323 = vmatpush3.bf16.msra.mxu1 %v10320_v21  ;;  %v14198_v25 = vld [vmem:[#allocation24_spill] sm:$0xff] }
 0x45b   : > { %10325 = vmatprep.subr.bf16.mxu1 %v10324_v51 }
 0x45d   : > { %9551 = vmatmul.mubr.f32.gmra.mrb[12].mxu1 %v12662_v0  ;;  %v14203_v0 = vld [vmem:[#allocation29_spill] sm:$0xff] }
 0x45e   : > { %9553 = vmatprep.mubr.f32.mxu1 %v14196_v8  ;;  %10327 = vmatpush3.bf16.msra.mxu1 %v10324_v51  ;;  %v7453_v51 = vld [vmem:[%s13998_s3 + $0x3f8] sm:$0xff]  ;;  %v5299_v8 = vld [vmem:[#allocation2 + $0xb0] sm:$0xff] }
 0x45f   : > { %10329 = vmatprep.subr.bf16.mxu1 %v10328_v28 }
 0x461   : > { %9554 = vmatmul.mubr.f32.gmra.mrb[14].mxu1 %v14197_v54  ;;  %v7465_v54 = vld [vmem:[%s13998_s3 + $0x458] sm:$0xff] }
 0x462   : > { %9556 = vmatprep.mubr.f32.mxu1 %v14198_v25  ;;  %10331 = vmatpush3.bf16.msra.mxu1 %v10328_v28  ;;  %v7462_v28 = vld [vmem:[%s13998_s3 + $0x440] sm:$0xff]  ;;  %v5300_v25 = vld [vmem:[#allocation2 + $0xc8] sm:$0xff] }
 0x463   : > { %10333 = vmatprep.subr.bf16.mxu1 %v10332_v43 }
 0x465   : > { %9557 = vmatmul.mubr.f32.gmra.mrb[16].mxu1 %v14199_v52 }
 0x466   : > { %9559 = vmatprep.mubr.f32.mxu1 %v14200_v58  ;;  %v5301_v58 = vld [vmem:[#allocation2 + $0xd0] sm:$0xff] }
 0x469   : > { %9560 = vmatmul.mubr.f32.gmra.mrb[18].mxu1 %v14201_v15  ;;  %v7466_v15 = vld [vmem:[%s13998_s3 + $0x460] sm:$0xff] }
 0x46a   : > { %9562 = vmatprep.mubr.f32.mxu1 %v14202_v19  ;;  %v7467_v19 = vld [vmem:[%s13998_s3 + $0x468] sm:$0xff] }
 0x46d   : > { %9563 = vmatmul.mubr.f32.gmra.mrb[20].mxu1 %v14203_v0  ;;  %v5302_v0 = vld [vmem:[#allocation2 + $0xe8] sm:$0xff] }
 0x46e   : > { %9565 = vmatprep.mubr.f32.mxu1 %v14204_v24  ;;  %v10388_v24 = vpack.c.bf16 %v7467_v19, %v7466_v15 }
 0x471   : > { %9566 = vmatmul.mubr.f32.gmra.mrb[22].mxu1 %v14205_v29  ;;  %v5303_v29 = vld [vmem:[#allocation2 + $0xf0] sm:$0xff] }
 0x472   : > { %9568 = vmatprep.mubr.f32.mxu1 %v14206_v32  ;;  %v7468_v32 = vld [vmem:[%s13998_s3 + $0x470] sm:$0xff] }
 0x475   : > { %9569 = vmatmul.mubr.f32.gmra.mrb[24].mxu1 %v14207_v7  ;;  %v7469_v7 = vld [vmem:[%s13998_s3 + $0x478] sm:$0xff] }
 0x476   : > { %9571 = vmatprep.mubr.f32.mxu1 %v14208_v35  ;;  %v5304_v35 = vld [vmem:[#allocation2 + $0x108] sm:$0xff] }
 0x479   : > { %9572 = vmatmul.mubr.f32.gmra.mrb[26].mxu1 %v14209_v44  ;;  %v10392_v44 = vpack.c.bf16 %v7469_v7, %v7468_v32 }
 0x47a   : > { %9574 = vmatprep.mubr.f32.mxu1 %v14210_v26  ;;  %v5305_v26 = vld [vmem:[#allocation2 + $0x110] sm:$0xff] }
 0x47d   : > { %9575 = vmatmul.mubr.f32.gmra.mrb[28].mxu1 %v12710_v63  ;;  %v7442_v63 = vld [vmem:[%s13998_s3 + $0x3a0] sm:$0xff] }
 0x47e   : > { %9577 = vmatprep.mubr.f32.mxu1 %v12959_v48  ;;  %v10340_v21 = vpack.c.bf16 %v7443_v40, %v7442_v63  ;;  %v5309_v63 = vld [vmem:[#allocation2 + $0x150] sm:$0xff]  ;;  %v5310_v40 = vld [vmem:[#allocation2 + $0x168] sm:$0xff] }
 0x481   : > { %9578 = vmatmul.mubr.f32.gmra.mrb[30].mxu1 %v12962_v47 }
 0x482   : > { %9612 = vmatprep.mubr.f32.mxu1 %v12461_v17  ;;  %v7444_v17 = vld [vmem:[%s13998_s3 + $0x3b0] sm:$0xff] }
 0x485   : > { %9613 = vmatmul.mubr.f32.vlgmr.msra.gmra.mrb[0].mxu1 %v12464_v46  ;;  %v10344_v46 = vpack.c.bf16 %v7445_v36, %v7444_v17  ;;  %v5312_v17 = vld [vmem:[#allocation2 + $0x188] sm:$0xff]  ;;  %v5313_v36 = vld [vmem:[#allocation2 + $0x190] sm:$0xff] }
 0x486   : > { %9615 = vmatprep.mubr.f32.mxu1 %v12473_v56  ;;  %10335 = vmatpush3.bf16.msra.mxu1 %v10332_v43  ;;  %v7446_v56 = vld [vmem:[%s13998_s3 + $0x3c0] sm:$0xff]  ;;  %v7464_v43 = vld [vmem:[%s13998_s3 + $0x450] sm:$0xff] }
 0x487   : > { %10337 = vmatprep.subr.bf16.mxu1 %v10336_v49  ;;  %v10384_v52 = vpack.c.bf16 %v7465_v54, %v7464_v43  ;;  %v13097_v43 = vld [vmem:[%s14000_s5] ss:$0 sm:$0xff]  ;;  %v5975_v54 = vld [vmem:[#allocation3 + $0x7] sm:$0xff] }
 0x489   : > { %9616 = vmatmul.mubr.f32.gmra.mrb[2].mxu1 %v12476_v22  ;;  %v10348_v22 = vpack.c.bf16 %v7447_v45, %v7446_v56  ;;  %v5315_v56 = vld [vmem:[#allocation2 + $0x1b0] sm:$0xff]  ;;  %v5316_v45 = vld [vmem:[#allocation2 + $0x1c8] sm:$0xff] }
 0x48a   : > { %9618 = vmatprep.mubr.f32.mxu1 %v12485_v60  ;;  %10339 = vmatpush3.bf16.msra.mxu1 %v10336_v49  ;;  %v7448_v60 = vld [vmem:[%s13998_s3 + $0x3d0] sm:$0xff]  ;;  %v5308_v49 = vld [vmem:[#allocation2 + $0x148] sm:$0xff] }
 0x48b   : > { %10341 = vmatprep.subr.bf16.mxu1 %v10340_v21 }
 0x48d   : > { %9619 = vmatmul.mubr.f32.gmra.mrb[4].mxu1 %v12488_v42  ;;  %v10352_v42 = vpack.c.bf16 %v7449_v55, %v7448_v60  ;;  %v5318_v60 = vld [vmem:[#allocation2 + $0x1e8] sm:$0xff]  ;;  %v5319_v55 = vld [vmem:[#allocation2 + $0x1f0] sm:$0xff] }
 0x48e   : > { %9621 = vmatprep.mubr.f32.mxu1 %v12497_v11  ;;  %10343 = vmatpush3.bf16.msra.mxu1 %v10340_v21  ;;  %v7450_v11 = vld [vmem:[%s13998_s3 + $0x3e0] sm:$0xff]  ;;  %v5311_v21 = vld [vmem:[#allocation2 + $0x170] sm:$0xff] }
 0x48f   : > { %10345 = vmatprep.subr.bf16.mxu1 %v10344_v46 }
 0x491   : > { %9622 = vmatmul.mubr.f32.gmra.mrb[6].mxu1 %v12500_v3  ;;  %v10356_v3 = vpack.c.bf16 %v7451_v37, %v7450_v11  ;;  %v5321_v11 = vld [vmem:[#allocation2 + $0x210] sm:$0xff]  ;;  %v13088_v37 = vld [vmem:[#allocation2] sm:$0xff] }
 0x492   : > { %9624 = vmatprep.mubr.f32.mxu1 %v12509_v30  ;;  %10347 = vmatpush3.bf16.msra.mxu1 %v10344_v46  ;;  %v7452_v30 = vld [vmem:[%s13998_s3 + $0x3f0] sm:$0xff]  ;;  %v5314_v46 = vld [vmem:[#allocation2 + $0x1a8] sm:$0xff] }
 0x493   : > { %10349 = vmatprep.subr.bf16.mxu1 %v10348_v22 }
 0x495   : > { %9625 = vmatmul.mubr.f32.gmra.mrb[8].mxu1 %v12512_v39  ;;  %v10360_v39 = vpack.c.bf16 %v7453_v51, %v7452_v30  ;;  %v5599_v30 = vld [vmem:[#allocation2 + $0x51] sm:$0xff]  ;;  %v5600_v51 = vld [vmem:[#allocation2 + $0x69] sm:$0xff] }
 0x496   : > { %9627 = vmatprep.mubr.f32.mxu1 %v12521_v62  ;;  %10351 = vmatpush3.bf16.msra.mxu1 %v10348_v22  ;;  %v7454_v62 = vld [vmem:[%s13998_s3 + $0x400] sm:$0xff]  ;;  %v5317_v22 = vld [vmem:[#allocation2 + $0x1d0] sm:$0xff] }
 0x497   : > { %10353 = vmatprep.subr.bf16.mxu1 %v10352_v42 }
 0x499   : > { %9628 = vmatmul.mubr.f32.gmra.mrb[10].mxu1 %v12524_v23  ;;  %v10364_v23 = vpack.c.bf16 %v7455_v61, %v7454_v62  ;;  %v5602_v62 = vld [vmem:[#allocation2 + $0x89] sm:$0xff]  ;;  %v5603_v61 = vld [vmem:[#allocation2 + $0x91] sm:$0xff] }
 0x49a   : > { %9630 = vmatprep.mubr.f32.mxu1 %v12527_v9  ;;  %10355 = vmatpush3.bf16.msra.mxu1 %v10352_v42  ;;  %v14211_v9 = vld [vmem:[#allocation9_spill] sm:$0xff]  ;;  %v5320_v42 = vld [vmem:[#allocation2 + $0x208] sm:$0xff] }
 0x49b   : > { %10357 = vmatprep.subr.bf16.mxu1 %v10356_v3 }
 0x49d   : > { %9631 = vmatmul.mubr.f32.gmra.mrb[12].mxu1 %v12530_v13  ;;  %v14212_v13 = vld [vmem:[#allocation10_spill] sm:$0xff] }
 0x49e   : > { %9633 = vmatprep.mubr.f32.mxu1 %v12533_v31  ;;  %10359 = vmatpush3.bf16.msra.mxu1 %v10356_v3  ;;  %v14213_v31 = vld [vmem:[#allocation37_spill] sm:$0xff]  ;;  %v5598_v3 = vld [vmem:[#allocation2 + $0x49] sm:$0xff] }
 0x49f   : > { %10361 = vmatprep.subr.bf16.mxu1 %v10360_v39 }
 0x4a1   : > { %9634 = vmatmul.mubr.f32.gmra.mrb[14].mxu1 %v12536_v20  ;;  %v5016_v20 = vld [vmem:[#allocation2 + $0x227] sm:$0xff] }
 0x4a2   : > { %9636 = vmatprep.mubr.f32.mxu1 %v12539_v57  ;;  %10363 = vmatpush3.bf16.msra.mxu1 %v10360_v39  ;;  %v14214_v57 = vld [vmem:[#allocation38_spill] sm:$0xff]  ;;  %v5601_v39 = vld [vmem:[#allocation2 + $0x71] sm:$0xff] }
 0x4a3   : > { %10365 = vmatprep.subr.bf16.mxu1 %v10364_v23 }
 0x4a5   : > { %9637 = vmatmul.mubr.f32.gmra.mrb[16].mxu1 %v12542_v12  ;;  %v5017_v12 = vld [vmem:[#allocation2 + $0x22f] sm:$0xff] }
 0x4a6   : > { %9639 = vmatprep.mubr.f32.mxu1 %v12545_v41  ;;  %v7456_v41 = vld [vmem:[%s13998_s3 + $0x410] sm:$0xff] }
 0x4a9   : > { %9640 = vmatmul.mubr.f32.gmra.mrb[18].mxu1 %v12548_v53  ;;  %v7457_v53 = vld [vmem:[%s13998_s3 + $0x418] sm:$0xff] }
 0x4aa   : > { %9642 = vmatprep.mubr.f32.mxu1 %v12551_v50  ;;  %v10368_v50 = vpack.c.bf16 %v7457_v53, %v7456_v41  ;;  %v5611_v41 = vld [vmem:[#allocation2 + $0x111] sm:$0xff]  ;;  %v5612_v53 = vld [vmem:[#allocation2 + $0x129] sm:$0xff] }
 0x4ad   : > { %9643 = vmatmul.mubr.f32.gmra.mrb[20].mxu1 %v12554_v18  ;;  %v7458_v18 = vld [vmem:[%s13998_s3 + $0x420] sm:$0xff] }
 0x4ae   : > { %9645 = vmatprep.mubr.f32.mxu1 %v12557_v1  ;;  %v7459_v1 = vld [vmem:[%s13998_s3 + $0x428] sm:$0xff] }
 0x4b1   : > { %9646 = vmatmul.mubr.f32.gmra.mrb[22].mxu1 %v12560_v5  ;;  %v5294_v5 = vld [vmem:[#allocation2 + $0x68] sm:$0xff] }
 0x4b2   : > { %9648 = vmatprep.mubr.f32.mxu1 %v12563_v6  ;;  %v10372_v6 = vpack.c.bf16 %v7459_v1, %v7458_v18  ;;  %v5614_v18 = vld [vmem:[#allocation2 + $0x149] sm:$0xff]  ;;  %v5615_v1 = vld [vmem:[#allocation2 + $0x151] sm:$0xff] }
 0x4b5   : > { %9649 = vmatmul.mubr.f32.gmra.mrb[24].mxu1 %v12566_v34  ;;  %v7460_v34 = vld [vmem:[%s13998_s3 + $0x430] sm:$0xff] }
 0x4b6   : > { %9651 = vmatprep.mubr.f32.mxu1 %v14211_v9  ;;  %v5605_v9 = vld [vmem:[#allocation2 + $0xb1] sm:$0xff] }
 0x4b9   : > { %9652 = vmatmul.mubr.f32.gmra.mrb[26].mxu1 %v14212_v13  ;;  %v5606_v13 = vld [vmem:[#allocation2 + $0xc9] sm:$0xff] }
 0x4ba   : > { %9654 = vmatprep.mubr.f32.mxu1 %v14213_v31  ;;  %v5607_v31 = vld [vmem:[#allocation2 + $0xd1] sm:$0xff] }
 0x4bd   : > { %9655 = vmatmul.mubr.f32.gmra.mrb[28].mxu1 %v14214_v57  ;;  %v5609_v57 = vld [vmem:[#allocation2 + $0xf1] sm:$0xff] }
 0x4be   : > { %9657 = vmatprep.mubr.f32.mxu1 %v5016_v20  ;;  %v5608_v20 = vld [vmem:[#allocation2 + $0xe9] sm:$0xff] }
 0x4c1   : > { %9658 = vmatmul.mubr.f32.gmra.mrb[30].mxu1 %v5017_v12  ;;  %v5610_v12 = vld [vmem:[#allocation2 + $0x109] sm:$0xff] }
 0x4c2   : > { %9692 = vmatprep.mubr.f32.mxu1 %v12809_v59  ;;  %v7461_v59 = vld [vmem:[%s13998_s3 + $0x438] sm:$0xff] }
 0x4c5   : > { %9693 = vmatmul.mubr.f32.vlgmr.msra.gmra.mrb[0].mxu1 %v12812_v10  ;;  %v10376_v10 = vpack.c.bf16 %v7461_v59, %v7460_v34  ;;  %v5618_v34 = vld [vmem:[#allocation2 + $0x189] sm:$0xff]  ;;  %v5619_v59 = vld [vmem:[#allocation2 + $0x191] sm:$0xff] }
 0x4c6   : > { %9695 = vmatprep.mubr.f32.mxu1 %v5294_v5  ;;  %10367 = vmatpush3.bf16.msra.mxu1 %v10364_v23  ;;  %v5604_v23 = vld [vmem:[#allocation2 + $0xa9] sm:$0xff] }
 0x4c7   : > { %10369 = vmatprep.subr.bf16.mxu1 %v10368_v50  ;;  %v5616_v5 = vld [vmem:[#allocation2 + $0x169] sm:$0xff] }
 0x4c9   : > { %9696 = vmatmul.mubr.f32.gmra.mrb[2].mxu1 %v12822_v16  ;;  %v10380_v16 = vpack.c.bf16 %v7463_v14, %v7462_v28  ;;  %v5623_v28 = vld [vmem:[#allocation2 + $0x1d1] sm:$0xff]  ;;  %v5624_v14 = vld [vmem:[#allocation2 + $0x1e9] sm:$0xff] }
 0x4ca   : > { %9698 = vmatprep.mubr.f32.mxu1 %v5296_v2  ;;  %10371 = vmatpush3.bf16.msra.mxu1 %v10368_v50  ;;  %v5613_v50 = vld [vmem:[#allocation2 + $0x131] sm:$0xff]  ;;  %v5620_v2 = vld [vmem:[#allocation2 + $0x1a9] sm:$0xff] }
 0x4cb   : > { %10373 = vmatprep.subr.bf16.mxu1 %v10372_v6 }
 0x4cd   : > { %9699 = vmatmul.mubr.f32.gmra.mrb[4].mxu1 %v5297_v4  ;;  %v5622_v4 = vld [vmem:[#allocation2 + $0x1c9] sm:$0xff] }
 0x4ce   : > { %9701 = vmatprep.mubr.f32.mxu1 %v5298_v33  ;;  %10375 = vmatpush3.bf16.msra.mxu1 %v10372_v6  ;;  %v5617_v6 = vld [vmem:[#allocation2 + $0x171] sm:$0xff] }
 0x4cf   : > { %10377 = vmatprep.subr.bf16.mxu1 %v10376_v10  ;;  %v5625_v33 = vld [vmem:[#allocation2 + $0x1f1] sm:$0xff] }
 0x4d1   : > { %9702 = vmatmul.mubr.f32.gmra.mrb[6].mxu1 %v5299_v8  ;;  %v5629_v8 = vld [vmem:[#allocation2 + $0x231] sm:$0xff] }
 0x4d2   : > { %9704 = vmatprep.mubr.f32.mxu1 %v5300_v25  ;;  %10379 = vmatpush3.bf16.msra.mxu1 %v10376_v10  ;;  %v5621_v10 = vld [vmem:[#allocation2 + $0x1b1] sm:$0xff] }
 0x4d3   : > { %10381 = vmatprep.subr.bf16.mxu1 %v10380_v16  ;;  %v5976_v25 = vld [vmem:[#allocation3 + $0xf] sm:$0xff] }
 0x4d5   : > { %9705 = vmatmul.mubr.f32.gmra.mrb[8].mxu1 %v5301_v58  ;;  %v6013_v58 = vmul.f32 %v13097_v43, %v5976_v25 }
 0x4d6   : > { %9707 = vmatprep.mubr.f32.mxu1 %v5302_v0  ;;  %10383 = vmatpush3.bf16.msra.mxu1 %v10380_v16  ;;  %v5628_v16 = vld [vmem:[#allocation2 + $0x229] sm:$0xff]  ;;  %v13116_v0 = vld [vmem:[%s14000_s5 + $0x2] ss:$0 sm:$0xff] }
 0x4d7   : > { %10385 = vmatprep.subr.bf16.mxu1 %v10384_v52 }
 0x4d9   : > { %9708 = vmatmul.mubr.f32.gmra.mrb[10].mxu1 %v5303_v29  ;;  %v6146_v29 = vld [vmem:[#allocation3 + $0x11] sm:$0xff] }
 0x4da   : > { %9710 = vmatprep.mubr.f32.mxu1 %v5304_v35  ;;  %10387 = vmatpush3.bf16.msra.mxu1 %v10384_v52  ;;  %v13102_v52 = vld [vmem:[%s13999_s4] ss:$0 sm:$0xff] }
 0x4db   : > { %10389 = vmatprep.subr.bf16.mxu1 %v10388_v24 }
 0x4dd   : > { %9711 = vmatmul.mubr.f32.gmra.mrb[12].mxu1 %v5305_v26 }
 0x4de   : > { %9713 = vmatprep.mubr.f32.mxu1 %v5306_v38  ;;  %10391 = vmatpush3.bf16.msra.mxu1 %v10388_v24  ;;  %v6145_v24 = vld [vmem:[#allocation3 + $0x9] sm:$0xff] }
 0x4df   : > { %10393 = vmatprep.subr.bf16.mxu1 %v10392_v44  ;;  %v6182_v38 = vmul.f32 %v13116_v0, %v6145_v24 }
 0x4e1   : > { %9714 = vmatmul.mubr.f32.gmra.mrb[14].mxu1 %v5307_v27  ;;  %v6183_v27 = vmul.f32 %v13116_v0, %v6146_v29 }
 0x4e2   : > { %9716 = vmatprep.mubr.f32.mxu1 %v5308_v49  ;;  %10395 = vmatpush3.bf16.msra.mxu1 %v10392_v44 }
 0x4e5   : > { %9717 = vmatmul.mubr.f32.gmra.mrb[16].mxu1 %v5309_v63 }
 0x4e6   : > { %9719 = vmatprep.mubr.f32.mxu1 %v5310_v40 }
 0x4e9   : > { %9720 = vmatmul.mubr.f32.gmra.mrb[18].mxu1 %v5311_v21  ;;  %v13126_v21 = vld [vmem:[%s14000_s5 + $0x4] ss:$0 sm:$0xff] }
 0x4ea   : > { %9722 = vmatprep.mubr.f32.mxu1 %v5312_v17 }
 0x4ed   : > { %9723 = vmatmul.mubr.f32.gmra.mrb[20].mxu1 %v5313_v36  ;;  %v13132_v36 = vld [vmem:[%s14000_s5 + $0x7] ss:$0 sm:$0xff] }
 0x4ee   : > { %9725 = vmatprep.mubr.f32.mxu1 %v5314_v46 }
 0x4f1   : > { %9726 = vmatmul.mubr.f32.gmra.mrb[22].mxu1 %v5315_v56 }
 0x4f2   : > { %9728 = vmatprep.mubr.f32.mxu1 %v5316_v45 }
 0x4f5   : > { %9729 = vmatmul.mubr.f32.gmra.mrb[24].mxu1 %v5317_v22  ;;  %v13137_v22 = vld [vmem:[%s14000_s5 + $0x5] ss:$0 sm:$0xff] }
 0x4f6   : > { %9731 = vmatprep.mubr.f32.mxu1 %v5318_v60 }
 0x4f9   : > { %9732 = vmatmul.mubr.f32.gmra.mrb[26].mxu1 %v5319_v55 }
 0x4fa   : > { %9734 = vmatprep.mubr.f32.mxu1 %v5320_v42 }
 0x4fd   : > { %9735 = vmatmul.mubr.f32.gmra.mrb[28].mxu1 %v5321_v11 }
 0x4fe   : > { %9737 = vmatprep.mubr.f32.mxu1 %v13088_v37 }
 0x501   : > { %9738 = vmatmul.mubr.f32.gmra.mrb[30].mxu1 %v13088_v37 }
 0x502   : > { %9772 = vmatprep.mubr.f32.mxu1 %v5598_v3 }
 0x505   : > { %9773 = vmatmul.mubr.f32.vlgmr.msra.gmra.mrb[0].mxu1 %v5599_v30  ;;  %v13149_v30 = vld [vmem:[%s14000_s5 + $0x3] ss:$0 sm:$0xff] }
 0x506   : > { %9775 = vmatprep.mubr.f32.mxu1 %v5600_v51 }
 0x509   : > { %9776 = vmatmul.mubr.f32.gmra.mrb[2].mxu1 %v5601_v39 }
 0x50a   : > { %9778 = vmatprep.mubr.f32.mxu1 %v5602_v62 }
 0x50d   : > { %9779 = vmatmul.mubr.f32.gmra.mrb[4].mxu1 %v5603_v61 }
 0x50e   : > { %9781 = vmatprep.mubr.f32.mxu1 %v5604_v23 }
 0x511   : > { %9782 = vmatmul.mubr.f32.gmra.mrb[6].mxu1 %v5605_v9 }
 0x512   : > { %9784 = vmatprep.mubr.f32.mxu1 %v5606_v13 }
 0x515   : > { %9785 = vmatmul.mubr.f32.gmra.mrb[8].mxu1 %v5607_v31 }
 0x516   : > { %9787 = vmatprep.mubr.f32.mxu1 %v5608_v20 }
 0x519   : > { %9788 = vmatmul.mubr.f32.gmra.mrb[10].mxu1 %v5609_v57 }
 0x51a   : > { %9790 = vmatprep.mubr.f32.mxu1 %v5610_v12 }
 0x51d   : > { %9791 = vmatmul.mubr.f32.gmra.mrb[12].mxu1 %v5611_v41 }
 0x51e   : > { %9793 = vmatprep.mubr.f32.mxu1 %v5612_v53 }
 0x521   : > { %9794 = vmatmul.mubr.f32.gmra.mrb[14].mxu1 %v5613_v50 }
 0x522   : > { %9796 = vmatprep.mubr.f32.mxu1 %v5614_v18 }
 0x525   : > { %9797 = vmatmul.mubr.f32.gmra.mrb[16].mxu1 %v5615_v1 }
 0x526   : > { %9799 = vmatprep.mubr.f32.mxu1 %v5616_v5  ;;  %v13187_v5 = vld [vmem:[%s14000_s5 + $0x8] ss:$0 sm:$0xff] }
 0x529   : > { %9800 = vmatmul.mubr.f32.gmra.mrb[18].mxu1 %v5617_v6 }
 0x52a   : > { %9802 = vmatprep.mubr.f32.mxu1 %v5618_v34 }
 0x52d   : > { %9803 = vmatmul.mubr.f32.gmra.mrb[20].mxu1 %v5619_v59 }
 0x52e   : > { %9805 = vmatprep.mubr.f32.mxu1 %v5620_v2 }
 0x531   : > { %9806 = vmatmul.mubr.f32.gmra.mrb[22].mxu1 %v5621_v10 }
 0x532   : > { %9808 = vmatprep.mubr.f32.mxu1 %v5622_v4 }
 0x535   : > { %9809 = vmatmul.mubr.f32.gmra.mrb[24].mxu1 %v5623_v28  ;;  %v13199_v28 = vld [vmem:[%s14000_s5 + $0x6] ss:$0 sm:$0xff] }
 0x536   : > { %9811 = vmatprep.mubr.f32.mxu1 %v5624_v14 }
 0x539   : > { %9812 = vmatmul.mubr.f32.gmra.mrb[26].mxu1 %v5625_v33 }
 0x53a   : > { %9814 = vmatprep.mubr.f32.mxu1 %v12959_v48  ;;  %v13107_v48 = vld [vmem:[%s14000_s5 + $0x1] ss:$0 sm:$0xff] }
 0x53b   : > { %v6081_v15 = vmul.f32 %v13088_v37, %v13107_v48 }
 0x53d   : > { %9815 = vmatmul.mubr.f32.gmra.mrb[28].mxu1 %v12962_v47  ;;  %v6012_v47 = vmul.f32 %v13097_v43, %v5975_v54  ;;  %v6114_v26 = vadd.f32 %v6081_v15, %v6013_v58 }
 0x53e   : > { %9817 = vmatprep.mubr.f32.mxu1 %v5628_v16 }
 0x53f   : > { %v6113_v44 = vadd.f32 %v6081_v15, %v6012_v47  ;;  %v6215_v56 = vadd.f32 %v6183_v27, %v6114_v26 }
 0x541   : > { %9818 = vmatmul.mubr.f32.gmra.mrb[30].mxu1 %v5629_v8  ;;  %v6214_v46 = vadd.f32 %v6182_v38, %v6113_v44 }
 0x5d8   : > { %v9774_v19 = vpop.f32.mrb[0].mxu1 }
 0x5d9   : > { %v5911_v32 = vadd.f32 %v9774_v19, %v13102_v52  ;;  %v5713_v7 = vpop.f32.mrb[1].mxu1 }
 0x5da   : > { %v5910_v35 = vadd.f32 %v13102_v52, %v5713_v7 }
 0x5db   : > { %5944 = vst [vmem:[#allocation3 + $0x30] sm:$0xff] %v5911_v32  ;;  %v6385_v55 = vmul.f32 %v13126_v21, %v5911_v32  ;;  %v6084_v11 = vmul.f32 %v13107_v48, %v5911_v32 }
 0x5dc   : > { %5943 = vst [vmem:[#allocation3 + $0x28] sm:$0xff] %v5910_v35  ;;  %v9777_v49 = vpop.f32.mrb[2].mxu1  ;;  %v6384_v60 = vmul.f32 %v13126_v21, %v5910_v35  ;;  %v6083_v42 = vmul.f32 %v13107_v48, %v5910_v35 }
 0x5dd   : > { %v5913_v63 = vadd.f32 %v9777_v49, %v13102_v52  ;;  %v5723_v40 = vpop.f32.mrb[3].mxu1 }
 0x5de   : > { %v5912_v17 = vadd.f32 %v13102_v52, %v5723_v40 }
 0x5df   : > { %5946 = vst [vmem:[#allocation3 + $0x50] sm:$0xff] %v5913_v63  ;;  %v13152_v51 = vmul.f32 %v13132_v36, %v5913_v63  ;;  %v13155_v39 = vmul.f32 %v13126_v21, %v5913_v63  ;;  %v13158_v62 = vmul.f32 %v13107_v48, %v5913_v63 }
 0x5e0   : > { %5945 = vst [vmem:[#allocation3 + $0x48] sm:$0xff] %v5912_v17  ;;  %v9780_v45 = vpop.f32.mrb[4].mxu1  ;;  %v13164_v9 = vmul.f32 %v13132_v36, %v5912_v17  ;;  %v13167_v13 = vmul.f32 %v13126_v21, %v5912_v17  ;;  %v13170_v31 = vmul.f32 %v13107_v48, %v5912_v17 }
 0x5e1   : > { %v13144_v37 = vadd.f32 %v9780_v45, %v13102_v52  ;;  %v5733_v3 = vpop.f32.mrb[5].mxu1 }
 0x5e2   : > { %v13161_v61 = vadd.f32 %v13102_v52, %v5733_v3  ;;  %v6449_v23 = vld [vmem:[#allocation3 + $0x31] sm:$0xff] }
 0x5e3   : > { %5948 = vst [vmem:[#allocation3 + $0x70] sm:$0xff] %v13144_v37  ;;  %v6246_v20 = vld [vmem:[#allocation3 + $0x27] sm:$0xff]  ;;  %v6247_v57 = vld [vmem:[#allocation3 + $0x2f] sm:$0xff]  ;;  %v6486_v41 = vmul.f32 %v13137_v22, %v6449_v23  ;;  %v6185_v53 = vmul.f32 %v13116_v0, %v6449_v23  ;;  %v13177_v50 = vmul.f32 %v13132_v36, %v13144_v37  ;;  %v13181_v18 = vmul.f32 %v13126_v21, %v13144_v37 }
 0x5e4   : > { %v6448_v12 = vld [vmem:[#allocation3 + $0x29] sm:$0xff]  ;;  %5947 = vst [vmem:[#allocation3 + $0x68] sm:$0xff] %v13161_v61  ;;  %v9783_v1 = vpop.f32.mrb[6].mxu1  ;;  %v6283_v6 = vmul.f32 %v13149_v30, %v6246_v20  ;;  %v6284_v34 = vmul.f32 %v13149_v30, %v6247_v57  ;;  %v6014_v2 = vmul.f32 %v13097_v43, %v6246_v20  ;;  %v6015_v14 = vmul.f32 %v13097_v43, %v6247_v57 }
 0x5e5   : > { %v6485_v59 = vmul.f32 %v13137_v22, %v6448_v12  ;;  %v13194_v10 = vadd.f32 %v9783_v1, %v13102_v52  ;;  %v5743_v4 = vpop.f32.mrb[7].mxu1  ;;  %v6184_v33 = vmul.f32 %v13116_v0, %v6448_v12  ;;  %v13205_v16 = vmul.f32 %v13132_v36, %v13161_v61 }
 0x5e6   : > { %v13208_v8 = vadd.f32 %v13102_v52, %v5743_v4  ;;  %v6315_v54 = vadd.f32 %v6283_v6, %v6214_v46  ;;  %v6316_v25 = vadd.f32 %v6284_v34, %v6215_v56  ;;  %v6753_v47 = vld [vmem:[#allocation3 + $0x51] sm:$0xff]  ;;  %v6115_v58 = vadd.f32 %v6083_v42, %v6014_v2 }
 0x5e7   : > { %14215 = vst [vmem:[#allocation6_spill] sm:$0xff] %v13194_v10  ;;  %5950 = vst [vmem:[#allocation3 + $0x90] sm:$0xff] %v13194_v10  ;;  %v6550_v15 = vld [vmem:[#allocation3 + $0x47] sm:$0xff]  ;;  %v6551_v19 = vld [vmem:[#allocation3 + $0x4f] sm:$0xff]  ;;  %v6790_v29 = vmul.f32 %v13187_v5, %v6753_v47  ;;  %v6116_v32 = vadd.f32 %v6084_v11, %v6015_v14  ;;  %v6488_v7 = vmul.f32 %v13137_v22, %v6753_v47 }
 0x5e8   : > { %14216 = vst [vmem:[#allocation5_spill] sm:$0xff] %v13208_v8  ;;  %v6752_v24 = vld [vmem:[#allocation3 + $0x49] sm:$0xff]  ;;  %v13214_v35 = vmul.f32 %v13116_v0, %v6753_v47  ;;  %5949 = vst [vmem:[#allocation3 + $0x88] sm:$0xff] %v13208_v8  ;;  %v9786_v44 = vpop.f32.mrb[8].mxu1  ;;  %v6416_v26 = vadd.f32 %v6384_v60, %v6315_v54  ;;  %v6417_v38 = vadd.f32 %v6385_v55, %v6316_v25 }
 0x5e9   : > { %v6587_v27 = vmul.f32 %v13199_v28, %v6550_v15  ;;  %v6588_v49 = vmul.f32 %v13199_v28, %v6551_v19  ;;  %v13220_v63 = vadd.f32 %v9786_v44, %v13102_v52  ;;  %v5753_v40 = vpop.f32.mrb[9].mxu1  ;;  %v6789_v17 = vmul.f32 %v13187_v5, %v6752_v24 }
 0x5ea   : > { %v6216_v46 = vadd.f32 %v6184_v33, %v6115_v58  ;;  %v6217_v56 = vadd.f32 %v6185_v53, %v6116_v32  ;;  %v13224_v45 = vadd.f32 %v13102_v52, %v5753_v40  ;;  %v6517_v42 = vadd.f32 %v6485_v59, %v6416_v26  ;;  %v13227_v55 = vld [vmem:[#allocation3 + $0x71] sm:$0xff] }
 0x5eb   : > { %14217 = vst [vmem:[#allocation8_spill] sm:$0xff] %v13220_v63  ;;  %v6518_v11 = vadd.f32 %v6486_v41, %v6417_v38  ;;  %v6285_v60 = vmul.f32 %v13149_v30, %v6550_v15  ;;  %5952 = vst [vmem:[#allocation3 + $0xb0] sm:$0xff] %v13220_v63  ;;  %v6286_v3 = vmul.f32 %v13149_v30, %v6551_v19  ;;  %v13232_v20 = vld [vmem:[#allocation3 + $0x67] sm:$0xff]  ;;  %v13234_v57 = vld [vmem:[#allocation3 + $0x6f] sm:$0xff] }
 0x5ec   : > { %14218 = vst [vmem:[#allocation7_spill] sm:$0xff] %v13224_v45  ;;  %v6487_v23 = vmul.f32 %v13137_v22, %v6752_v24  ;;  %v13236_v12 = vld [vmem:[#allocation3 + $0x69] sm:$0xff]  ;;  %v13240_v53 = vmul.f32 %v13187_v5, %v13227_v55  ;;  %v6016_v41 = vmul.f32 %v13097_v43, %v6550_v15  ;;  %5951 = vst [vmem:[#allocation3 + $0xa8] sm:$0xff] %v13224_v45  ;;  %v9789_v1 = vpop.f32.mrb[10].mxu1 }
 0x5ed   : > { %v6619_v6 = vadd.f32 %v6587_v27, %v6517_v42  ;;  %v6620_v34 = vadd.f32 %v6588_v49, %v6518_v11  ;;  %v6317_v59 = vadd.f32 %v6285_v60, %v6216_v46  ;;  %v6589_v2 = vmul.f32 %v13199_v28, %v13232_v20  ;;  %v5763_v14 = vpop.f32.mrb[11].mxu1 }
 0x5ee   : > { %v5921_v4 = vadd.f32 %v9789_v1, %v13102_v52  ;;  %v6318_v33 = vadd.f32 %v6286_v3, %v6217_v56  ;;  %v6590_v54 = vmul.f32 %v13199_v28, %v13234_v57  ;;  %v6791_v25 = vmul.f32 %v13187_v5, %v13236_v12 }
 0x5ef   : > { %v5920_v47 = vadd.f32 %v13102_v52, %v5763_v14  ;;  %v6720_v58 = vadd.f32 %v13164_v9, %v6619_v6  ;;  %v6721_v15 = vadd.f32 %v13152_v51, %v6620_v34  ;;  %v6418_v32 = vadd.f32 %v13167_v13, %v6317_v59 }
 0x5f0   : > { %5954 = vst [vmem:[#allocation3 + $0xd0] sm:$0xff] %v5921_v4  ;;  %v6419_v44 = vadd.f32 %v13155_v39, %v6318_v33  ;;  %v6017_v26 = vmul.f32 %v13097_v43, %v6551_v19  ;;  %v6117_v38 = vadd.f32 %v13170_v31, %v6016_v41  ;;  %v6186_v27 = vmul.f32 %v13116_v0, %v6752_v24  ;;  %v9792_v49 = vpop.f32.mrb[12].mxu1  ;;  %v13267_v31 = vld [vmem:[#allocation3 + $0x87] sm:$0xff] }
 0x5f1   : > { %5953 = vst [vmem:[#allocation3 + $0xc8] sm:$0xff] %v5920_v47  ;;  %v13259_v40 = vadd.f32 %v6789_v17, %v6720_v58  ;;  %v13261_v46 = vadd.f32 %v6790_v29, %v6721_v15  ;;  %v6519_v9 = vadd.f32 %v6487_v23, %v6418_v32  ;;  %v6287_v51 = vmul.f32 %v13149_v30, %v13232_v20  ;;  %v5773_v56 = vpop.f32.mrb[13].mxu1  ;;  %v13290_v47 = vld [vmem:[#allocation3 + $0x91] sm:$0xff] }
 0x5f2   : > { %v5923_v13 = vadd.f32 %v9792_v49, %v13102_v52  ;;  %v6520_v39 = vadd.f32 %v6488_v7, %v6419_v44  ;;  %v6118_v19 = vadd.f32 %v13158_v62, %v6017_v26  ;;  %v6218_v42 = vadd.f32 %v6186_v27, %v6117_v38  ;;  %14219 = vst [vmem:[#allocation11_spill] sm:$0xff] %v13267_v31  ;;  %v13277_v7 = vld [vmem:[#allocation3 + $0x8f] sm:$0xff] }
 0x5f3   : > { %v5922_v24 = vadd.f32 %v13102_v52, %v5773_v56  ;;  %v6621_v29 = vadd.f32 %v6589_v2, %v6519_v9  ;;  %v6288_v11 = vmul.f32 %v13149_v30, %v13234_v57  ;;  %v6388_v62 = vmul.f32 %v13126_v21, %v13161_v61  ;;  %14220 = vst [vmem:[#allocation12_spill] sm:$0xff] %v13277_v7 }
 0x5f4   : > { %5956 = vst [vmem:[#allocation3 + $0xf0] sm:$0xff] %v5923_v13  ;;  %v6622_v60 = vadd.f32 %v6590_v54, %v6520_v39  ;;  %v6219_v3 = vadd.f32 %v13214_v35, %v6118_v19  ;;  %v6319_v23 = vadd.f32 %v6287_v51, %v6218_v42  ;;  %v9795_v41 = vpop.f32.mrb[14].mxu1  ;;  %v6489_v6 = vmul.f32 %v13137_v22, %v13236_v12  ;;  %v13288_v54 = vld [vmem:[#allocation3 + $0x89] sm:$0xff] }
 0x5f5   : > { %5955 = vst [vmem:[#allocation3 + $0xe8] sm:$0xff] %v5922_v24  ;;  %v6722_v1 = vadd.f32 %v13205_v16, %v6621_v29  ;;  %v6490_v34 = vmul.f32 %v13137_v22, %v13227_v55  ;;  %v6591_v59 = vmul.f32 %v13199_v28, %v13267_v31  ;;  %v5925_v35 = vadd.f32 %v9795_v41, %v13102_v52  ;;  %v5783_v2 = vpop.f32.mrb[15].mxu1 }
 0x5f6   : > { %v6723_v4 = vadd.f32 %v13177_v50, %v6622_v60  ;;  %v6320_v14 = vadd.f32 %v6288_v11, %v6219_v3  ;;  %v6420_v33 = vadd.f32 %v6388_v62, %v6319_v23  ;;  %14221 = vst [vmem:[#allocation13_spill] sm:$0xff] %v13288_v54  ;;  %14222 = vst [vmem:[#allocation14_spill] sm:$0xff] %v13290_v47 }
 0x5f7   : > { %v5924_v16 = vadd.f32 %v13102_v52, %v5783_v2  ;;  %v13293_v58 = vadd.f32 %v6791_v25, %v6722_v1  ;;  %v6592_v15 = vmul.f32 %v13199_v28, %v13277_v7  ;;  %v6692_v32 = vmul.f32 %v13132_v36, %v13208_v8  ;;  %5958 = vst [vmem:[#allocation3 + $0x110] sm:$0xff] %v5925_v35 }
 0x5f8   : > { %v6098_v44 = vmul.f32 %v13107_v48, %v5925_v35  ;;  %v13301_v50 = vadd.f32 %v13240_v53, %v6723_v4  ;;  %v6421_v26 = vadd.f32 %v13181_v18, %v6320_v14  ;;  %v6521_v38 = vadd.f32 %v6489_v6, %v6420_v33  ;;  %v9798_v27 = vpop.f32.mrb[16].mxu1 }
 0x5f9   : > { %5957 = vst [vmem:[#allocation3 + $0x108] sm:$0xff] %v5924_v16  ;;  %v6097_v25 = vmul.f32 %v13107_v48, %v5924_v16  ;;  %v6693_v49 = vmul.f32 %v13132_v36, %v13194_v10  ;;  %v6793_v9 = vmul.f32 %v13187_v5, %v13288_v54  ;;  %v6794_v51 = vmul.f32 %v13187_v5, %v13290_v47  ;;  %v5793_v53 = vpop.f32.mrb[17].mxu1 }
 0x5fa   : > { %v5927_v13 = vadd.f32 %v9798_v27, %v13102_v52  ;;  %v6522_v56 = vadd.f32 %v6490_v34, %v6421_v26  ;;  %v6623_v39 = vadd.f32 %v6591_v59, %v6521_v38  ;;  %v5926_v19 = vadd.f32 %v13102_v52, %v5793_v53 }
 0x5fb   : > { %v6018_v42 = vmul.f32 %v13097_v43, %v13232_v20  ;;  %v6019_v24 = vmul.f32 %v13097_v43, %v13234_v57  ;;  %v6087_v29 = vmul.f32 %v13107_v48, %v13161_v61  ;;  %v6088_v61 = vmul.f32 %v13107_v48, %v13144_v37 }
 0x5fc   : > { %5960 = vst [vmem:[#allocation3 + $0x130] sm:$0xff] %v5927_v13  ;;  %v13322_v11 = vmul.f32 %v13126_v21, %v5927_v13  ;;  %v13325_v60 = vmul.f32 %v13107_v48, %v5927_v13  ;;  %v6624_v3 = vadd.f32 %v6592_v15, %v6522_v56  ;;  %v6724_v23 = vadd.f32 %v6692_v32, %v6623_v39  ;;  %v9801_v62 = vpop.f32.mrb[18].mxu1 }
 0x5fd   : > { %5959 = vst [vmem:[#allocation3 + $0x128] sm:$0xff] %v5926_v19  ;;  %v13328_v41 = vmul.f32 %v13126_v21, %v5926_v19  ;;  %v13331_v20 = vmul.f32 %v13107_v48, %v5926_v19  ;;  %v6119_v57 = vadd.f32 %v6087_v29, %v6018_v42  ;;  %v5929_v1 = vadd.f32 %v9801_v62, %v13102_v52  ;;  %v5803_v6 = vpop.f32.mrb[19].mxu1 }
 0x5fe   : > { %v6725_v34 = vadd.f32 %v6693_v49, %v6624_v3  ;;  %v13336_v59 = vadd.f32 %v6793_v9, %v6724_v23  ;;  %v6188_v35 = vmul.f32 %v13116_v0, %v13236_v12  ;;  %v5928_v2 = vadd.f32 %v13102_v52, %v5803_v6  ;;  %v6162_v4 = vld [vmem:[#allocation3 + $0x111] sm:$0xff] }
 0x5ff   : > { %v13341_v14 = vadd.f32 %v6088_v61, %v6019_v24  ;;  %v13345_v33 = vmul.f32 %v13116_v0, %v13227_v55  ;;  %v13349_v37 = vmul.f32 %v13149_v30, %v13267_v31  ;;  %5962 = vst [vmem:[#allocation3 + $0x150] sm:$0xff] %v5929_v1  ;;  %v6199_v26 = vmul.f32 %v13116_v0, %v6162_v4 }
 0x600   : > { %v5991_v16 = vld [vmem:[#allocation3 + $0x107] sm:$0xff]  ;;  %v5992_v15 = vld [vmem:[#allocation3 + $0x10f] sm:$0xff]  ;;  %v13353_v12 = vmul.f32 %v13132_v36, %v5929_v1  ;;  %v13356_v38 = vmul.f32 %v13126_v21, %v5929_v1  ;;  %v13359_v27 = vmul.f32 %v13107_v48, %v5929_v1  ;;  %5961 = vst [vmem:[#allocation3 + $0x148] sm:$0xff] %v5928_v2  ;;  %v9804_v55 = vpop.f32.mrb[20].mxu1  ;;  %v13365_v53 = vmul.f32 %v13132_v36, %v5928_v2 }
 0x601   : > { %14223 = vst [vmem:[#allocation15_spill] sm:$0xff] %v13345_v33  ;;  %14224 = vst [vmem:[#allocation16_spill] sm:$0xff] %v13349_v37  ;;  %v6161_v32 = vld [vmem:[#allocation3 + $0x109] sm:$0xff]  ;;  %v6028_v49 = vmul.f32 %v13097_v43, %v5991_v16  ;;  %v6029_v9 = vmul.f32 %v13097_v43, %v5992_v15  ;;  %v13368_v56 = vadd.f32 %v9804_v55, %v13102_v52  ;;  %v5813_v39 = vpop.f32.mrb[21].mxu1 }
 0x602   : > { %v6198_v13 = vmul.f32 %v13116_v0, %v6161_v32  ;;  %v13371_v19 = vmul.f32 %v13126_v21, %v5928_v2  ;;  %v13374_v42 = vmul.f32 %v13107_v48, %v5928_v2  ;;  %v13376_v24 = vadd.f32 %v6794_v51, %v6725_v34 }
 0x603   : > { %v13379_v29 = vadd.f32 %v13102_v52, %v5813_v39  ;;  %v6129_v3 = vadd.f32 %v6097_v25, %v6028_v49  ;;  %v6130_v23 = vadd.f32 %v6098_v44, %v6029_v9  ;;  %v6465_v62 = vld [vmem:[#allocation3 + $0x131] sm:$0xff]  ;;  %v13381_v61 = vadd.f32 %v6188_v35, %v6119_v57  ;;  %5964 = vst [vmem:[#allocation3 + $0x170] sm:$0xff] %v13368_v56 }
 0x604   : > { %v6262_v1 = vld [vmem:[#allocation3 + $0x127] sm:$0xff]  ;;  %v6263_v6 = vld [vmem:[#allocation3 + $0x12f] sm:$0xff]  ;;  %v6502_v16 = vmul.f32 %v13137_v22, %v6465_v62  ;;  %v6201_v2 = vmul.f32 %v13116_v0, %v6465_v62  ;;  %v13388_v51 = vmul.f32 %v13132_v36, %v13368_v56  ;;  %v13392_v25 = vmul.f32 %v13126_v21, %v13368_v56  ;;  %v9807_v44 = vpop.f32.mrb[22].mxu1 }
 0x605   : > { %14225 = vst [vmem:[#allocation17_spill] sm:$0xff] %v13381_v61  ;;  %v6464_v4 = vld [vmem:[#allocation3 + $0x129] sm:$0xff]  ;;  %5963 = vst [vmem:[#allocation3 + $0x168] sm:$0xff] %v13379_v29  ;;  %v6230_v57 = vadd.f32 %v6198_v13, %v6129_v3  ;;  %v6231_v34 = vadd.f32 %v6199_v26, %v6130_v23  ;;  %v6299_v35 = vmul.f32 %v13149_v30, %v6262_v1  ;;  %v5823_v55 = vpop.f32.mrb[23].mxu1 }
 0x606   : > { %v6300_v15 = vmul.f32 %v13149_v30, %v6263_v6  ;;  %v13398_v32 = vadd.f32 %v9807_v44, %v13102_v52  ;;  %v6501_v49 = vmul.f32 %v13137_v22, %v6464_v4  ;;  %v6030_v9 = vmul.f32 %v13097_v43, %v6262_v1  ;;  %v6769_v26 = vld [vmem:[#allocation3 + $0x151] sm:$0xff] }
 0x607   : > { %v6031_v39 = vmul.f32 %v13097_v43, %v6263_v6  ;;  %v13404_v62 = vadd.f32 %v13102_v52, %v5823_v55  ;;  %v6331_v18 = vadd.f32 %v6299_v35, %v6230_v57  ;;  %v6200_v3 = vmul.f32 %v13116_v0, %v6464_v4  ;;  %v6566_v23 = vld [vmem:[#allocation3 + $0x147] sm:$0xff]  ;;  %v6567_v44 = vld [vmem:[#allocation3 + $0x14f] sm:$0xff] }
 0x608   : > { %v6332_v13 = vadd.f32 %v6300_v15, %v6231_v34  ;;  %5966 = vst [vmem:[#allocation3 + $0x190] sm:$0xff] %v13398_v32  ;;  %v6768_v17 = vld [vmem:[#allocation3 + $0x149] sm:$0xff]  ;;  %v6806_v31 = vmul.f32 %v13187_v5, %v6769_v26  ;;  %v6131_v63 = vadd.f32 %v13331_v20, %v6030_v9  ;;  %v6504_v6 = vmul.f32 %v13137_v22, %v6769_v26  ;;  %v9810_v57 = vpop.f32.mrb[24].mxu1 }
 0x609   : > { %v6132_v1 = vadd.f32 %v13325_v60, %v6031_v39  ;;  %5965 = vst [vmem:[#allocation3 + $0x188] sm:$0xff] %v13404_v62  ;;  %v6432_v34 = vadd.f32 %v13328_v41, %v6331_v18  ;;  %v6603_v35 = vmul.f32 %v13199_v28, %v6566_v23  ;;  %v6604_v15 = vmul.f32 %v13199_v28, %v6567_v44  ;;  %v5833_v45 = vpop.f32.mrb[25].mxu1 }
 0x60a   : > { %v6433_v4 = vadd.f32 %v13322_v11, %v6332_v13  ;;  %v13418_v55 = vadd.f32 %v9810_v57, %v13102_v52  ;;  %v6805_v20 = vmul.f32 %v13187_v5, %v6768_v17  ;;  %v6232_v60 = vadd.f32 %v6200_v3, %v6131_v63  ;;  %v13425_v11 = vld [vmem:[#allocation3 + $0x171] sm:$0xff] }
 0x60b   : > { %v6233_v9 = vadd.f32 %v6201_v2, %v6132_v1  ;;  %v13422_v39 = vadd.f32 %v13102_v52, %v5833_v45  ;;  %v6533_v47 = vadd.f32 %v6501_v49, %v6432_v34  ;;  %v6301_v18 = vmul.f32 %v13149_v30, %v6566_v23 }
 0x60c   : > { %v6534_v54 = vadd.f32 %v6502_v16, %v6433_v4  ;;  %5968 = vst [vmem:[#allocation3 + $0x1b0] sm:$0xff] %v13418_v55  ;;  %v6302_v41 = vmul.f32 %v13149_v30, %v6567_v44  ;;  %v6503_v13 = vmul.f32 %v13137_v22, %v6768_v17  ;;  %v13430_v57 = vld [vmem:[#allocation3 + $0x167] sm:$0xff]  ;;  %v13432_v10 = vld [vmem:[#allocation3 + $0x16f] sm:$0xff]  ;;  %v6706_v63 = vmul.f32 %v13132_v36, %v13379_v29  ;;  %v9813_v2 = vpop.f32.mrb[26].mxu1 }
 0x60d   : > { %v13436_v45 = vld [vmem:[#allocation3 + $0x169] sm:$0xff]  ;;  %v13440_v16 = vmul.f32 %v13187_v5, %v13425_v11  ;;  %5967 = vst [vmem:[#allocation3 + $0x1a8] sm:$0xff] %v13422_v39  ;;  %v6635_v49 = vadd.f32 %v6603_v35, %v6533_v47  ;;  %v6333_v1 = vadd.f32 %v6301_v18, %v6232_v60  ;;  %v6605_v34 = vmul.f32 %v13199_v28, %v13430_v57  ;;  %v5843_v8 = vpop.f32.mrb[27].mxu1 }
 0x60e   : > { %v6636_v3 = vadd.f32 %v6604_v15, %v6534_v54  ;;  %v13446_v4 = vadd.f32 %v9813_v2, %v13102_v52  ;;  %v6334_v37 = vadd.f32 %v6302_v41, %v6233_v9  ;;  %v6606_v61 = vmul.f32 %v13199_v28, %v13432_v10 }
 0x60f   : > { %v6807_v7 = vmul.f32 %v13187_v5, %v13436_v45  ;;  %v13453_v33 = vadd.f32 %v13102_v52, %v5843_v8  ;;  %v6736_v54 = vadd.f32 %v13365_v53, %v6635_v49  ;;  %v6434_v35 = vadd.f32 %v13371_v19, %v6333_v1 }
 0x610   : > { %v6737_v47 = vadd.f32 %v13353_v12, %v6636_v3  ;;  %5970 = vst [vmem:[#allocation3 + $0x1d0] sm:$0xff] %v13446_v4  ;;  %v6435_v15 = vadd.f32 %v13356_v38, %v6334_v37  ;;  %v6032_v60 = vmul.f32 %v13097_v43, %v6566_v23  ;;  %v6033_v9 = vmul.f32 %v13097_v43, %v6567_v44  ;;  %v9816_v8 = vpop.f32.mrb[28].mxu1 }
 0x611   : > { %v6202_v18 = vmul.f32 %v13116_v0, %v6768_v17  ;;  %5969 = vst [vmem:[#allocation3 + $0x1c8] sm:$0xff] %v13453_v33  ;;  %v6837_v41 = vadd.f32 %v6805_v20, %v6736_v54  ;;  %v6535_v53 = vadd.f32 %v6503_v13, %v6434_v35  ;;  %v6203_v12 = vmul.f32 %v13116_v0, %v6769_v26  ;;  %v5853_v49 = vpop.f32.mrb[29].mxu1  ;;  %v13473_v54 = vld [vmem:[#allocation3 + $0x187] sm:$0xff] }
 0x612   : > { %v6838_v2 = vadd.f32 %v6806_v31, %v6737_v47  ;;  %v5939_v19 = vadd.f32 %v9816_v8, %v13102_v52  ;;  %v6536_v3 = vadd.f32 %v6504_v6, %v6435_v15  ;;  %v6133_v37 = vadd.f32 %v13374_v42, %v6032_v60  ;;  %v13475_v6 = vld [vmem:[#allocation3 + $0x18f] sm:$0xff] }
 0x613   : > { %v6134_v38 = vadd.f32 %v13359_v27, %v6033_v9  ;;  %v5938_v23 = vadd.f32 %v13102_v52, %v5853_v49  ;;  %v6637_v17 = vadd.f32 %v6605_v34, %v6535_v53  ;;  %v6303_v1 = vmul.f32 %v13149_v30, %v13430_v57  ;;  %v13488_v8 = vld [vmem:[#allocation3 + $0x189] sm:$0xff] }
 0x614   : > { %v10396_v44 = vpack.c.bf16 %v6838_v2, %v6837_v41  ;;  %5972 = vst [vmem:[#allocation3 + $0x1f0] sm:$0xff] %v5939_v19  ;;  %v6638_v31 = vadd.f32 %v6606_v61, %v6536_v3  ;;  %v6234_v20 = vadd.f32 %v6202_v18, %v6133_v37  ;;  %v6304_v26 = vmul.f32 %v13149_v30, %v13432_v10  ;;  %v9819_v27 = vpop.f32.mrb[30].mxu1  ;;  %v13490_v41 = vld [vmem:[#allocation3 + $0x191] sm:$0xff] }
 0x615   : > { %v6235_v13 = vadd.f32 %v6203_v12, %v6134_v38  ;;  %5971 = vst [vmem:[#allocation3 + $0x1e8] sm:$0xff] %v5938_v23  ;;  %v6738_v42 = vadd.f32 %v6706_v63, %v6637_v17  ;;  %v6404_v34 = vmul.f32 %v13126_v21, %v13379_v29  ;;  %v6505_v47 = vmul.f32 %v13137_v22, %v13436_v45  ;;  %v5863_v15 = vpop.f32.mrb[31].mxu1 }
 0x616   : > { %10397 = vmatprep.subr.bf16.mxu0 %v10396_v44  ;;  %v6506_v61 = vmul.f32 %v13137_v22, %v13425_v11  ;;  %v5941_v35 = vadd.f32 %v9819_v27, %v13102_v52  ;;  %v14226_v60 = vpack.c.bf16 %v13261_v46, %v13259_v40  ;;  %v6739_v9 = vadd.f32 %v13388_v51, %v6638_v31 }
 0x617   : > { %v6335_v18 = vadd.f32 %v6303_v1, %v6234_v20  ;;  %v6336_v63 = vadd.f32 %v6304_v26, %v6235_v13  ;;  %v5940_v2 = vadd.f32 %v13102_v52, %v5863_v15  ;;  %v6839_v53 = vadd.f32 %v6807_v7, %v6738_v42  ;;  %v13523_v13 = vld [vmem:[#allocation3 + $0x1a7] sm:$0xff] }
 0x618   : > { %10399 = vmatpush3.bf16.xpose.msra.mxu0 %v14226_v60  ;;  %v6607_v12 = vmul.f32 %v13199_v28, %v13473_v54  ;;  %v6608_v19 = vmul.f32 %v13199_v28, %v13475_v6  ;;  %5974 = vst [vmem:[#allocation3 + $0x210] sm:$0xff] %v5941_v35  ;;  %v6840_v40 = vadd.f32 %v13440_v16, %v6739_v9 }
 0x619   : > { %v6436_v46 = vadd.f32 %v6404_v34, %v6335_v18  ;;  %v6437_v51 = vadd.f32 %v13392_v25, %v6336_v63  ;;  %v6708_v49 = vmul.f32 %v13132_v36, %v13404_v62  ;;  %5973 = vst [vmem:[#allocation3 + $0x208] sm:$0xff] %v5940_v2  ;;  %v6709_v52 = vmul.f32 %v13132_v36, %v13398_v32 }
 0x61a   : > { %v6809_v7 = vmul.f32 %v13187_v5, %v13488_v8  ;;  %v6810_v3 = vmul.f32 %v13187_v5, %v13490_v41  ;;  %v10406_v37 = vpack.c.bf16 %v13376_v24, %v13336_v59  ;;  %v10400_v16 = vpack.c.bf16 %v6840_v40, %v6839_v53 }
 0x61b   : > { %v6537_v38 = vadd.f32 %v6505_v47, %v6436_v46  ;;  %v6538_v23 = vadd.f32 %v6506_v61, %v6437_v51  ;;  %v6034_v25 = vmul.f32 %v13097_v43, %v13430_v57  ;;  %v6035_v44 = vmul.f32 %v13097_v43, %v13432_v10  ;;  %v13538_v61 = vld [vmem:[#allocation3 + $0x1a9] sm:$0xff] }
 0x61c   : > { %v6103_v17 = vmul.f32 %v13107_v48, %v13379_v29  ;;  %v6104_v1 = vmul.f32 %v13107_v48, %v13368_v56  ;;  %v6204_v31 = vmul.f32 %v13116_v0, %v13436_v45  ;;  %10401 = vmatprep.subr.bf16.mxu0 %v10400_v16  ;;  %v6205_v20 = vmul.f32 %v13116_v0, %v13425_v11  ;;  %v13529_v45 = vld [vmem:[#allocation3 + $0x1af] sm:$0xff]  ;;  %v13560_v16 = vld [vmem:[#allocation3 + $0xa7] sm:$0xff] }
 0x61d   : > { %v6639_v59 = vadd.f32 %v6607_v12, %v6537_v38  ;;  %v6640_v24 = vadd.f32 %v6608_v19, %v6538_v23  ;;  %v6305_v57 = vmul.f32 %v13149_v30, %v13473_v54  ;;  %v6306_v29 = vmul.f32 %v13149_v30, %v13475_v6 }
 0x61e   : > { %v6135_v10 = vadd.f32 %v6103_v17, %v6034_v25  ;;  %v6136_v26 = vadd.f32 %v6104_v1, %v6035_v44  ;;  %v6406_v56 = vmul.f32 %v13126_v21, %v13404_v62  ;;  %v14227_v27 = vpack.c.bf16 %v13301_v50, %v13293_v58  ;;  %v13544_v58 = vld [vmem:[#allocation3 + $0x1b1] sm:$0xff]  ;;  %v14230_v25 = vld [vmem:[#allocation17_spill] sm:$0xff] }
 0x61f   : > { %v6740_v11 = vadd.f32 %v6708_v49, %v6639_v59  ;;  %v6741_v42 = vadd.f32 %v6709_v52, %v6640_v24  ;;  %v6407_v34 = vmul.f32 %v13126_v21, %v13398_v32  ;;  %v6507_v47 = vmul.f32 %v13137_v22, %v13488_v8  ;;  %v14228_v49 = vld [vmem:[#allocation15_spill] sm:$0xff]  ;;  %v14231_v44 = vld [vmem:[#allocation16_spill] sm:$0xff]  ;;  %v14232_v1 = vld [vmem:[#allocation5_spill] sm:$0xff] }
 0x620   : > { %10403 = vmatpush3.bf16.xpose.msra.mxu0 %v14227_v27  ;;  %v6236_v35 = vadd.f32 %v6204_v31, %v6135_v10  ;;  %v6237_v15 = vadd.f32 %v6205_v20, %v6136_v26  ;;  %v6508_v60 = vmul.f32 %v13137_v22, %v13490_v41  ;;  %v6609_v9 = vmul.f32 %v13199_v28, %v13523_v13  ;;  %v13566_v59 = vld [vmem:[#allocation3 + $0xaf] sm:$0xff] }
 0x621   : > { %v6841_v50 = vadd.f32 %v6809_v7, %v6740_v11  ;;  %v6842_v18 = vadd.f32 %v6810_v3, %v6741_v42  ;;  %v6610_v63 = vmul.f32 %v13199_v28, %v13529_v45  ;;  %v6710_v2 = vmul.f32 %v13132_v36, %v13422_v39  ;;  %v14229_v7 = vld [vmem:[#allocation12_spill] sm:$0xff]  ;;  %v14233_v20 = vld [vmem:[#allocation6_spill] sm:$0xff] }
 0x622   : > { %v6337_v53 = vadd.f32 %v6305_v57, %v6236_v35  ;;  %v6338_v12 = vadd.f32 %v6306_v29, %v6237_v15  ;;  %v6711_v19 = vmul.f32 %v13132_v36, %v13418_v55  ;;  %v6811_v40 = vmul.f32 %v13187_v5, %v13538_v61  ;;  %v14234_v57 = vld [vmem:[#allocation13_spill] sm:$0xff]  ;;  %v14235_v26 = vld [vmem:[#allocation14_spill] sm:$0xff]  ;;  %v13578_v35 = vld [vmem:[#allocation3 + $0xb1] sm:$0xff] }
 0x623   : > { %v10404_v46 = vpack.c.bf16 %v6842_v18, %v6841_v50  ;;  %v6812_v51 = vmul.f32 %v13187_v5, %v13544_v58  ;;  %v6221_v52 = vadd.f32 %v14228_v49, %v13341_v14  ;;  %v6290_v3 = vmul.f32 %v13149_v30, %v14229_v7  ;;  %v14236_v18 = vld [vmem:[#allocation7_spill] sm:$0xff] }
 0x624   : > { %v6438_v38 = vadd.f32 %v6406_v56, %v6337_v53  ;;  %v6439_v23 = vadd.f32 %v6407_v34, %v6338_v12  ;;  %v6321_v17 = vadd.f32 %v14231_v44, %v14230_v25  ;;  %v6390_v31 = vmul.f32 %v13126_v21, %v14232_v1  ;;  %v13574_v56 = vld [vmem:[#allocation3 + $0xa9] sm:$0xff]  ;;  %v14237_v12 = vld [vmem:[#allocation8_spill] sm:$0xff] }
 0x625   : > { %10405 = vmatprep.subr.bf16.mxu0 %v10404_v46  ;;  %v6322_v24 = vadd.f32 %v6290_v3, %v6221_v52  ;;  %v6391_v14 = vmul.f32 %v13126_v21, %v14233_v20  ;;  %v6491_v10 = vmul.f32 %v13137_v22, %v14234_v57  ;;  %v6492_v29 = vmul.f32 %v13137_v22, %v14235_v26 }
 0x626   : > { %v6539_v27 = vadd.f32 %v6507_v47, %v6438_v38  ;;  %v6540_v11 = vadd.f32 %v6508_v60, %v6439_v23  ;;  %v6422_v42 = vadd.f32 %v6390_v31, %v6321_v17  ;;  %v6593_v34 = vmul.f32 %v13199_v28, %v13560_v16 }
 0x627   : > { %v6423_v15 = vadd.f32 %v6391_v14, %v6322_v24  ;;  %v6594_v50 = vmul.f32 %v13199_v28, %v13566_v59  ;;  %v6694_v53 = vmul.f32 %v13132_v36, %v14236_v18  ;;  %v6695_v46 = vmul.f32 %v13132_v36, %v14237_v12  ;;  %v6052_v18 = vld [vmem:[#allocation3 + $0x88] sm:$0xff] }
 0x628   : > { %10407 = vmatpush3.bf16.xpose.msra.mxu0 %v10406_v37  ;;  %v6641_v49 = vadd.f32 %v6609_v9, %v6539_v27  ;;  %v6642_v47 = vadd.f32 %v6610_v63, %v6540_v11  ;;  %v6523_v60 = vadd.f32 %v6491_v10, %v6422_v42  ;;  %v6795_v52 = vmul.f32 %v13187_v5, %v13574_v56  ;;  %v13606_v11 = vld [vmem:[#allocation3 + $0x1c7] sm:$0xff] }
 0x629   : > { %v6524_v3 = vadd.f32 %v6492_v29, %v6423_v15  ;;  %v6796_v37 = vmul.f32 %v13187_v5, %v13578_v35  ;;  %v6036_v38 = vmul.f32 %v13097_v43, %v13473_v54  ;;  %v6037_v23 = vmul.f32 %v13097_v43, %v13475_v6 }
 0x62a   : > { %v6742_v25 = vadd.f32 %v6710_v2, %v6641_v49  ;;  %v6743_v44 = vadd.f32 %v6711_v19, %v6642_v47  ;;  %v6625_v17 = vadd.f32 %v6593_v34, %v6523_v60  ;;  %v6105_v9 = vmul.f32 %v13107_v48, %v13404_v62 }
 0x62b   : > { %v6626_v63 = vadd.f32 %v6594_v50, %v6524_v3  ;;  %v6106_v1 = vmul.f32 %v13107_v48, %v13398_v32  ;;  %v6206_v31 = vmul.f32 %v13116_v0, %v13488_v8  ;;  %v6207_v24 = vmul.f32 %v13116_v0, %v13490_v41  ;;  %v13608_v8 = vld [vmem:[#allocation3 + $0x1cf] sm:$0xff] }
 0x62c   : > { %v6843_v54 = vadd.f32 %v6811_v40, %v6742_v25  ;;  %v6844_v20 = vadd.f32 %v6812_v51, %v6743_v44  ;;  %v6726_v14 = vadd.f32 %v6694_v53, %v6625_v17  ;;  %v6137_v6 = vadd.f32 %v6105_v9, %v6036_v38  ;;  %v6053_v53 = vld [vmem:[#allocation3 + $0x90] sm:$0xff] }
 0x62d   : > { %v6727_v2 = vadd.f32 %v6695_v46, %v6626_v63  ;;  %v6138_v19 = vadd.f32 %v6106_v1, %v6037_v23  ;;  %v6307_v10 = vmul.f32 %v13149_v30, %v13523_v13  ;;  %v6308_v62 = vmul.f32 %v13149_v30, %v13529_v45  ;;  %v13628_v38 = vld [vmem:[#allocation3 + $0x1c9] sm:$0xff]  ;;  %v13630_v23 = vld [vmem:[#allocation3 + $0x1d1] sm:$0xff] }
 0x62e   : > { %v10408_v29 = vpack.c.bf16 %v6844_v20, %v6843_v54  ;;  %v6827_v32 = vadd.f32 %v6795_v52, %v6726_v14  ;;  %v6238_v27 = vadd.f32 %v6206_v31, %v6137_v6  ;;  %v6408_v51 = vmul.f32 %v13126_v21, %v13422_v39  ;;  %v14238_v52 = vld [vmem:[#allocation11_spill] sm:$0xff]  ;;  %v13648_v20 = vld [vmem:[#allocation3 + $0xc7] sm:$0xff] }
 0x62f   : > { %v6828_v41 = vadd.f32 %v6796_v37, %v6727_v2  ;;  %v6239_v40 = vadd.f32 %v6207_v24, %v6138_v19  ;;  %v6409_v34 = vmul.f32 %v13126_v21, %v13418_v55  ;;  %v6509_v15 = vmul.f32 %v13137_v22, %v13538_v61  ;;  %v13644_v31 = vld [vmem:[#allocation3 + $0xb0] sm:$0xff] }
 0x630   : > { %10409 = vmatprep.subr.bf16.mxu0 %v10408_v29  ;;  %v6339_v42 = vadd.f32 %v6307_v10, %v6238_v27  ;;  %v6510_v50 = vmul.f32 %v13137_v22, %v13544_v58  ;;  %v6611_v49 = vmul.f32 %v13199_v28, %v13606_v11  ;;  %v6612_v39 = vmul.f32 %v13199_v28, %v13608_v8  ;;  %v13656_v2 = vld [vmem:[#allocation3 + $0xcf] sm:$0xff] }
 0x631   : > { %v10410_v12 = vpack.c.bf16 %v6828_v41, %v6827_v32  ;;  %v6340_v46 = vadd.f32 %v6308_v62, %v6239_v40  ;;  %v6712_v55 = vmul.f32 %v13132_v36, %v13453_v33  ;;  %v6713_v60 = vmul.f32 %v13132_v36, %v13446_v4  ;;  %v13636_v33 = vld [vmem:[#allocation3 + $0xa8] sm:$0xff]  ;;  %v13662_v27 = vld [vmem:[#allocation3 + $0xd0] sm:$0xff] }
 0x632   : > { %v6440_v47 = vadd.f32 %v6408_v51, %v6339_v42  ;;  %v6020_v3 = vmul.f32 %v13097_v43, %v14238_v52  ;;  %v6021_v25 = vmul.f32 %v13097_v43, %v14229_v7  ;;  %v6089_v44 = vmul.f32 %v13107_v48, %v6052_v18  ;;  %v13660_v32 = vld [vmem:[#allocation3 + $0xc8] sm:$0xff] }
 0x633   : > { %10411 = vmatpush3.bf16.xpose.msra.mxu0 %v10410_v12  ;;  %v6441_v37 = vadd.f32 %v6409_v34, %v6340_v46  ;;  %v6090_v17 = vmul.f32 %v13107_v48, %v6053_v53  ;;  %v6190_v4 = vmul.f32 %v13116_v0, %v14234_v57  ;;  %v6191_v63 = vmul.f32 %v13116_v0, %v14235_v26  ;;  %v13672_v18 = vld [vmem:[#allocation3 + $0xc9] sm:$0xff] }
 0x634   : > { %v6541_v9 = vadd.f32 %v6509_v15, %v6440_v47  ;;  %v6291_v1 = vmul.f32 %v13149_v30, %v13560_v16  ;;  %v6121_v7 = vadd.f32 %v6089_v44, %v6020_v3  ;;  %v6292_v48 = vmul.f32 %v13149_v30, %v13566_v59  ;;  %v6070_v53 = vld [vmem:[#allocation3 + $0x1a8] sm:$0xff]  ;;  %v6071_v12 = vld [vmem:[#allocation3 + $0x1b0] sm:$0xff]  ;;  %v13683_v3 = vld [vmem:[%s14000_s5] ss:$0 sm:$0xff] }
 0x635   : > { %v6542_v24 = vadd.f32 %v6510_v50, %v6441_v37  ;;  %v6122_v54 = vadd.f32 %v6090_v17, %v6021_v25  ;;  %v6813_v57 = vmul.f32 %v13187_v5, %v13628_v38  ;;  %v6814_v26 = vmul.f32 %v13187_v5, %v13630_v23  ;;  %v13687_v25 = vld [vmem:[#allocation3 + $0xd1] sm:$0xff] }
 0x636   : > { %v6643_v14 = vadd.f32 %v6611_v49, %v6541_v9  ;;  %v6392_v6 = vmul.f32 %v13126_v21, %v13636_v33  ;;  %v6222_v10 = vadd.f32 %v6190_v4, %v6121_v7  ;;  %v6393_v29 = vmul.f32 %v13126_v21, %v13644_v31  ;;  %v13700_v9 = vld [vmem:[#allocation3 + $0x1c8] sm:$0xff]  ;;  %v13709_v7 = vld [vmem:[#allocation3 + $0x1d0] sm:$0xff] }
 0x637   : > { %v6644_v19 = vadd.f32 %v6612_v39, %v6542_v24  ;;  %v6223_v62 = vadd.f32 %v6191_v63, %v6122_v54  ;;  %v6493_v40 = vmul.f32 %v13137_v22, %v13574_v56  ;;  %v6494_v51 = vmul.f32 %v13137_v22, %v13578_v35 }
 0x638   : > { %v6744_v41 = vadd.f32 %v6712_v55, %v6643_v14  ;;  %v6595_v42 = vmul.f32 %v13199_v28, %v13648_v20  ;;  %v6323_v15 = vadd.f32 %v6291_v1, %v6222_v10  ;;  %v6596_v21 = vmul.f32 %v13199_v28, %v13656_v2  ;;  %v13705_v1 = vld [vmem:[%s14000_s5 + $0x2] ss:$0 sm:$0xff]  ;;  %v13715_v14 = vld [vmem:[#allocation3 + $0x1e7] sm:$0xff]  ;;  %v13726_v10 = vld [vmem:[#allocation3 + $0x1ef] sm:$0xff] }
 0x639   : > { %v6745_v34 = vadd.f32 %v6713_v60, %v6644_v19  ;;  %v6324_v50 = vadd.f32 %v6292_v48, %v6223_v62  ;;  %v6696_v49 = vmul.f32 %v13132_v36, %v13660_v32  ;;  %v6697_v39 = vmul.f32 %v13132_v36, %v13662_v27  ;;  %v13728_v62 = vld [vmem:[#allocation3 + $0x1e8] sm:$0xff] }
 0x63a   : > { %v6845_v46 = vadd.f32 %v6813_v57, %v6744_v41  ;;  %v6038_v47 = vmul.f32 %v13097_v43, %v13523_v13  ;;  %v6424_v60 = vadd.f32 %v6392_v6, %v6323_v15  ;;  %v6039_v37 = vmul.f32 %v13683_v3, %v13529_v45  ;;  %v13694_v43 = vld [vmem:[%s14000_s5 + $0x1] ss:$0 sm:$0xff]  ;;  %v13739_v15 = vld [vmem:[%s14000_s5 + $0x5] ss:$0 sm:$0xff] }
 0x63b   : > { %v6846_v55 = vadd.f32 %v6814_v26, %v6745_v34  ;;  %v6425_v52 = vadd.f32 %v6393_v29, %v6324_v50  ;;  %v6797_v44 = vmul.f32 %v13187_v5, %v13672_v18  ;;  %v6107_v36 = vmul.f32 %v13694_v43, %v6070_v53 }
 0x63c   : > { %v6108_v13 = vmul.f32 %v13694_v43, %v6071_v12  ;;  %v6208_v17 = vmul.f32 %v13116_v0, %v13538_v61  ;;  %v6525_v4 = vadd.f32 %v6493_v40, %v6424_v60  ;;  %v6209_v24 = vmul.f32 %v13705_v1, %v13544_v58  ;;  %v13722_v58 = vld [vmem:[%s14000_s5 + $0x4] ss:$0 sm:$0xff] }
 0x63d   : > { %v10412_v45 = vpack.c.bf16 %v6846_v55, %v6845_v46  ;;  %v6526_v63 = vadd.f32 %v6494_v51, %v6425_v52  ;;  %v6139_v54 = vadd.f32 %v6107_v36, %v6038_v47  ;;  %v6309_v0 = vmul.f32 %v13149_v30, %v13606_v11  ;;  %v13734_v51 = vld [vmem:[#allocation3 + $0x1f0] sm:$0xff]  ;;  %v13750_v46 = vld [vmem:[%s14000_s5 + $0x7] ss:$0 sm:$0xff] }
 0x63e   : > { %v6140_v48 = vadd.f32 %v6108_v13, %v6039_v37  ;;  %v6310_v61 = vmul.f32 %v13149_v30, %v13608_v8  ;;  %v6627_v57 = vadd.f32 %v6595_v42, %v6525_v4  ;;  %v6798_v6 = vmul.f32 %v13187_v5, %v13687_v25  ;;  %v13760_v36 = vld [vmem:[#allocation3 + $0x1f1] sm:$0xff] }
 0x63f   : > { %10413 = vmatprep.subr.bf16.mxu0 %v10412_v45  ;;  %v6628_v26 = vadd.f32 %v6596_v21, %v6526_v63  ;;  %v6410_v19 = vmul.f32 %v13722_v58, %v13700_v9  ;;  %v6240_v30 = vadd.f32 %v6208_v17, %v6139_v54  ;;  %v6411_v41 = vmul.f32 %v13722_v58, %v13709_v7 }
 0x640   : > { %v6241_v29 = vadd.f32 %v6209_v24, %v6140_v48  ;;  %v6511_v40 = vmul.f32 %v13137_v22, %v13628_v38  ;;  %v6728_v42 = vadd.f32 %v6696_v49, %v6627_v57  ;;  %v6512_v50 = vmul.f32 %v13739_v15, %v13630_v23 }
 0x641   : > { %v6729_v34 = vadd.f32 %v6697_v39, %v6628_v26  ;;  %v6613_v21 = vmul.f32 %v13199_v28, %v13715_v14  ;;  %v6341_v53 = vadd.f32 %v6309_v0, %v6240_v30  ;;  %v6614_v22 = vmul.f32 %v13199_v28, %v13726_v10  ;;  %v13754_v39 = vld [vmem:[#allocation3 + $0x1e9] sm:$0xff] }
 0x642   : > { %v6342_v12 = vadd.f32 %v6310_v61, %v6241_v29  ;;  %v6714_v49 = vmul.f32 %v13750_v46, %v13728_v62  ;;  %v6829_v47 = vadd.f32 %v6797_v44, %v6728_v42  ;;  %v6715_v60 = vmul.f32 %v13750_v46, %v13734_v51  ;;  %v13790_v61 = vld [vmem:[#allocation3 + $0xe7] sm:$0xff]  ;;  %v13794_v30 = vld [vmem:[#allocation3 + $0xef] sm:$0xff] }
 0x643   : > { %v6830_v55 = vadd.f32 %v6798_v6, %v6729_v34  ;;  %v6022_v52 = vmul.f32 %v13683_v3, %v13560_v16  ;;  %v6442_v37 = vadd.f32 %v6410_v19, %v6341_v53  ;;  %v6023_v13 = vmul.f32 %v13683_v3, %v13566_v59  ;;  %v13775_v59 = vld [vmem:[%s14000_s5 + $0x3] ss:$0 sm:$0xff]  ;;  %v13796_v29 = vld [vmem:[#allocation3 + $0xe8] sm:$0xff] }
 0x644   : > { %v6443_v28 = vadd.f32 %v6411_v41, %v6342_v12  ;;  %v6091_v17 = vmul.f32 %v13694_v43, %v13636_v33  ;;  %v6815_v44 = vmul.f32 %v13187_v5, %v13754_v39  ;;  %v6092_v4 = vmul.f32 %v13694_v43, %v13644_v31  ;;  %v13782_v5 = vld [vmem:[%s14000_s5 + $0x8] ss:$0 sm:$0xff]  ;;  %v13798_v41 = vld [vmem:[#allocation3 + $0xf0] sm:$0xff]  ;;  %v13809_v12 = vld [vmem:[%s14000_s5 + $0x6] ss:$0 sm:$0xff] }
 0x645   : > { %v10414_v45 = vpack.c.bf16 %v6830_v55, %v6829_v47  ;;  %v6192_v16 = vmul.f32 %v13705_v1, %v13574_v56  ;;  %v6543_v63 = vadd.f32 %v6511_v40, %v6442_v37  ;;  %v6293_v33 = vmul.f32 %v13775_v59, %v13648_v20 }
 0x646   : > { %v6544_v24 = vadd.f32 %v6512_v50, %v6443_v28  ;;  %v6123_v54 = vadd.f32 %v6091_v17, %v6022_v52  ;;  %v6816_v56 = vmul.f32 %v13782_v5, %v13760_v36  ;;  %v6124_v31 = vadd.f32 %v6092_v4, %v6023_v13  ;;  %v13823_v4 = vld [vmem:[#allocation3 + $0xf1] sm:$0xff] }
 0x647   : > { %10415 = vmatpush3.bf16.xpose.msra.mxu0 %v10414_v45  ;;  %v6193_v48 = vmul.f32 %v13705_v1, %v13578_v35  ;;  %v6294_v0 = vmul.f32 %v13775_v59, %v13656_v2  ;;  %v6645_v57 = vadd.f32 %v6613_v21, %v6543_v63  ;;  %v6394_v19 = vmul.f32 %v13722_v58, %v13660_v32  ;;  %v13821_v45 = vld [vmem:[#allocation3 + $0xe9] sm:$0xff] }
 0x648   : > { %v6646_v26 = vadd.f32 %v6614_v22, %v6544_v24  ;;  %v6224_v6 = vadd.f32 %v6192_v16, %v6123_v54  ;;  %v6395_v35 = vmul.f32 %v13722_v58, %v13662_v27  ;;  %v6495_v42 = vmul.f32 %v13739_v15, %v13672_v18 }
 0x649   : > { %v6225_v40 = vadd.f32 %v6193_v48, %v6124_v31  ;;  %v6496_v34 = vmul.f32 %v13739_v15, %v13687_v25  ;;  %v6746_v50 = vadd.f32 %v6714_v49, %v6645_v57  ;;  %v6597_v22 = vmul.f32 %v13809_v12, %v13790_v61  ;;  %v13843_v57 = vld [vmem:[#allocation3 + $0x207] sm:$0xff] }
 0x64a   : > { %v6747_v21 = vadd.f32 %v6715_v60, %v6646_v26  ;;  %v6325_v53 = vadd.f32 %v6293_v33, %v6224_v6  ;;  %v6598_v55 = vmul.f32 %v13809_v12, %v13794_v30  ;;  %v6698_v52 = vmul.f32 %v13750_v46, %v13796_v29 }
 0x64b   : > { %v6326_v47 = vadd.f32 %v6294_v0, %v6225_v40  ;;  %v6699_v49 = vmul.f32 %v13750_v46, %v13798_v41  ;;  %v6847_v60 = vadd.f32 %v6815_v44, %v6746_v50  ;;  %v6040_v13 = vmul.f32 %v13683_v3, %v13606_v11  ;;  %v13847_v40 = vld [vmem:[#allocation3 + $0x20f] sm:$0xff] }
 0x64c   : > { %v6848_v37 = vadd.f32 %v6816_v56, %v6747_v21  ;;  %v6426_v28 = vadd.f32 %v6394_v19, %v6325_v53  ;;  %v6041_v16 = vmul.f32 %v13683_v3, %v13608_v8  ;;  %v6109_v63 = vmul.f32 %v13694_v43, %v13700_v9 }
 0x64d   : > { %v6427_v17 = vadd.f32 %v6395_v35, %v6326_v47  ;;  %v6110_v24 = vmul.f32 %v13694_v43, %v13709_v7  ;;  %v6210_v33 = vmul.f32 %v13705_v1, %v13628_v38  ;;  %v6211_v11 = vmul.f32 %v13705_v1, %v13630_v23  ;;  %v13849_v35 = vld [vmem:[#allocation3 + $0x208] sm:$0xff] }
 0x64e   : > { %v10416_v44 = vpack.c.bf16 %v6848_v37, %v6847_v60  ;;  %v6527_v54 = vadd.f32 %v6495_v42, %v6426_v28  ;;  %v6141_v31 = vadd.f32 %v6109_v63, %v6040_v13  ;;  %v6311_v8 = vmul.f32 %v13775_v59, %v13715_v14  ;;  %v13851_v42 = vld [vmem:[#allocation3 + $0x210] sm:$0xff] }
 0x64f   : > { %v6528_v56 = vadd.f32 %v6496_v34, %v6427_v17  ;;  %v6142_v48 = vadd.f32 %v6110_v24, %v6041_v16  ;;  %v6799_v9 = vmul.f32 %v13782_v5, %v13821_v45  ;;  %v6800_v7 = vmul.f32 %v13782_v5, %v13823_v4  ;;  %v13869_v24 = vld [vmem:[#allocation3 + $0x209] sm:$0xff] }
 0x650   : > { %10417 = vmatprep.subr.bf16.mxu0 %v10416_v44  ;;  %v6629_v0 = vadd.f32 %v6597_v22, %v6527_v54  ;;  %v6312_v38 = vmul.f32 %v13775_v59, %v13726_v10  ;;  %v6242_v26 = vadd.f32 %v6210_v33, %v6141_v31  ;;  %v6412_v19 = vmul.f32 %v13722_v58, %v13728_v62  ;;  %v13871_v44 = vld [vmem:[#allocation3 + $0x211] sm:$0xff] }
 0x651   : > { %v6630_v23 = vadd.f32 %v6598_v55, %v6528_v56  ;;  %v6243_v6 = vadd.f32 %v6211_v11, %v6142_v48  ;;  %v6413_v50 = vmul.f32 %v13722_v58, %v13734_v51  ;;  %v6513_v21 = vmul.f32 %v13739_v15, %v13754_v39 }
 0x652   : > { %v6730_v34 = vadd.f32 %v6698_v52, %v6629_v0  ;;  %v6514_v53 = vmul.f32 %v13739_v15, %v13760_v36  ;;  %v6343_v47 = vadd.f32 %v6311_v8, %v6242_v26  ;;  %v6615_v60 = vmul.f32 %v13809_v12, %v13843_v57 }
 0x653   : > { %v6731_v22 = vadd.f32 %v6699_v49, %v6630_v23  ;;  %v6344_v55 = vadd.f32 %v6312_v38, %v6243_v6  ;;  %v6616_v28 = vmul.f32 %v13809_v12, %v13847_v40  ;;  %v6716_v52 = vmul.f32 %v13750_v46, %v13849_v35  ;;  %v13891_v23 = vld [vmem:[#allocation3 + $0x107] sm:$0xff] }
 0x654   : > { %v6831_v37 = vadd.f32 %v6799_v9, %v6730_v34  ;;  %v6717_v13 = vmul.f32 %v13750_v46, %v13851_v42  ;;  %v6444_v16 = vadd.f32 %v6412_v19, %v6343_v47  ;;  %v6024_v49 = vmul.f32 %v13683_v3, %v13648_v20 }
 0x655   : > { %v6832_v17 = vadd.f32 %v6800_v7, %v6731_v22  ;;  %v6445_v63 = vadd.f32 %v6413_v50, %v6344_v55  ;;  %v6025_v54 = vmul.f32 %v13683_v3, %v13656_v2  ;;  %v6093_v33 = vmul.f32 %v13694_v43, %v13660_v32  ;;  %v13899_v50 = vld [vmem:[#allocation3 + $0x108] sm:$0xff] }
 0x656   : > { %v6094_v11 = vmul.f32 %v13694_v43, %v13662_v27  ;;  %v6194_v56 = vmul.f32 %v13705_v1, %v13672_v18  ;;  %v6545_v48 = vadd.f32 %v6513_v21, %v6444_v16  ;;  %v6195_v20 = vmul.f32 %v13705_v1, %v13687_v25  ;;  %v13893_v25 = vld [vmem:[#allocation3 + $0x10f] sm:$0xff] }
 0x657   : > { %v10418_v31 = vpack.c.bf16 %v6832_v17, %v6831_v37  ;;  %v6546_v8 = vadd.f32 %v6514_v53, %v6445_v63  ;;  %v6125_v0 = vadd.f32 %v6093_v33, %v6024_v49  ;;  %v6295_v2 = vmul.f32 %v13775_v59, %v13790_v61  ;;  %v13901_v21 = vld [vmem:[#allocation3 + $0x110] sm:$0xff] }
 0x658   : > { %v6126_v9 = vadd.f32 %v6094_v11, %v6025_v54  ;;  %v6296_v32 = vmul.f32 %v13775_v59, %v13794_v30  ;;  %v6647_v7 = vadd.f32 %v6615_v60, %v6545_v48  ;;  %v6817_v18 = vmul.f32 %v13782_v5, %v13869_v24  ;;  %v13911_v16 = vld [vmem:[#allocation3 + $0x109] sm:$0xff]  ;;  %v13921_v48 = vld [vmem:[#allocation3 + $0x111] sm:$0xff] }
 0x659   : > { %10419 = vmatpush3.bf16.xpose.msra.mxu0 %v10418_v31  ;;  %v6648_v27 = vadd.f32 %v6616_v28, %v6546_v8  ;;  %v6818_v38 = vmul.f32 %v13782_v5, %v13871_v44  ;;  %v6226_v26 = vadd.f32 %v6194_v56, %v6125_v0  ;;  %v6396_v19 = vmul.f32 %v13722_v58, %v13796_v29 }
 0x65a   : > { %v6227_v6 = vadd.f32 %v6195_v20, %v6126_v9  ;;  %v6397_v34 = vmul.f32 %v13722_v58, %v13798_v41  ;;  %v6748_v53 = vadd.f32 %v6716_v52, %v6647_v7  ;;  %v6497_v47 = vmul.f32 %v13739_v15, %v13821_v45 }
 0x65b   : > { %v6749_v22 = vadd.f32 %v6717_v13, %v6648_v27  ;;  %v6498_v55 = vmul.f32 %v13739_v15, %v13823_v4  ;;  %v6327_v60 = vadd.f32 %v6295_v2, %v6226_v26  ;;  %v6599_v28 = vmul.f32 %v13809_v12, %v13891_v23 }
 0x65c   : > { %v6328_v37 = vadd.f32 %v6296_v32, %v6227_v6  ;;  %v6600_v17 = vmul.f32 %v13809_v12, %v13893_v25  ;;  %v6849_v63 = vadd.f32 %v6817_v18, %v6748_v53  ;;  %v6700_v52 = vmul.f32 %v13750_v46, %v13899_v50  ;;  %v6580_v18 = vld [vmem:[#allocation3 + $0x227] sm:$0xff]  ;;  %v6581_v6 = vld [vmem:[#allocation3 + $0x22f] sm:$0xff] }
 0x65d   : > { %v6850_v49 = vadd.f32 %v6818_v38, %v6749_v22  ;;  %v6701_v13 = vmul.f32 %v13750_v46, %v13901_v21  ;;  %v6428_v54 = vadd.f32 %v6396_v19, %v6327_v60  ;;  %v6042_v11 = vmul.f32 %v13683_v3, %v13715_v14 }
 0x65e   : > { %v6429_v33 = vadd.f32 %v6397_v34, %v6328_v37  ;;  %v6043_v56 = vmul.f32 %v13683_v3, %v13726_v10  ;;  %v6801_v8 = vmul.f32 %v13782_v5, %v13911_v16  ;;  %v6111_v20 = vmul.f32 %v13694_v43, %v13728_v62  ;;  %v10978_v37 = vld [vmem:[#allocation2] sm:$0xff] }
 0x65f   : > { %v10420_v31 = vpack.c.bf16 %v6850_v49, %v6849_v63  ;;  %v6112_v0 = vmul.f32 %v13694_v43, %v13734_v51  ;;  %v6529_v9 = vadd.f32 %v6497_v47, %v6428_v54  ;;  %v6212_v14 = vmul.f32 %v13705_v1, %v13754_v39 }
 0x660   : > { %v6530_v2 = vadd.f32 %v6498_v55, %v6429_v33  ;;  %v6213_v10 = vmul.f32 %v13705_v1, %v13760_v36  ;;  %v6143_v32 = vadd.f32 %v6111_v20, %v6042_v11  ;;  %v6313_v27 = vmul.f32 %v13775_v59, %v13843_v57 }
 0x661   : > { %10421 = vmatprep.subr.bf16.mxu0 %v10420_v31  ;;  %v6144_v7 = vadd.f32 %v6112_v0, %v6043_v56  ;;  %v6314_v62 = vmul.f32 %v13775_v59, %v13847_v40  ;;  %v6631_v38 = vadd.f32 %v6599_v28, %v6529_v9  ;;  %v6802_v26 = vmul.f32 %v13782_v5, %v13921_v48 }
 0x662   : > { %v6632_v51 = vadd.f32 %v6600_v17, %v6530_v2  ;;  %v6414_v39 = vmul.f32 %v13722_v58, %v13849_v35  ;;  %v6244_v36 = vadd.f32 %v6212_v14, %v6143_v32  ;;  %v6415_v34 = vmul.f32 %v13722_v58, %v13851_v42 }
 0x663   : > { %v6245_v19 = vadd.f32 %v6213_v10, %v6144_v7  ;;  %v6515_v57 = vmul.f32 %v13739_v15, %v13869_v24  ;;  %v6732_v53 = vadd.f32 %v6700_v52, %v6631_v38  ;;  %v6516_v22 = vmul.f32 %v13739_v15, %v13871_v44  ;;  %v6782_v44 = vld [vmem:[#allocation3 + $0x229] sm:$0xff] }
 0x664   : > { %v6733_v40 = vadd.f32 %v6701_v13, %v6632_v51  ;;  %v6617_v47 = vmul.f32 %v13809_v12, %v6580_v18  ;;  %v6345_v55 = vadd.f32 %v6313_v27, %v6244_v36  ;;  %v6618_v35 = vmul.f32 %v13809_v12, %v6581_v6  ;;  %v6783_v13 = vld [vmem:[#allocation3 + $0x231] sm:$0xff]  ;;  %v6564_v7 = vld [vmem:[#allocation3 + $0x127] sm:$0xff] }
 0x665   : > { %v6346_v60 = vadd.f32 %v6314_v62, %v6245_v19  ;;  %v6718_v28 = vmul.f32 %v10978_v37, %v13750_v46  ;;  %v6833_v17 = vadd.f32 %v6801_v8, %v6732_v53  ;;  %v6026_v42 = vmul.f32 %v13683_v3, %v13790_v61 }
 0x666   : > { %v6834_v63 = vadd.f32 %v6802_v26, %v6733_v40  ;;  %v6027_v24 = vmul.f32 %v13683_v3, %v13794_v30  ;;  %v6446_v49 = vadd.f32 %v6414_v39, %v6345_v55  ;;  %v6095_v54 = vmul.f32 %v13694_v43, %v13796_v29  ;;  %v6666_v26 = vld [vmem:[#allocation3 + $0x130] sm:$0xff] }
 0x667   : > { %v6447_v52 = vadd.f32 %v6415_v34, %v6346_v60  ;;  %v6096_v33 = vmul.f32 %v13694_v43, %v13798_v41  ;;  %v6196_v56 = vmul.f32 %v13705_v1, %v13821_v45  ;;  %v6197_v61 = vmul.f32 %v13705_v1, %v13823_v4  ;;  %v6767_v34 = vld [vmem:[#allocation3 + $0x131] sm:$0xff] }
 0x668   : > { %v10422_v11 = vpack.c.bf16 %v6834_v63, %v6833_v17  ;;  %v6297_v3 = vmul.f32 %v13775_v59, %v13891_v23  ;;  %v6547_v30 = vadd.f32 %v6515_v57, %v6446_v49  ;;  %v6127_v8 = vadd.f32 %v6095_v54, %v6026_v42 }
 0x669   : > { %v6548_v31 = vadd.f32 %v6516_v22, %v6447_v52  ;;  %v6128_v20 = vadd.f32 %v6096_v33, %v6027_v24  ;;  %v6819_v29 = vmul.f32 %v13782_v5, %v6782_v44  ;;  %v6820_v0 = vmul.f32 %v13782_v5, %v6783_v13 }
 0x66a   : > { %10423 = vmatpush3.bf16.xpose.msra.mxu0 %v10422_v11  ;;  %v6298_v43 = vmul.f32 %v13775_v59, %v13893_v25  ;;  %v6649_v41 = vadd.f32 %v6617_v47, %v6547_v30  ;;  %v6228_v9 = vadd.f32 %v6196_v56, %v6127_v8  ;;  %v6398_v1 = vmul.f32 %v13722_v58, %v13899_v50  ;;  %v6565_v25 = vld [vmem:[#allocation3 + $0x12f] sm:$0xff] }
 0x66b   : > { %v6650_v45 = vadd.f32 %v6618_v35, %v6548_v31  ;;  %v6229_v2 = vadd.f32 %v6197_v61, %v6128_v20  ;;  %v6399_v4 = vmul.f32 %v13722_v58, %v13901_v21  ;;  %v6499_v27 = vmul.f32 %v13739_v15, %v13911_v16  ;;  %v6665_v21 = vld [vmem:[#allocation3 + $0x128] sm:$0xff] }
 0x66c   : > { %v6750_v23 = vadd.f32 %v6718_v28, %v6649_v41  ;;  %v6329_v10 = vadd.f32 %v6297_v3, %v6228_v9  ;;  %v6500_v59 = vmul.f32 %v13739_v15, %v13921_v48  ;;  %v11004_v50 = vmov 1.0   ;;  %v6766_v16 = vld [vmem:[#allocation3 + $0x129] sm:$0xff] }
 0x66d   : > { %v6751_v14 = vadd.f32 %v6718_v28, %v6650_v45  ;;  %v6330_v32 = vadd.f32 %v6298_v43, %v6229_v2  ;;  %8378 = vmatprep.mubr.f32.mxu0 %v11004_v50  ;;  %v6601_v58 = vmul.f32 %v13809_v12, %v6564_v7  ;;  %v6602_v19 = vmul.f32 %v13809_v12, %v6565_v25 }
 0x66e   : > { %v6851_v62 = vadd.f32 %v6819_v29, %v6750_v23  ;;  %v6430_v38 = vadd.f32 %v6398_v1, %v6329_v10  ;;  %v6702_v57 = vmul.f32 %v13750_v46, %v6665_v21  ;;  %v6703_v53 = vmul.f32 %v13750_v46, %v6666_v26 }
 0x66f   : > { %v6852_v18 = vadd.f32 %v6820_v0, %v6751_v14  ;;  %v6431_v51 = vadd.f32 %v6399_v4, %v6330_v32  ;;  %v6803_v47 = vmul.f32 %v13782_v5, %v6766_v16  ;;  %v6804_v55 = vmul.f32 %v13782_v5, %v6767_v34 }
 0x670   : > { %v6531_v6 = vadd.f32 %v6499_v27, %v6430_v38  ;;  %v11005_v12 = vmov 1966171168   ;;  %v6932_v17 = vlaneseq  ;;  %v6854_v63 = vstv %s6853_s21 }
 0x671   : > { %v10424_v39 = vpack.c.bf16 %v6852_v18, %v6851_v62  ;;  %v6532_v36 = vadd.f32 %v6500_v59, %v6431_v51  ;;  %v6930_v28 = vunpack.c.l.s4 %v11005_v12 }
 0x672   : > { %v6633_v15 = vadd.f32 %v6601_v58, %v6531_v6  ;;  %v6933_v24 = vshrl.u32 %v6932_v17, 7  ;;  %vm6946_vm0 = vcmp.lt.s32.totalorder %v6932_v17, 256 }
 0x673   : > { %10425 = vmatprep.subr.bf16.mxu0 %v10424_v39  ;;  %v6634_v48 = vadd.f32 %v6602_v19, %v6532_v36  ;;  %v6931_v42 = vunpack.c.0.s8 %v6930_v28 }
 0x674   : > { %v6734_v40 = vadd.f32 %v6702_v57, %v6633_v15 }
 0x675   : > { %v6735_v22 = vadd.f32 %v6703_v53, %v6634_v48  ;;  %v6934_v13 = vsub.s32 %v6931_v42, %v6933_v24 }
 0x676   : > { %v6835_v60 = vadd.f32 %v6803_v47, %v6734_v40 }
 0x677   : > { %v6836_v35 = vadd.f32 %v6804_v55, %v6735_v22 }
 0x679   : > { %v10426_v37 = vpack.c.bf16 %v6836_v35, %v6835_v60 }
 0x67b   : > { %10427 = vmatpush3.bf16.xpose.msra.mxu0 %v10426_v37 }
 0x682   : > { %8379 = vmatmul.mubr.f32.vlgmr.msra.gmra.mrb[32].mxu0 %v11004_v50 }
 0x755   : > { %v6921_v46 = vpop.f32.mrb[32].mxu0 }
 0x756   : > { %v6922_v49 = vadd.f32 %v6921_v46, %v6854_v63  ;;  %v6923_v52 = vpop.f32.mrb[33].mxu0 }
 0x757   : > { %v6924_v44 = vadd.f32 %v6923_v52, %v6854_v63 }
 0x759   : > { %v6928_v5 = vcombine.low %v6922_v49, %v6924_v44 }
 0x75b   : > { %v6935_v54 = vrot.slane %v6928_v5, %v6934_v13 }
 0x75d   : > { %v6942_v33 = vrot.slane %v6935_v54, %v6934_v13 }
 0x75f   : > { %6948 = vst.msk [vmem:[%s300_s25] sm:$0x3] %vm6946_vm0, %v6942_v33 }
 0x760 PF: > { %s18_s28 = sadd.s32 1, %s11001_s28   ;;  %s14239_s26 = smov %s10997_s27 }
 0x761   : > { %p15_p5 = scmp.ge.s32.totalorder %s18_s28, 4   ;;  %s14240_s27 = smov %s14242_s6 }
 0x763   :  { %17 = sbr.rel (!%p15_p5) target bundleno = 2 (0x2), region = 104 }

</bundles_post_ra>
